<compile_context>
chip_gen: v5e
topology: v5e:2x2
jax: 0.10.0
libtpu: 0.0.40
codegen_flags: <defaults>
</compile_context>

<pallas_src>
import numpy as np
import jax
import jax.numpy as jnp
from jax.experimental import pallas as pl
from jax.experimental.pallas import tpu as pltpu

EPS = 1e-5
_PAD = 32  # zero guard rows above/below the VMEM activation strip (max dilated offset)


# ------------------------------- fused kernel ------------------------------ #

def _wdcnn_kernel(x_ref, w1_ref, s1_ref, w2_ref, s2_ref, w3_ref, s3_ref,
                  w4_ref, s4_ref, w5_ref, s5_ref, wf1_ref, sf1_ref,
                  wf2_ref, bf2_ref, o_ref, buf_ref):
    """Whole WDCNN forward for one batch tile (TB samples), activations in VMEM.

    buf_ref: (TB*128 + 64, 64) f32 scratch.  Rows [_PAD, _PAD + TB*128) hold the current
    activation; each sample owns 128 consecutive rows.  Layer n (dilation d = 2**(n-1))
    stores the value of its pooled output position m at in-sample row p = 2*d*m; rows in
    between hold quarantined garbage that later layers never read at valid positions.
    """
    f32 = jnp.float32
    TB = o_ref.shape[0]
    N = TB * 128

    def dot(a, b):
        return jnp.dot(a, b, preferred_element_type=f32)

    def rd(off, c):
        # activation strip shifted by `off` rows; guard rows read as zero.
        return buf_ref[_PAD + off:_PAD + off + N, 0:c]

    # Deterministic scratch contents (guard rows = 0), rewritten every grid step.
    buf_ref[...] = jnp.zeros((N + 2 * _PAD, 64), f32)

    # Row position inside each sample's 128-row block (for "same"-padding masks).
    pos = jax.lax.broadcasted_iota(jnp.int32, (N, 1), 0) % 128

    # ------------- layer 1: Conv1d(1,16,k=64,s=16,p=24) + BN + ReLU + MaxPool(2) -------------
    # Wrapper delivers the zero-padded signal reshaped to (131, 16); tap block j of the
    # stride-16 conv is rows [j, j+128) of that view, so the conv is 4 accumulating matmuls.
    w1 = w1_ref[...]                       # (64, 16)  k-major, BN scale folded in
    s1 = s1_ref[...]                       # (1, 16)
    for b in range(TB):
        acc = dot(x_ref[b, 0:128, :], w1[0:16, :])
        for j in range(1, 4):
            acc = acc + dot(x_ref[b, j:j + 128, :], w1[16 * j:16 * (j + 1), :])
        yb = jnp.maximum(acc + s1, 0.0)    # (128, 16)
        buf_ref[_PAD + 128 * b:_PAD + 128 * (b + 1), 0:16] = yb
    y = rd(0, 16)
    r = jnp.maximum(y, rd(1, 16))          # pool pairs (2m, 2m+1) -> valid at p % 2 == 0
    buf_ref[_PAD:_PAD + N, 0:16] = r

    # ------------- layers 2-4: Conv1d(k=3,s=1,p=1) + BN + ReLU + MaxPool(2), dilated ----------
    def conv3_same(w_ref_, s_ref_, cin, cout, d):
        w = w_ref_[...]                    # (3*cin, cout)  rows ordered (tap k, channel)
        s = s_ref_[...]                    # (1, cout)
        t_prev = jnp.where(pos < d, 0.0, rd(-d, cin))           # left "same" pad / sample edge
        t_ctr = rd(0, cin)
        t_next = jnp.where(pos >= 128 - d, 0.0, rd(d, cin))     # right "same" pad / sample edge
        yl = (dot(t_prev, w[0:cin, :])
              + dot(t_ctr, w[cin:2 * cin, :])
              + dot(t_next, w[2 * cin:3 * cin, :]))
        yl = jnp.maximum(yl + s, 0.0)
        buf_ref[_PAD:_PAD + N, 0:cout] = yl
        rl = jnp.maximum(yl, rd(d, cout))  # MaxPool(2,2) on the dilated grid
        buf_ref[_PAD:_PAD + N, 0:cout] = rl

    conv3_same(w2_ref, s2_ref, 16, 32, 2)
    conv3_same(w3_ref, s3_ref, 32, 64, 4)
    conv3_same(w4_ref, s4_ref, 64, 64, 8)  # PyTorch order conv,BN,pool,ReLU == conv,BN,ReLU,pool

    # ------------- layer 5: Conv1d(64,64,k=3,s=1,p=0) + BN + ReLU + MaxPool(2) ----------------
    w5 = w5_ref[...]                       # (192, 64)
    s5 = s5_ref[...]
    y5 = (dot(rd(0, 64), w5[0:64, :])
          + dot(rd(16, 64), w5[64:128, :])
          + dot(rd(32, 64), w5[128:192, :]))
    y5 = jnp.maximum(y5 + s5, 0.0)
    buf_ref[_PAD:_PAD + N, 0:64] = y5
    r5 = jnp.maximum(y5, rd(16, 64))       # valid at in-sample rows 0, 32, 64 (flatten positions)

    # ------------- head: channel-major flatten + Linear(192,100)+BN+ReLU + Linear(100,ncls) ---
    # The flatten permutation is pre-folded into wf1 (shape (3, 64, 100)), so fc1 is just a
    # sum over the 3 surviving positions.
    wf1 = [wf1_ref[j] for j in range(3)]   # (64, 100) each, BN scale folded in
    sf1 = sf1_ref[...]                     # (1, 100)
    wf2 = wf2_ref[...]                     # (100, ncls)
    bf2 = bf2_ref[...]                     # (1, ncls)
    for b in range(TB):
        base = 128 * b
        h = (dot(r5[base:base + 1, :], wf1[0])
             + dot(r5[base + 32:base + 33, :], wf1[1])
             + dot(r5[base + 64:base + 65, :], wf1[2]))
        h = jnp.maximum(h + sf1, 0.0)
        o_ref[b:b + 1, :] = (dot(h, wf2) + bf2).astype(o_ref.dtype)


# ------------------------------ wrapper / glue ------------------------------ #

def _fold_conv(p):
    """PyTorch (Cout,Cin,K) conv + eval-BN -> (K*Cin, Cout) weight (tap-major) and shift."""
    cout, cin, k = p["w"].shape
    scale = p["gamma"] / jnp.sqrt(p["var"] + EPS)
    w_km = jnp.transpose(p["w"], (2, 1, 0)).reshape(k * cin, cout)   # row index = k*Cin + ci
    return w_km * scale[None, :], ((p["b"] - p["mean"]) * scale + p["beta"])[None, :]


def _fold_fc1(p):
    """Linear(192,100)+eval-BN, with the (C=64, L=3) channel-major flatten pre-permuted."""
    scale = p["gamma"] / jnp.sqrt(p["var"] + EPS)
    w = p["w"].reshape(p["w"].shape[0], 64, 3)                 # [out, channel, position]
    wf1 = jnp.transpose(w, (2, 1, 0)) * scale[None, None, :]   # (3, 64, 100)
    sf1 = ((p["b"] - p["mean"]) * scale + p["beta"])[None, :]
    return wf1, sf1


def _const_spec(a):
    zeros = (0,) * a.ndim
    return pl.BlockSpec(a.shape, lambda i, _z=zeros: _z)


def _extra_pallas_kwargs(B, ncls, args):
    kw = {}
    cp_cls = getattr(pltpu, "CompilerParams", None) or getattr(pltpu, "TPUCompilerParams", None)
    if cp_cls is not None:
        kw["compiler_params"] = cp_cls(dimension_semantics=("parallel",))
    if hasattr(pl, "CostEstimate"):
        flops_per_sample = (4 * 128 * 16 * 16 * 2 + 3 * 128 * 16 * 32 * 2 +
                            3 * 128 * 32 * 64 * 2 + 2 * (3 * 128 * 64 * 64 * 2) +
                            3 * 64 * 100 * 2 + 100 * ncls * 2)
        bytes_accessed = sum(int(a.size) * a.dtype.itemsize for a in args) + B * ncls * 4
        kw["cost_estimate"] = pl.CostEstimate(
            flops=B * flops_per_sample, transcendentals=0, bytes_accessed=int(bytes_accessed))
    return kw


def wdcnn_forward(x_ncl, params):
    """x_ncl: (B, 1, 2048) float32 (PyTorch NCL layout). Returns (B, num_classes)."""
    B = x_ncl.shape[0]
    ncls = params["fc2"]["w"].shape[0]
    TB = 8 if B % 8 == 0 else B            # batch tile (per grid step); small nets stay 1 tile

    # Only input-side prep happens in XLA: pad (Conv1 padding=24) and view the padded signal
    # as (131, 16) so the stride-16/k=64 conv becomes 4 shifted matmuls inside the kernel.
    x = jnp.pad(x_ncl[:, 0, :], ((0, 0), (24, 24))).reshape(B, 131, 16)

    w1, s1 = _fold_conv(params["c1"])
    w2, s2 = _fold_conv(params["c2"])
    w3, s3 = _fold_conv(params["c3"])
    w4, s4 = _fold_conv(params["c4"])
    w5, s5 = _fold_conv(params["c5"])
    wf1, sf1 = _fold_fc1(params["fc1"])
    wf2 = params["fc2"]["w"].T
    bf2 = params["fc2"]["b"][None, :]

    args = (x, w1, s1, w2, s2, w3, s3, w4, s4, w5, s5, wf1, sf1, wf2, bf2)
    in_specs = [pl.BlockSpec((TB, 131, 16), lambda i: (i, 0, 0))]
    in_specs += [_const_spec(a) for a in args[1:]]

    return pl.pallas_call(
        _wdcnn_kernel,
        out_shape=jax.ShapeDtypeStruct((B, ncls), jnp.float32),
        grid=(B // TB,),
        in_specs=in_specs,
        out_specs=pl.BlockSpec((TB, ncls), lambda i: (i, 0)),
        scratch_shapes=[pltpu.VMEM((TB * 128 + 2 * _PAD, 64), jnp.float32)],
        **_extra_pallas_kwargs(B, ncls, args),
    )(*args)


# ------------------------------- parameters -------------------------------- #

def _conv_params(key, cout, cin, k):
    ks = jax.random.split(key, 6)
    return dict(
        w=jax.random.normal(ks[0], (cout, cin, k), jnp.float32) / np.sqrt(cin * k),
        b=0.05 * jax.random.normal(ks[1], (cout,), jnp.float32),
        gamma=1.0 + 0.1 * jax.random.normal(ks[2], (cout,), jnp.float32),
        beta=0.1 * jax.random.normal(ks[3], (cout,), jnp.float32),
        mean=0.1 * jax.random.normal(ks[4], (cout,), jnp.float32),
        var=jax.random.uniform(ks[5], (cout,), jnp.float32, 0.5, 1.5),
    )


def _linear_bn_params(key, out_f, in_f):
    ks = jax.random.split(key, 6)
    return dict(
        w=jax.random.normal(ks[0], (out_f, in_f), jnp.float32) / np.sqrt(in_f),
        b=0.05 * jax.random.normal(ks[1], (out_f,), jnp.float32),
        gamma=1.0 + 0.1 * jax.random.normal(ks[2], (out_f,), jnp.float32),
        beta=0.1 * jax.random.normal(ks[3], (out_f,), jnp.float32),
        mean=0.1 * jax.random.normal(ks[4], (out_f,), jnp.float32),
        var=jax.random.uniform(ks[5], (out_f,), jnp.float32, 0.5, 1.5),
    )


def _linear_params(key, out_f, in_f):
    k1, k2 = jax.random.split(key)
    return dict(
        w=jax.random.normal(k1, (out_f, in_f), jnp.float32) / np.sqrt(in_f),
        b=0.05 * jax.random.normal(k2, (out_f,), jnp.float32),
    )


def init_wdcnn_params(key, num_classes=10):
    keys = jax.random.split(key, 7)
    return dict(
        c1=_conv_params(keys[0], 16, 1, 64),
        c2=_conv_params(keys[1], 32, 16, 3),
        c3=_conv_params(keys[2], 64, 32, 3),
        c4=_conv_params(keys[3], 64, 64, 3),
        c5=_conv_params(keys[4], 64, 64, 3),
        fc1=_linear_bn_params(keys[5], 100, 192),
        fc2=_linear_params(keys[6], num_classes, 100),
    )


# ------------------------------ pure-JAX reference ------------------------- #

def _reference_forward(x, params):
    hp = jax.lax.Precision.HIGHEST

    def block(x, p, stride, pad):
        y = jax.lax.conv_general_dilated(
            x, p["w"], window_strides=(stride,), padding=[(pad, pad)],
            dimension_numbers=("NCH", "OIH", "NCH"), precision=hp)
        y = y + p["b"][None, :, None]
        scale = (p["gamma"] / jnp.sqrt(p["var"] + EPS))[None, :, None]
        y = (y - p["mean"][None, :, None]) * scale + p["beta"][None, :, None]
        y = jnp.maximum(y, 0.0)
        B, C, L = y.shape
        return jnp.max(y.reshape(B, C, L // 2, 2), axis=-1)

    y = block(x, params["c1"], 16, 24)
    y = block(y, params["c2"], 1, 1)
    y = block(y, params["c3"], 1, 1)
    y = block(y, params["c4"], 1, 1)   # conv,BN,pool,ReLU == conv,BN,ReLU,pool
    y = block(y, params["c5"], 1, 0)
    y = y.reshape(y.shape[0], -1)
    p1, p2 = params["fc1"], params["fc2"]
    h = jnp.dot(y, p1["w"].T, precision=hp) + p1["b"]
    h = (h - p1["mean"]) * (p1["gamma"] / jnp.sqrt(p1["var"] + EPS)) + p1["beta"]
    h = jnp.maximum(h, 0.0)
    return jnp.dot(h, p2["w"].T, precision=hp) + p2["b"]


# ----------------------------------- main ----------------------------------- #

if __name__ == "__main__":
    key = jax.random.PRNGKey(0)
    kx, kp = jax.random.split(key)
    # Linear(192,100) pins the architecture to input length 2048 (WDCNN standard).
    x = jax.random.normal(kx, (2, 1, 2048), jnp.float32)
    params = init_wdcnn_params(kp, num_classes=10)

    out = jax.jit(wdcnn_forward)(x, params)
    out = jax.block_until_ready(out)
    assert out.shape == (2, 10) and out.dtype == jnp.float32

    ref = _reference_forward(x, params)
    err = float(jnp.max(jnp.abs(out - ref)))
    if err > 1e-2:
        raise AssertionError(f"mismatch vs pure-JAX reference: max abs err = {err}")
    print("KERNEL_OK")
</pallas_src>

<mosaic_0001>
module attributes {stable_mosaic.version = 11 : i64} {
  func.func @_wdcnn_kernel(%arg0: i32, %arg1: memref<2x131x16xf32, #tpu.memory_space<vmem>>, %arg2: memref<64x16xf32, #tpu.memory_space<vmem>>, %arg3: memref<1x16xf32, #tpu.memory_space<vmem>>, %arg4: memref<48x32xf32, #tpu.memory_space<vmem>>, %arg5: memref<1x32xf32, #tpu.memory_space<vmem>>, %arg6: memref<96x64xf32, #tpu.memory_space<vmem>>, %arg7: memref<1x64xf32, #tpu.memory_space<vmem>>, %arg8: memref<192x64xf32, #tpu.memory_space<vmem>>, %arg9: memref<1x64xf32, #tpu.memory_space<vmem>>, %arg10: memref<192x64xf32, #tpu.memory_space<vmem>>, %arg11: memref<1x64xf32, #tpu.memory_space<vmem>>, %arg12: memref<3x64x100xf32, #tpu.memory_space<vmem>>, %arg13: memref<1x100xf32, #tpu.memory_space<vmem>>, %arg14: memref<100x10xf32, #tpu.memory_space<vmem>>, %arg15: memref<1x10xf32, #tpu.memory_space<vmem>>, %arg16: memref<2x10xf32, #tpu.memory_space<vmem>>, %arg17: memref<320x64xf32, #tpu.memory_space<vmem>>) attributes {dimension_semantics = [#tpu.dimension_semantics<parallel>], iteration_bounds = array<i64: 1>, scalar_prefetch = 0 : i64, scratch_operands = 1 : i64, tpu.core_type = #tpu.core_type<tc>, window_params = [{transform_indices = @transform_0, window_bounds = array<i64: 2, 131, 16>}, {pipeline_mode = #tpu.pipeline_mode<synchronous>, transform_indices = @transform_1, window_bounds = array<i64: 64, 16>}, {pipeline_mode = #tpu.pipeline_mode<synchronous>, transform_indices = @transform_2, window_bounds = array<i64: 1, 16>}, {pipeline_mode = #tpu.pipeline_mode<synchronous>, transform_indices = @transform_3, window_bounds = array<i64: 48, 32>}, {pipeline_mode = #tpu.pipeline_mode<synchronous>, transform_indices = @transform_4, window_bounds = array<i64: 1, 32>}, {pipeline_mode = #tpu.pipeline_mode<synchronous>, transform_indices = @transform_5, window_bounds = array<i64: 96, 64>}, {pipeline_mode = #tpu.pipeline_mode<synchronous>, transform_indices = @transform_6, window_bounds = array<i64: 1, 64>}, {pipeline_mode = #tpu.pipeline_mode<synchronous>, transform_indices = @transform_7, window_bounds = array<i64: 192, 64>}, {pipeline_mode = #tpu.pipeline_mode<synchronous>, transform_indices = @transform_8, window_bounds = array<i64: 1, 64>}, {pipeline_mode = #tpu.pipeline_mode<synchronous>, transform_indices = @transform_9, window_bounds = array<i64: 192, 64>}, {pipeline_mode = #tpu.pipeline_mode<synchronous>, transform_indices = @transform_10, window_bounds = array<i64: 1, 64>}, {pipeline_mode = #tpu.pipeline_mode<synchronous>, transform_indices = @transform_11, window_bounds = array<i64: 3, 64, 100>}, {pipeline_mode = #tpu.pipeline_mode<synchronous>, transform_indices = @transform_12, window_bounds = array<i64: 1, 100>}, {pipeline_mode = #tpu.pipeline_mode<synchronous>, transform_indices = @transform_13, window_bounds = array<i64: 100, 10>}, {pipeline_mode = #tpu.pipeline_mode<synchronous>, transform_indices = @transform_14, window_bounds = array<i64: 1, 10>}, {transform_indices = @transform_15, window_bounds = array<i64: 2, 10>}]} {
    %cst = arith.constant 0.000000e+00 : f32
    %0 = vector.broadcast %cst : f32 to vector<320x64xf32>
    %c0 = arith.constant 0 : index
    %c0_0 = arith.constant 0 : index
    %1 = vector.load %arg17[%c0, %c0_0] : memref<320x64xf32, #tpu.memory_space<vmem>>, vector<320x64xf32>
    tpu.vector_store %arg17[%c0, %c0_0], %0 {strides = array<i32>} : memref<320x64xf32, #tpu.memory_space<vmem>>, vector<320x64xf32>,
    %2 = tpu.iota {dimensions = array<i32: 0>} : vector<256x1xi32>
    %c128_i32 = arith.constant 128 : i32
    %c0_i32 = arith.constant 0 : i32
    %3 = arith.cmpi eq, %c128_i32, %c0_i32 : i32
    %c1_i32 = arith.constant 1 : i32
    %4 = arith.select %3, %c1_i32, %c128_i32 : i32
    %5 = vector.broadcast %4 : i32 to vector<256x1xi32>
    %6 = arith.remsi %2, %5 : vector<256x1xi32>
    %c0_i32_1 = arith.constant 0 : i32
    %7 = vector.broadcast %c0_i32_1 : i32 to vector<256x1xi32>
    %8 = arith.cmpi ne, %6, %7 : vector<256x1xi32>
    %c0_i32_2 = arith.constant 0 : i32
    %9 = vector.broadcast %c0_i32_2 : i32 to vector<256x1xi32>
    %10 = arith.cmpi slt, %6, %9 : vector<256x1xi32>
    %c0_i32_3 = arith.constant 0 : i32
    %11 = arith.cmpi slt, %4, %c0_i32_3 : i32
    %12 = vector.broadcast %11 : i1 to vector<256x1xi1>
    %13 = vector.broadcast %12 : vector<256x1xi1> to vector<256x1xi1>
    %14 = arith.xori %10, %13 : vector<256x1xi1>
    %15 = arith.andi %14, %8 : vector<256x1xi1>
    %16 = vector.broadcast %4 : i32 to vector<256x1xi32>
    %17 = arith.addi %6, %16 : vector<256x1xi32>
    %18 = arith.select %15, %17, %6 : vector<256x1xi1>, vector<256x1xi32>
    %c0_4 = arith.constant 0 : index
    %c0_5 = arith.constant 0 : index
    %19 = vector.load %arg2[%c0_4, %c0_5] : memref<64x16xf32, #tpu.memory_space<vmem>>, vector<64x16xf32>
    %c0_6 = arith.constant 0 : index
    %c0_7 = arith.constant 0 : index
    %20 = vector.load %arg3[%c0_6, %c0_7] : memref<1x16xf32, #tpu.memory_space<vmem>>, vector<1x16xf32>
    %c0_8 = arith.constant 0 : index
    %c0_9 = arith.constant 0 : index
    %c0_10 = arith.constant 0 : index
    %21 = vector.load %arg1[%c0_8, %c0_9, %c0_10] : memref<2x131x16xf32, #tpu.memory_space<vmem>>, vector<1x128x16xf32>
    %22 = vector.shape_cast %21 : vector<1x128x16xf32> to vector<128x16xf32>
    %23 = vector.extract_strided_slice %19 {offsets = [0, 0], sizes = [16, 16], strides = [1, 1]} : vector<64x16xf32> to vector<16x16xf32>
    %cst_11 = arith.constant dense<0.000000e+00> : vector<128x16xf32>
    %24 = tpu.matmul %22, %23, %cst_11 {dimension_numbers = #tpu.dot_dimension_numbers<[1], [0], [0], [1], [0, 0, 1, 1], [], []>} : vector<128x16xf32>, vector<16x16xf32>, vector<128x16xf32> -> vector<128x16xf32>
    %c0_12 = arith.constant 0 : index
    %c1 = arith.constant 1 : index
    %c0_13 = arith.constant 0 : index
    %25 = vector.load %arg1[%c0_12, %c1, %c0_13] : memref<2x131x16xf32, #tpu.memory_space<vmem>>, vector<1x128x16xf32>
    %26 = vector.shape_cast %25 : vector<1x128x16xf32> to vector<128x16xf32>
    %27 = vector.extract_strided_slice %19 {offsets = [16, 0], sizes = [16, 16], strides = [1, 1]} : vector<64x16xf32> to vector<16x16xf32>
    %cst_14 = arith.constant dense<0.000000e+00> : vector<128x16xf32>
    %28 = tpu.matmul %26, %27, %cst_14 {dimension_numbers = #tpu.dot_dimension_numbers<[1], [0], [0], [1], [0, 0, 1, 1], [], []>} : vector<128x16xf32>, vector<16x16xf32>, vector<128x16xf32> -> vector<128x16xf32>
    %29 = arith.addf %24, %28 : vector<128x16xf32>
    %c0_15 = arith.constant 0 : index
    %c2 = arith.constant 2 : index
    %c0_16 = arith.constant 0 : index
    %30 = vector.load %arg1[%c0_15, %c2, %c0_16] : memref<2x131x16xf32, #tpu.memory_space<vmem>>, vector<1x128x16xf32>
    %31 = vector.shape_cast %30 : vector<1x128x16xf32> to vector<128x16xf32>
    %32 = vector.extract_strided_slice %19 {offsets = [32, 0], sizes = [16, 16], strides = [1, 1]} : vector<64x16xf32> to vector<16x16xf32>
    %cst_17 = arith.constant dense<0.000000e+00> : vector<128x16xf32>
    %33 = tpu.matmul %31, %32, %cst_17 {dimension_numbers = #tpu.dot_dimension_numbers<[1], [0], [0], [1], [0, 0, 1, 1], [], []>} : vector<128x16xf32>, vector<16x16xf32>, vector<128x16xf32> -> vector<128x16xf32>
    %34 = arith.addf %29, %33 : vector<128x16xf32>
    %c0_18 = arith.constant 0 : index
    %c3 = arith.constant 3 : index
    %c0_19 = arith.constant 0 : index
    %35 = vector.load %arg1[%c0_18, %c3, %c0_19] : memref<2x131x16xf32, #tpu.memory_space<vmem>>, vector<1x128x16xf32>
    %36 = vector.shape_cast %35 : vector<1x128x16xf32> to vector<128x16xf32>
    %37 = vector.extract_strided_slice %19 {offsets = [48, 0], sizes = [16, 16], strides = [1, 1]} : vector<64x16xf32> to vector<16x16xf32>
    %cst_20 = arith.constant dense<0.000000e+00> : vector<128x16xf32>
    %38 = tpu.matmul %36, %37, %cst_20 {dimension_numbers = #tpu.dot_dimension_numbers<[1], [0], [0], [1], [0, 0, 1, 1], [], []>} : vector<128x16xf32>, vector<16x16xf32>, vector<128x16xf32> -> vector<128x16xf32>
    %39 = arith.addf %34, %38 : vector<128x16xf32>
    %40 = vector.broadcast %20 : vector<1x16xf32> to vector<128x16xf32>
    %41 = arith.addf %39, %40 : vector<128x16xf32>
    %cst_21 = arith.constant 0.000000e+00 : f32
    %42 = vector.broadcast %cst_21 : f32 to vector<128x16xf32>
    %43 = arith.maximumf %41, %42 : vector<128x16xf32>
    %c32 = arith.constant 32 : index
    %c0_22 = arith.constant 0 : index
    %44 = vector.load %arg17[%c32, %c0_22] : memref<320x64xf32, #tpu.memory_space<vmem>>, vector<128x16xf32>
    tpu.vector_store %arg17[%c32, %c0_22], %43 {strides = array<i32>} : memref<320x64xf32, #tpu.memory_space<vmem>>, vector<128x16xf32>,
    %c1_23 = arith.constant 1 : index
    %c0_24 = arith.constant 0 : index
    %c0_25 = arith.constant 0 : index
    %45 = vector.load %arg1[%c1_23, %c0_24, %c0_25] : memref<2x131x16xf32, #tpu.memory_space<vmem>>, vector<1x128x16xf32>
    %46 = vector.shape_cast %45 : vector<1x128x16xf32> to vector<128x16xf32>
    %47 = vector.extract_strided_slice %19 {offsets = [0, 0], sizes = [16, 16], strides = [1, 1]} : vector<64x16xf32> to vector<16x16xf32>
    %cst_26 = arith.constant dense<0.000000e+00> : vector<128x16xf32>
    %48 = tpu.matmul %46, %47, %cst_26 {dimension_numbers = #tpu.dot_dimension_numbers<[1], [0], [0], [1], [0, 0, 1, 1], [], []>} : vector<128x16xf32>, vector<16x16xf32>, vector<128x16xf32> -> vector<128x16xf32>
    %c1_27 = arith.constant 1 : index
    %c1_28 = arith.constant 1 : index
    %c0_29 = arith.constant 0 : index
    %49 = vector.load %arg1[%c1_27, %c1_28, %c0_29] : memref<2x131x16xf32, #tpu.memory_space<vmem>>, vector<1x128x16xf32>
    %50 = vector.shape_cast %49 : vector<1x128x16xf32> to vector<128x16xf32>
    %51 = vector.extract_strided_slice %19 {offsets = [16, 0], sizes = [16, 16], strides = [1, 1]} : vector<64x16xf32> to vector<16x16xf32>
    %cst_30 = arith.constant dense<0.000000e+00> : vector<128x16xf32>
    %52 = tpu.matmul %50, %51, %cst_30 {dimension_numbers = #tpu.dot_dimension_numbers<[1], [0], [0], [1], [0, 0, 1, 1], [], []>} : vector<128x16xf32>, vector<16x16xf32>, vector<128x16xf32> -> vector<128x16xf32>
    %53 = arith.addf %48, %52 : vector<128x16xf32>
    %c1_31 = arith.constant 1 : index
    %c2_32 = arith.constant 2 : index
    %c0_33 = arith.constant 0 : index
    %54 = vector.load %arg1[%c1_31, %c2_32, %c0_33] : memref<2x131x16xf32, #tpu.memory_space<vmem>>, vector<1x128x16xf32>
    %55 = vector.shape_cast %54 : vector<1x128x16xf32> to vector<128x16xf32>
    %56 = vector.extract_strided_slice %19 {offsets = [32, 0], sizes = [16, 16], strides = [1, 1]} : vector<64x16xf32> to vector<16x16xf32>
    %cst_34 = arith.constant dense<0.000000e+00> : vector<128x16xf32>
    %57 = tpu.matmul %55, %56, %cst_34 {dimension_numbers = #tpu.dot_dimension_numbers<[1], [0], [0], [1], [0, 0, 1, 1], [], []>} : vector<128x16xf32>, vector<16x16xf32>, vector<128x16xf32> -> vector<128x16xf32>
    %58 = arith.addf %53, %57 : vector<128x16xf32>
    %c1_35 = arith.constant 1 : index
    %c3_36 = arith.constant 3 : index
    %c0_37 = arith.constant 0 : index
    %59 = vector.load %arg1[%c1_35, %c3_36, %c0_37] : memref<2x131x16xf32, #tpu.memory_space<vmem>>, vector<1x128x16xf32>
    %60 = vector.shape_cast %59 : vector<1x128x16xf32> to vector<128x16xf32>
    %61 = vector.extract_strided_slice %19 {offsets = [48, 0], sizes = [16, 16], strides = [1, 1]} : vector<64x16xf32> to vector<16x16xf32>
    %cst_38 = arith.constant dense<0.000000e+00> : vector<128x16xf32>
    %62 = tpu.matmul %60, %61, %cst_38 {dimension_numbers = #tpu.dot_dimension_numbers<[1], [0], [0], [1], [0, 0, 1, 1], [], []>} : vector<128x16xf32>, vector<16x16xf32>, vector<128x16xf32> -> vector<128x16xf32>
    %63 = arith.addf %58, %62 : vector<128x16xf32>
    %64 = vector.broadcast %20 : vector<1x16xf32> to vector<128x16xf32>
    %65 = arith.addf %63, %64 : vector<128x16xf32>
    %cst_39 = arith.constant 0.000000e+00 : f32
    %66 = vector.broadcast %cst_39 : f32 to vector<128x16xf32>
    %67 = arith.maximumf %65, %66 : vector<128x16xf32>
    %c160 = arith.constant 160 : index
    %c0_40 = arith.constant 0 : index
    %68 = vector.load %arg17[%c160, %c0_40] : memref<320x64xf32, #tpu.memory_space<vmem>>, vector<128x16xf32>
    tpu.vector_store %arg17[%c160, %c0_40], %67 {strides = array<i32>} : memref<320x64xf32, #tpu.memory_space<vmem>>, vector<128x16xf32>,
    %c32_41 = arith.constant 32 : index
    %c0_42 = arith.constant 0 : index
    %69 = vector.load %arg17[%c32_41, %c0_42] : memref<320x64xf32, #tpu.memory_space<vmem>>, vector<256x16xf32>
    %c33 = arith.constant 33 : index
    %c0_43 = arith.constant 0 : index
    %70 = vector.load %arg17[%c33, %c0_43] : memref<320x64xf32, #tpu.memory_space<vmem>>, vector<256x16xf32>
    %71 = arith.maximumf %69, %70 : vector<256x16xf32>
    %c32_44 = arith.constant 32 : index
    %c0_45 = arith.constant 0 : index
    %72 = vector.load %arg17[%c32_44, %c0_45] : memref<320x64xf32, #tpu.memory_space<vmem>>, vector<256x16xf32>
    tpu.vector_store %arg17[%c32_44, %c0_45], %71 {strides = array<i32>} : memref<320x64xf32, #tpu.memory_space<vmem>>, vector<256x16xf32>,
    %c0_46 = arith.constant 0 : index
    %c0_47 = arith.constant 0 : index
    %73 = vector.load %arg4[%c0_46, %c0_47] : memref<48x32xf32, #tpu.memory_space<vmem>>, vector<48x32xf32>
    %c0_48 = arith.constant 0 : index
    %c0_49 = arith.constant 0 : index
    %74 = vector.load %arg5[%c0_48, %c0_49] : memref<1x32xf32, #tpu.memory_space<vmem>>, vector<1x32xf32>
    %c2_i32 = arith.constant 2 : i32
    %75 = vector.broadcast %c2_i32 : i32 to vector<256x1xi32>
    %76 = arith.cmpi slt, %18, %75 : vector<256x1xi32>
    %c30 = arith.constant 30 : index
    %c0_50 = arith.constant 0 : index
    %77 = vector.load %arg17[%c30, %c0_50] : memref<320x64xf32, #tpu.memory_space<vmem>>, vector<256x16xf32>
    %cst_51 = arith.constant 0.000000e+00 : f32
    %78 = vector.shape_cast %76 : vector<256x1xi1> to vector<256x1xi1>
    %79 = vector.broadcast %78 : vector<256x1xi1> to vector<256x16xi1>
    %80 = vector.broadcast %cst_51 : f32 to vector<256x16xf32>
    %81 = arith.select %79, %80, %77 : vector<256x16xi1>, vector<256x16xf32>
    %c32_52 = arith.constant 32 : index
    %c0_53 = arith.constant 0 : index
    %82 = vector.load %arg17[%c32_52, %c0_53] : memref<320x64xf32, #tpu.memory_space<vmem>>, vector<256x16xf32>
    %c126_i32 = arith.constant 126 : i32
    %83 = vector.broadcast %c126_i32 : i32 to vector<256x1xi32>
    %84 = arith.cmpi sge, %18, %83 : vector<256x1xi32>
    %c34 = arith.constant 34 : index
    %c0_54 = arith.constant 0 : index
    %85 = vector.load %arg17[%c34, %c0_54] : memref<320x64xf32, #tpu.memory_space<vmem>>, vector<256x16xf32>
    %cst_55 = arith.constant 0.000000e+00 : f32
    %86 = vector.shape_cast %84 : vector<256x1xi1> to vector<256x1xi1>
    %87 = vector.broadcast %86 : vector<256x1xi1> to vector<256x16xi1>
    %88 = vector.broadcast %cst_55 : f32 to vector<256x16xf32>
    %89 = arith.select %87, %88, %85 : vector<256x16xi1>, vector<256x16xf32>
    %90 = vector.extract_strided_slice %73 {offsets = [0, 0], sizes = [16, 32], strides = [1, 1]} : vector<48x32xf32> to vector<16x32xf32>
    %cst_56 = arith.constant dense<0.000000e+00> : vector<256x32xf32>
    %91 = tpu.matmul %81, %90, %cst_56 {dimension_numbers = #tpu.dot_dimension_numbers<[1], [0], [0], [1], [0, 0, 1, 1], [], []>} : vector<256x16xf32>, vector<16x32xf32>, vector<256x32xf32> -> vector<256x32xf32>
    %92 = vector.extract_strided_slice %73 {offsets = [16, 0], sizes = [16, 32], strides = [1, 1]} : vector<48x32xf32> to vector<16x32xf32>
    %cst_57 = arith.constant dense<0.000000e+00> : vector<256x32xf32>
    %93 = tpu.matmul %82, %92, %cst_57 {dimension_numbers = #tpu.dot_dimension_numbers<[1], [0], [0], [1], [0, 0, 1, 1], [], []>} : vector<256x16xf32>, vector<16x32xf32>, vector<256x32xf32> -> vector<256x32xf32>
    %94 = arith.addf %91, %93 : vector<256x32xf32>
    %95 = vector.extract_strided_slice %73 {offsets = [32, 0], sizes = [16, 32], strides = [1, 1]} : vector<48x32xf32> to vector<16x32xf32>
    %cst_58 = arith.constant dense<0.000000e+00> : vector<256x32xf32>
    %96 = tpu.matmul %89, %95, %cst_58 {dimension_numbers = #tpu.dot_dimension_numbers<[1], [0], [0], [1], [0, 0, 1, 1], [], []>} : vector<256x16xf32>, vector<16x32xf32>, vector<256x32xf32> -> vector<256x32xf32>
    %97 = arith.addf %94, %96 : vector<256x32xf32>
    %98 = vector.broadcast %74 : vector<1x32xf32> to vector<256x32xf32>
    %99 = arith.addf %97, %98 : vector<256x32xf32>
    %cst_59 = arith.constant 0.000000e+00 : f32
    %100 = vector.broadcast %cst_59 : f32 to vector<256x32xf32>
    %101 = arith.maximumf %99, %100 : vector<256x32xf32>
    %c32_60 = arith.constant 32 : index
    %c0_61 = arith.constant 0 : index
    %102 = vector.load %arg17[%c32_60, %c0_61] : memref<320x64xf32, #tpu.memory_space<vmem>>, vector<256x32xf32>
    tpu.vector_store %arg17[%c32_60, %c0_61], %101 {strides = array<i32>} : memref<320x64xf32, #tpu.memory_space<vmem>>, vector<256x32xf32>,
    %c34_62 = arith.constant 34 : index
    %c0_63 = arith.constant 0 : index
    %103 = vector.load %arg17[%c34_62, %c0_63] : memref<320x64xf32, #tpu.memory_space<vmem>>, vector<256x32xf32>
    %104 = arith.maximumf %101, %103 : vector<256x32xf32>
    %c32_64 = arith.constant 32 : index
    %c0_65 = arith.constant 0 : index
    %105 = vector.load %arg17[%c32_64, %c0_65] : memref<320x64xf32, #tpu.memory_space<vmem>>, vector<256x32xf32>
    tpu.vector_store %arg17[%c32_64, %c0_65], %104 {strides = array<i32>} : memref<320x64xf32, #tpu.memory_space<vmem>>, vector<256x32xf32>,
    %c0_66 = arith.constant 0 : index
    %c0_67 = arith.constant 0 : index
    %106 = vector.load %arg6[%c0_66, %c0_67] : memref<96x64xf32, #tpu.memory_space<vmem>>, vector<96x64xf32>
    %c0_68 = arith.constant 0 : index
    %c0_69 = arith.constant 0 : index
    %107 = vector.load %arg7[%c0_68, %c0_69] : memref<1x64xf32, #tpu.memory_space<vmem>>, vector<1x64xf32>
    %c4_i32 = arith.constant 4 : i32
    %108 = vector.broadcast %c4_i32 : i32 to vector<256x1xi32>
    %109 = arith.cmpi slt, %18, %108 : vector<256x1xi32>
    %c28 = arith.constant 28 : index
    %c0_70 = arith.constant 0 : index
    %110 = vector.load %arg17[%c28, %c0_70] : memref<320x64xf32, #tpu.memory_space<vmem>>, vector<256x32xf32>
    %cst_71 = arith.constant 0.000000e+00 : f32
    %111 = vector.shape_cast %109 : vector<256x1xi1> to vector<256x1xi1>
    %112 = vector.broadcast %111 : vector<256x1xi1> to vector<256x32xi1>
    %113 = vector.broadcast %cst_71 : f32 to vector<256x32xf32>
    %114 = arith.select %112, %113, %110 : vector<256x32xi1>, vector<256x32xf32>
    %c32_72 = arith.constant 32 : index
    %c0_73 = arith.constant 0 : index
    %115 = vector.load %arg17[%c32_72, %c0_73] : memref<320x64xf32, #tpu.memory_space<vmem>>, vector<256x32xf32>
    %c124_i32 = arith.constant 124 : i32
    %116 = vector.broadcast %c124_i32 : i32 to vector<256x1xi32>
    %117 = arith.cmpi sge, %18, %116 : vector<256x1xi32>
    %c36 = arith.constant 36 : index
    %c0_74 = arith.constant 0 : index
    %118 = vector.load %arg17[%c36, %c0_74] : memref<320x64xf32, #tpu.memory_space<vmem>>, vector<256x32xf32>
    %cst_75 = arith.constant 0.000000e+00 : f32
    %119 = vector.shape_cast %117 : vector<256x1xi1> to vector<256x1xi1>
    %120 = vector.broadcast %119 : vector<256x1xi1> to vector<256x32xi1>
    %121 = vector.broadcast %cst_75 : f32 to vector<256x32xf32>
    %122 = arith.select %120, %121, %118 : vector<256x32xi1>, vector<256x32xf32>
    %123 = vector.extract_strided_slice %106 {offsets = [0, 0], sizes = [32, 64], strides = [1, 1]} : vector<96x64xf32> to vector<32x64xf32>
    %cst_76 = arith.constant dense<0.000000e+00> : vector<256x64xf32>
    %124 = tpu.matmul %114, %123, %cst_76 {dimension_numbers = #tpu.dot_dimension_numbers<[1], [0], [0], [1], [0, 0, 1, 1], [], []>} : vector<256x32xf32>, vector<32x64xf32>, vector<256x64xf32> -> vector<256x64xf32>
    %125 = vector.extract_strided_slice %106 {offsets = [32, 0], sizes = [32, 64], strides = [1, 1]} : vector<96x64xf32> to vector<32x64xf32>
    %cst_77 = arith.constant dense<0.000000e+00> : vector<256x64xf32>
    %126 = tpu.matmul %115, %125, %cst_77 {dimension_numbers = #tpu.dot_dimension_numbers<[1], [0], [0], [1], [0, 0, 1, 1], [], []>} : vector<256x32xf32>, vector<32x64xf32>, vector<256x64xf32> -> vector<256x64xf32>
    %127 = arith.addf %124, %126 : vector<256x64xf32>
    %128 = vector.extract_strided_slice %106 {offsets = [64, 0], sizes = [32, 64], strides = [1, 1]} : vector<96x64xf32> to vector<32x64xf32>
    %cst_78 = arith.constant dense<0.000000e+00> : vector<256x64xf32>
    %129 = tpu.matmul %122, %128, %cst_78 {dimension_numbers = #tpu.dot_dimension_numbers<[1], [0], [0], [1], [0, 0, 1, 1], [], []>} : vector<256x32xf32>, vector<32x64xf32>, vector<256x64xf32> -> vector<256x64xf32>
    %130 = arith.addf %127, %129 : vector<256x64xf32>
    %131 = vector.broadcast %107 : vector<1x64xf32> to vector<256x64xf32>
    %132 = arith.addf %130, %131 : vector<256x64xf32>
    %cst_79 = arith.constant 0.000000e+00 : f32
    %133 = vector.broadcast %cst_79 : f32 to vector<256x64xf32>
    %134 = arith.maximumf %132, %133 : vector<256x64xf32>
    %c32_80 = arith.constant 32 : index
    %c0_81 = arith.constant 0 : index
    %135 = vector.load %arg17[%c32_80, %c0_81] : memref<320x64xf32, #tpu.memory_space<vmem>>, vector<256x64xf32>
    tpu.vector_store %arg17[%c32_80, %c0_81], %134 {strides = array<i32>} : memref<320x64xf32, #tpu.memory_space<vmem>>, vector<256x64xf32>,
    %c36_82 = arith.constant 36 : index
    %c0_83 = arith.constant 0 : index
    %136 = vector.load %arg17[%c36_82, %c0_83] : memref<320x64xf32, #tpu.memory_space<vmem>>, vector<256x64xf32>
    %137 = arith.maximumf %134, %136 : vector<256x64xf32>
    %c32_84 = arith.constant 32 : index
    %c0_85 = arith.constant 0 : index
    %138 = vector.load %arg17[%c32_84, %c0_85] : memref<320x64xf32, #tpu.memory_space<vmem>>, vector<256x64xf32>
    tpu.vector_store %arg17[%c32_84, %c0_85], %137 {strides = array<i32>} : memref<320x64xf32, #tpu.memory_space<vmem>>, vector<256x64xf32>,
    %c0_86 = arith.constant 0 : index
    %c0_87 = arith.constant 0 : index
    %139 = vector.load %arg8[%c0_86, %c0_87] : memref<192x64xf32, #tpu.memory_space<vmem>>, vector<192x64xf32>
    %c0_88 = arith.constant 0 : index
    %c0_89 = arith.constant 0 : index
    %140 = vector.load %arg9[%c0_88, %c0_89] : memref<1x64xf32, #tpu.memory_space<vmem>>, vector<1x64xf32>
    %c8_i32 = arith.constant 8 : i32
    %141 = vector.broadcast %c8_i32 : i32 to vector<256x1xi32>
    %142 = arith.cmpi slt, %18, %141 : vector<256x1xi32>
    %c24 = arith.constant 24 : index
    %c0_90 = arith.constant 0 : index
    %143 = vector.load %arg17[%c24, %c0_90] : memref<320x64xf32, #tpu.memory_space<vmem>>, vector<256x64xf32>
    %cst_91 = arith.constant 0.000000e+00 : f32
    %144 = vector.shape_cast %142 : vector<256x1xi1> to vector<256x1xi1>
    %145 = vector.broadcast %144 : vector<256x1xi1> to vector<256x64xi1>
    %146 = vector.broadcast %cst_91 : f32 to vector<256x64xf32>
    %147 = arith.select %145, %146, %143 : vector<256x64xi1>, vector<256x64xf32>
    %c32_92 = arith.constant 32 : index
    %c0_93 = arith.constant 0 : index
    %148 = vector.load %arg17[%c32_92, %c0_93] : memref<320x64xf32, #tpu.memory_space<vmem>>, vector<256x64xf32>
    %c120_i32 = arith.constant 120 : i32
    %149 = vector.broadcast %c120_i32 : i32 to vector<256x1xi32>
    %150 = arith.cmpi sge, %18, %149 : vector<256x1xi32>
    %c40 = arith.constant 40 : index
    %c0_94 = arith.constant 0 : index
    %151 = vector.load %arg17[%c40, %c0_94] : memref<320x64xf32, #tpu.memory_space<vmem>>, vector<256x64xf32>
    %cst_95 = arith.constant 0.000000e+00 : f32
    %152 = vector.shape_cast %150 : vector<256x1xi1> to vector<256x1xi1>
    %153 = vector.broadcast %152 : vector<256x1xi1> to vector<256x64xi1>
    %154 = vector.broadcast %cst_95 : f32 to vector<256x64xf32>
    %155 = arith.select %153, %154, %151 : vector<256x64xi1>, vector<256x64xf32>
    %156 = vector.extract_strided_slice %139 {offsets = [0, 0], sizes = [64, 64], strides = [1, 1]} : vector<192x64xf32> to vector<64x64xf32>
    %cst_96 = arith.constant dense<0.000000e+00> : vector<256x64xf32>
    %157 = tpu.matmul %147, %156, %cst_96 {dimension_numbers = #tpu.dot_dimension_numbers<[1], [0], [0], [1], [0, 0, 1, 1], [], []>} : vector<256x64xf32>, vector<64x64xf32>, vector<256x64xf32> -> vector<256x64xf32>
    %158 = vector.extract_strided_slice %139 {offsets = [64, 0], sizes = [64, 64], strides = [1, 1]} : vector<192x64xf32> to vector<64x64xf32>
    %cst_97 = arith.constant dense<0.000000e+00> : vector<256x64xf32>
    %159 = tpu.matmul %148, %158, %cst_97 {dimension_numbers = #tpu.dot_dimension_numbers<[1], [0], [0], [1], [0, 0, 1, 1], [], []>} : vector<256x64xf32>, vector<64x64xf32>, vector<256x64xf32> -> vector<256x64xf32>
    %160 = arith.addf %157, %159 : vector<256x64xf32>
    %161 = vector.extract_strided_slice %139 {offsets = [128, 0], sizes = [64, 64], strides = [1, 1]} : vector<192x64xf32> to vector<64x64xf32>
    %cst_98 = arith.constant dense<0.000000e+00> : vector<256x64xf32>
    %162 = tpu.matmul %155, %161, %cst_98 {dimension_numbers = #tpu.dot_dimension_numbers<[1], [0], [0], [1], [0, 0, 1, 1], [], []>} : vector<256x64xf32>, vector<64x64xf32>, vector<256x64xf32> -> vector<256x64xf32>
    %163 = arith.addf %160, %162 : vector<256x64xf32>
    %164 = vector.broadcast %140 : vector<1x64xf32> to vector<256x64xf32>
    %165 = arith.addf %163, %164 : vector<256x64xf32>
    %cst_99 = arith.constant 0.000000e+00 : f32
    %166 = vector.broadcast %cst_99 : f32 to vector<256x64xf32>
    %167 = arith.maximumf %165, %166 : vector<256x64xf32>
    %c32_100 = arith.constant 32 : index
    %c0_101 = arith.constant 0 : index
    %168 = vector.load %arg17[%c32_100, %c0_101] : memref<320x64xf32, #tpu.memory_space<vmem>>, vector<256x64xf32>
    tpu.vector_store %arg17[%c32_100, %c0_101], %167 {strides = array<i32>} : memref<320x64xf32, #tpu.memory_space<vmem>>, vector<256x64xf32>,
    %c40_102 = arith.constant 40 : index
    %c0_103 = arith.constant 0 : index
    %169 = vector.load %arg17[%c40_102, %c0_103] : memref<320x64xf32, #tpu.memory_space<vmem>>, vector<256x64xf32>
    %170 = arith.maximumf %167, %169 : vector<256x64xf32>
    %c32_104 = arith.constant 32 : index
    %c0_105 = arith.constant 0 : index
    %171 = vector.load %arg17[%c32_104, %c0_105] : memref<320x64xf32, #tpu.memory_space<vmem>>, vector<256x64xf32>
    tpu.vector_store %arg17[%c32_104, %c0_105], %170 {strides = array<i32>} : memref<320x64xf32, #tpu.memory_space<vmem>>, vector<256x64xf32>,
    %c0_106 = arith.constant 0 : index
    %c0_107 = arith.constant 0 : index
    %172 = vector.load %arg10[%c0_106, %c0_107] : memref<192x64xf32, #tpu.memory_space<vmem>>, vector<192x64xf32>
    %c0_108 = arith.constant 0 : index
    %c0_109 = arith.constant 0 : index
    %173 = vector.load %arg11[%c0_108, %c0_109] : memref<1x64xf32, #tpu.memory_space<vmem>>, vector<1x64xf32>
    %c32_110 = arith.constant 32 : index
    %c0_111 = arith.constant 0 : index
    %174 = vector.load %arg17[%c32_110, %c0_111] : memref<320x64xf32, #tpu.memory_space<vmem>>, vector<256x64xf32>
    %175 = vector.extract_strided_slice %172 {offsets = [0, 0], sizes = [64, 64], strides = [1, 1]} : vector<192x64xf32> to vector<64x64xf32>
    %cst_112 = arith.constant dense<0.000000e+00> : vector<256x64xf32>
    %176 = tpu.matmul %174, %175, %cst_112 {dimension_numbers = #tpu.dot_dimension_numbers<[1], [0], [0], [1], [0, 0, 1, 1], [], []>} : vector<256x64xf32>, vector<64x64xf32>, vector<256x64xf32> -> vector<256x64xf32>
    %c48 = arith.constant 48 : index
    %c0_113 = arith.constant 0 : index
    %177 = vector.load %arg17[%c48, %c0_113] : memref<320x64xf32, #tpu.memory_space<vmem>>, vector<256x64xf32>
    %178 = vector.extract_strided_slice %172 {offsets = [64, 0], sizes = [64, 64], strides = [1, 1]} : vector<192x64xf32> to vector<64x64xf32>
    %cst_114 = arith.constant dense<0.000000e+00> : vector<256x64xf32>
    %179 = tpu.matmul %177, %178, %cst_114 {dimension_numbers = #tpu.dot_dimension_numbers<[1], [0], [0], [1], [0, 0, 1, 1], [], []>} : vector<256x64xf32>, vector<64x64xf32>, vector<256x64xf32> -> vector<256x64xf32>
    %180 = arith.addf %176, %179 : vector<256x64xf32>
    %c64 = arith.constant 64 : index
    %c0_115 = arith.constant 0 : index
    %181 = vector.load %arg17[%c64, %c0_115] : memref<320x64xf32, #tpu.memory_space<vmem>>, vector<256x64xf32>
    %182 = vector.extract_strided_slice %172 {offsets = [128, 0], sizes = [64, 64], strides = [1, 1]} : vector<192x64xf32> to vector<64x64xf32>
    %cst_116 = arith.constant dense<0.000000e+00> : vector<256x64xf32>
    %183 = tpu.matmul %181, %182, %cst_116 {dimension_numbers = #tpu.dot_dimension_numbers<[1], [0], [0], [1], [0, 0, 1, 1], [], []>} : vector<256x64xf32>, vector<64x64xf32>, vector<256x64xf32> -> vector<256x64xf32>
    %184 = arith.addf %180, %183 : vector<256x64xf32>
    %185 = vector.broadcast %173 : vector<1x64xf32> to vector<256x64xf32>
    %186 = arith.addf %184, %185 : vector<256x64xf32>
    %cst_117 = arith.constant 0.000000e+00 : f32
    %187 = vector.broadcast %cst_117 : f32 to vector<256x64xf32>
    %188 = arith.maximumf %186, %187 : vector<256x64xf32>
    %c32_118 = arith.constant 32 : index
    %c0_119 = arith.constant 0 : index
    %189 = vector.load %arg17[%c32_118, %c0_119] : memref<320x64xf32, #tpu.memory_space<vmem>>, vector<256x64xf32>
    tpu.vector_store %arg17[%c32_118, %c0_119], %188 {strides = array<i32>} : memref<320x64xf32, #tpu.memory_space<vmem>>, vector<256x64xf32>,
    %c48_120 = arith.constant 48 : index
    %c0_121 = arith.constant 0 : index
    %190 = vector.load %arg17[%c48_120, %c0_121] : memref<320x64xf32, #tpu.memory_space<vmem>>, vector<256x64xf32>
    %191 = arith.maximumf %188, %190 : vector<256x64xf32>
    %c0_122 = arith.constant 0 : index
    %c0_123 = arith.constant 0 : index
    %c0_124 = arith.constant 0 : index
    %192 = vector.load %arg12[%c0_122, %c0_123, %c0_124] : memref<3x64x100xf32, #tpu.memory_space<vmem>>, vector<1x64x100xf32>
    %193 = vector.shape_cast %192 : vector<1x64x100xf32> to vector<64x100xf32>
    %c1_125 = arith.constant 1 : index
    %c0_126 = arith.constant 0 : index
    %c0_127 = arith.constant 0 : index
    %194 = vector.load %arg12[%c1_125, %c0_126, %c0_127] : memref<3x64x100xf32, #tpu.memory_space<vmem>>, vector<1x64x100xf32>
    %195 = vector.shape_cast %194 : vector<1x64x100xf32> to vector<64x100xf32>
    %c2_128 = arith.constant 2 : index
    %c0_129 = arith.constant 0 : index
    %c0_130 = arith.constant 0 : index
    %196 = vector.load %arg12[%c2_128, %c0_129, %c0_130] : memref<3x64x100xf32, #tpu.memory_space<vmem>>, vector<1x64x100xf32>
    %197 = vector.shape_cast %196 : vector<1x64x100xf32> to vector<64x100xf32>
    %c0_131 = arith.constant 0 : index
    %c0_132 = arith.constant 0 : index
    %198 = vector.load %arg13[%c0_131, %c0_132] : memref<1x100xf32, #tpu.memory_space<vmem>>, vector<1x100xf32>
    %c0_133 = arith.constant 0 : index
    %c0_134 = arith.constant 0 : index
    %199 = vector.load %arg14[%c0_133, %c0_134] : memref<100x10xf32, #tpu.memory_space<vmem>>, vector<100x10xf32>
    %c0_135 = arith.constant 0 : index
    %c0_136 = arith.constant 0 : index
    %200 = vector.load %arg15[%c0_135, %c0_136] : memref<1x10xf32, #tpu.memory_space<vmem>>, vector<1x10xf32>
    %201 = vector.extract_strided_slice %191 {offsets = [0, 0], sizes = [1, 64], strides = [1, 1]} : vector<256x64xf32> to vector<1x64xf32>
    %cst_137 = arith.constant dense<0.000000e+00> : vector<1x100xf32>
    %202 = tpu.matmul %201, %193, %cst_137 {dimension_numbers = #tpu.dot_dimension_numbers<[1], [0], [0], [1], [0, 0, 1, 1], [], []>} : vector<1x64xf32>, vector<64x100xf32>, vector<1x100xf32> -> vector<1x100xf32>
    %203 = vector.extract_strided_slice %191 {offsets = [32, 0], sizes = [1, 64], strides = [1, 1]} : vector<256x64xf32> to vector<1x64xf32>
    %cst_138 = arith.constant dense<0.000000e+00> : vector<1x100xf32>
    %204 = tpu.matmul %203, %195, %cst_138 {dimension_numbers = #tpu.dot_dimension_numbers<[1], [0], [0], [1], [0, 0, 1, 1], [], []>} : vector<1x64xf32>, vector<64x100xf32>, vector<1x100xf32> -> vector<1x100xf32>
    %205 = arith.addf %202, %204 : vector<1x100xf32>
    %206 = vector.extract_strided_slice %191 {offsets = [64, 0], sizes = [1, 64], strides = [1, 1]} : vector<256x64xf32> to vector<1x64xf32>
    %cst_139 = arith.constant dense<0.000000e+00> : vector<1x100xf32>
    %207 = tpu.matmul %206, %197, %cst_139 {dimension_numbers = #tpu.dot_dimension_numbers<[1], [0], [0], [1], [0, 0, 1, 1], [], []>} : vector<1x64xf32>, vector<64x100xf32>, vector<1x100xf32> -> vector<1x100xf32>
    %208 = arith.addf %205, %207 : vector<1x100xf32>
    %209 = arith.addf %208, %198 : vector<1x100xf32>
    %cst_140 = arith.constant 0.000000e+00 : f32
    %210 = vector.broadcast %cst_140 : f32 to vector<1x100xf32>
    %211 = arith.maximumf %209, %210 : vector<1x100xf32>
    %cst_141 = arith.constant dense<0.000000e+00> : vector<1x10xf32>
    %212 = tpu.matmul %211, %199, %cst_141 {dimension_numbers = #tpu.dot_dimension_numbers<[1], [0], [0], [1], [0, 0, 1, 1], [], []>} : vector<1x100xf32>, vector<100x10xf32>, vector<1x10xf32> -> vector<1x10xf32>
    %213 = arith.addf %212, %200 : vector<1x10xf32>
    %c0_142 = arith.constant 0 : index
    %c0_143 = arith.constant 0 : index
    %214 = vector.load %arg16[%c0_142, %c0_143] : memref<2x10xf32, #tpu.memory_space<vmem>>, vector<1x10xf32>
    tpu.vector_store %arg16[%c0_142, %c0_143], %213 {strides = array<i32>} : memref<2x10xf32, #tpu.memory_space<vmem>>, vector<1x10xf32>,
    %215 = vector.extract_strided_slice %191 {offsets = [128, 0], sizes = [1, 64], strides = [1, 1]} : vector<256x64xf32> to vector<1x64xf32>
    %cst_144 = arith.constant dense<0.000000e+00> : vector<1x100xf32>
    %216 = tpu.matmul %215, %193, %cst_144 {dimension_numbers = #tpu.dot_dimension_numbers<[1], [0], [0], [1], [0, 0, 1, 1], [], []>} : vector<1x64xf32>, vector<64x100xf32>, vector<1x100xf32> -> vector<1x100xf32>
    %217 = vector.extract_strided_slice %191 {offsets = [160, 0], sizes = [1, 64], strides = [1, 1]} : vector<256x64xf32> to vector<1x64xf32>
    %cst_145 = arith.constant dense<0.000000e+00> : vector<1x100xf32>
    %218 = tpu.matmul %217, %195, %cst_145 {dimension_numbers = #tpu.dot_dimension_numbers<[1], [0], [0], [1], [0, 0, 1, 1], [], []>} : vector<1x64xf32>, vector<64x100xf32>, vector<1x100xf32> -> vector<1x100xf32>
    %219 = arith.addf %216, %218 : vector<1x100xf32>
    %220 = vector.extract_strided_slice %191 {offsets = [192, 0], sizes = [1, 64], strides = [1, 1]} : vector<256x64xf32> to vector<1x64xf32>
    %cst_146 = arith.constant dense<0.000000e+00> : vector<1x100xf32>
    %221 = tpu.matmul %220, %197, %cst_146 {dimension_numbers = #tpu.dot_dimension_numbers<[1], [0], [0], [1], [0, 0, 1, 1], [], []>} : vector<1x64xf32>, vector<64x100xf32>, vector<1x100xf32> -> vector<1x100xf32>
    %222 = arith.addf %219, %221 : vector<1x100xf32>
    %223 = arith.addf %222, %198 : vector<1x100xf32>
    %cst_147 = arith.constant 0.000000e+00 : f32
    %224 = vector.broadcast %cst_147 : f32 to vector<1x100xf32>
    %225 = arith.maximumf %223, %224 : vector<1x100xf32>
    %cst_148 = arith.constant dense<0.000000e+00> : vector<1x10xf32>
    %226 = tpu.matmul %225, %199, %cst_148 {dimension_numbers = #tpu.dot_dimension_numbers<[1], [0], [0], [1], [0, 0, 1, 1], [], []>} : vector<1x100xf32>, vector<100x10xf32>, vector<1x10xf32> -> vector<1x10xf32>
    %227 = arith.addf %226, %200 : vector<1x10xf32>
    %c1_149 = arith.constant 1 : index
    %c0_150 = arith.constant 0 : index
    %228 = vector.load %arg16[%c1_149, %c0_150] : memref<2x10xf32, #tpu.memory_space<vmem>>, vector<1x10xf32>
    tpu.vector_store %arg16[%c1_149, %c0_150], %227 {strides = array<i32>} : memref<2x10xf32, #tpu.memory_space<vmem>>, vector<1x10xf32>,
    return
  }
  func.func @transform_0(%arg0: i32) -> (i32, i32, i32) {
    %c0_i32 = arith.constant 0 : i32
    %c0_i32_0 = arith.constant 0 : i32
    %c0_i32_1 = arith.constant 0 : i32
    return %arg0, %c0_i32, %c0_i32_0 : i32, i32, i32
  }
  func.func @transform_1(%arg0: i32) -> (i32, i32) {
    %c0_i32 = arith.constant 0 : i32
    %c0_i32_0 = arith.constant 0 : i32
    %c0_i32_1 = arith.constant 0 : i32
    return %c0_i32, %c0_i32_0 : i32, i32
  }
  func.func @transform_2(%arg0: i32) -> (i32, i32) {
    %c0_i32 = arith.constant 0 : i32
    %c0_i32_0 = arith.constant 0 : i32
    %c0_i32_1 = arith.constant 0 : i32
    return %c0_i32, %c0_i32_0 : i32, i32
  }
  func.func @transform_3(%arg0: i32) -> (i32, i32) {
    %c0_i32 = arith.constant 0 : i32
    %c0_i32_0 = arith.constant 0 : i32
    %c0_i32_1 = arith.constant 0 : i32
    return %c0_i32, %c0_i32_0 : i32, i32
  }
  func.func @transform_4(%arg0: i32) -> (i32, i32) {
    %c0_i32 = arith.constant 0 : i32
    %c0_i32_0 = arith.constant 0 : i32
    %c0_i32_1 = arith.constant 0 : i32
    return %c0_i32, %c0_i32_0 : i32, i32
  }
  func.func @transform_5(%arg0: i32) -> (i32, i32) {
    %c0_i32 = arith.constant 0 : i32
    %c0_i32_0 = arith.constant 0 : i32
    %c0_i32_1 = arith.constant 0 : i32
    return %c0_i32, %c0_i32_0 : i32, i32
  }
  func.func @transform_6(%arg0: i32) -> (i32, i32) {
    %c0_i32 = arith.constant 0 : i32
    %c0_i32_0 = arith.constant 0 : i32
    %c0_i32_1 = arith.constant 0 : i32
    return %c0_i32, %c0_i32_0 : i32, i32
  }
  func.func @transform_7(%arg0: i32) -> (i32, i32) {
    %c0_i32 = arith.constant 0 : i32
    %c0_i32_0 = arith.constant 0 : i32
    %c0_i32_1 = arith.constant 0 : i32
    return %c0_i32, %c0_i32_0 : i32, i32
  }
  func.func @transform_8(%arg0: i32) -> (i32, i32) {
    %c0_i32 = arith.constant 0 : i32
    %c0_i32_0 = arith.constant 0 : i32
    %c0_i32_1 = arith.constant 0 : i32
    return %c0_i32, %c0_i32_0 : i32, i32
  }
  func.func @transform_9(%arg0: i32) -> (i32, i32) {
    %c0_i32 = arith.constant 0 : i32
    %c0_i32_0 = arith.constant 0 : i32
    %c0_i32_1 = arith.constant 0 : i32
    return %c0_i32, %c0_i32_0 : i32, i32
  }
  func.func @transform_10(%arg0: i32) -> (i32, i32) {
    %c0_i32 = arith.constant 0 : i32
    %c0_i32_0 = arith.constant 0 : i32
    %c0_i32_1 = arith.constant 0 : i32
    return %c0_i32, %c0_i32_0 : i32, i32
  }
  func.func @transform_11(%arg0: i32) -> (i32, i32, i32) {
    %c0_i32 = arith.constant 0 : i32
    %c0_i32_0 = arith.constant 0 : i32
    %c0_i32_1 = arith.constant 0 : i32
    %c0_i32_2 = arith.constant 0 : i32
    return %c0_i32, %c0_i32_0, %c0_i32_1 : i32, i32, i32
  }
  func.func @transform_12(%arg0: i32) -> (i32, i32) {
    %c0_i32 = arith.constant 0 : i32
    %c0_i32_0 = arith.constant 0 : i32
    %c0_i32_1 = arith.constant 0 : i32
    return %c0_i32, %c0_i32_0 : i32, i32
  }
  func.func @transform_13(%arg0: i32) -> (i32, i32) {
    %c0_i32 = arith.constant 0 : i32
    %c0_i32_0 = arith.constant 0 : i32
    %c0_i32_1 = arith.constant 0 : i32
    return %c0_i32, %c0_i32_0 : i32, i32
  }
  func.func @transform_14(%arg0: i32) -> (i32, i32) {
    %c0_i32 = arith.constant 0 : i32
    %c0_i32_0 = arith.constant 0 : i32
    %c0_i32_1 = arith.constant 0 : i32
    return %c0_i32, %c0_i32_0 : i32, i32
  }
  func.func @transform_15(%arg0: i32) -> (i32, i32) {
    %c0_i32 = arith.constant 0 : i32
    %c0_i32_0 = arith.constant 0 : i32
    return %arg0, %c0_i32 : i32, i32
  }
}

</mosaic_0001>

<bundles_post_ra>
// kernel: wdcnn_forward.1
= control target key start
LH: loop header
LB: loop body
LE: loop exit
PB: predicated region body
PF: predicated region fallthrough
CT: control target
= control target key end

     0   :  { %vm550_vm0 = vcmask 130048   ;;  %s9632_s0 = inlined_call_operand.vmem [shape: f32[2,131,16], index: 0, kind: input, shape index: {}]   ;;  %s9633_s1 = inlined_call_operand.vmem [shape: f32[64,16], index: 1, kind: input, shape index: {}]   ;;  %s9634_s2 = inlined_call_operand.vmem [shape: f32[1,16], index: 2, kind: input, shape index: {}]   ;;  %s9635_s3 = inlined_call_operand.vmem [shape: f32[48,32], index: 3, kind: input, shape index: {}]   ;;  %s9636_s4 = inlined_call_operand.vmem [shape: f32[1,32], index: 4, kind: input, shape index: {}]   ;;  %s9637_s5 = inlined_call_operand.vmem [shape: f32[96,64], index: 5, kind: input, shape index: {}]   ;;  %s9638_s6 = inlined_call_operand.vmem [shape: f32[1,64], index: 6, kind: input, shape index: {}]   ;;  %s9639_s7 = inlined_call_operand.vmem [shape: f32[192,64], index: 7, kind: input, shape index: {}]   ;;  %s9640_s8 = inlined_call_operand.vmem [shape: f32[1,64], index: 8, kind: input, shape index: {}]   ;;  %s9641_s9 = inlined_call_operand.vmem [shape: f32[192,64], index: 9, kind: input, shape index: {}]   ;;  %s9642_s10 = inlined_call_operand.vmem [shape: f32[1,64], index: 10, kind: input, shape index: {}]   ;;  %s9643_s11 = inlined_call_operand.vmem [shape: f32[3,64,100], index: 11, kind: input, shape index: {}]   ;;  %s9644_s12 = inlined_call_operand.vmem [shape: f32[1,100], index: 12, kind: input, shape index: {}]   ;;  %s9645_s13 = inlined_call_operand.vmem [shape: f32[100,10], index: 13, kind: input, shape index: {}]   ;;  %s9646_s14 = inlined_call_operand.vmem [shape: f32[1,10], index: 14, kind: input, shape index: {}]   ;;  %s9647_s15 = inlined_call_operand.hbm [shape: f32[2,10], index: 15, kind: output, shape index: {}]  }
   0x1   :  { %v512_v0 = vld [vmem:[%s9633_s1 + $0x18] sm:$0xff]  ;;  %v510_v1 = vld [vmem:[%s9633_s1 + $0x8] sm:$0xff]  ;;  %v511_v3 = vld [vmem:[%s9633_s1 + $0x10] sm:$0xff] }
   0x2   :  { %v514_v2 = vld [vmem:[%s9633_s1 + $0x28] sm:$0xff]  ;;  %613 = vmatpush.msra.mxu0 %v512_v0  ;;  %726 = vmatpush.msra.mxu1 %v510_v1  ;;  %v509_v4 = vld [vmem:[%s9633_s1] sm:$0xff]  ;;  %v516_v9 = vld [vmem:[%s9633_s1 + $0x38] sm:$0xff] }
   0x3   :  { %v513_v5 = vld [vmem:[%s9633_s1 + $0x20] sm:$0xff]  ;;  %855 = vmatpush.msra.mxu2 %v514_v2  ;;  %v515_v10 = vld [vmem:[%s9633_s1 + $0x30] sm:$0xff]  ;;  %7038 = vmatpush.msra.mxu3 %v516_v9  ;;  %v519_v13 = vld [vmem:[%s9632_s0 + $0x8] sm:$0xff] }
   0x4   :  { %v534_v6 = vld [vmem:[%s9632_s0 + $0x1] sm:$0xff]  ;;  %614 = vmatpush.msra.mxu0 %v511_v3  ;;  %727 = vmatpush.msra.mxu1 %v509_v4  ;;  %v923_v11 = vld [vmem:[%s9632_s0 + $0xb] sm:$0xff] }
   0x5   :  { %v518_v7 = vld [vmem:[%s9632_s0] sm:$0xff]  ;;  %856 = vmatpush.msra.mxu2 %v513_v5  ;;  %6440 = vmatmul.msk.f32.vlgmr.msra.gmra.mxu0 %vm550_vm0, %v534_v6  ;;  %v535_v12 = vld [vmem:[%s9632_s0 + $0x9] sm:$0xff] }
   0x6   :  { %v777_v8 = vld [vmem:[%s9632_s0 + $0x2] sm:$0xff]  ;;  %6456 = vmatmul.msk.f32.vlgmr.msra.gmra.mxu1 %vm550_vm0, %v518_v7  ;;  %1000 = vmatpush.msrb.mxu0 %v516_v9  ;;  %v778_v14 = vld [vmem:[%s9632_s0 + $0xa] sm:$0xff] }
   0x7   :  { %6472 = vmatmul.msk.f32.vlgmr.msra.gmra.mxu2 %vm550_vm0, %v777_v8  ;;  %1326 = vmatpush.msrb.mxu1 %v510_v1 }
   0x8   :  { %1455 = vmatpush.msrb.mxu2 %v514_v2  ;;  %7039 = vmatpush.msra.mxu3 %v515_v10 }
   0x9   :  { %1001 = vmatpush.msrb.mxu0 %v515_v10  ;;  %6489 = vmatmul.msk.f32.vlgmr.msra.gmra.mxu3 %vm550_vm0, %v923_v11 }
   0xa   :  { %1456 = vmatpush.msrb.mxu2 %v513_v5  ;;  %1327 = vmatpush.msrb.mxu1 %v509_v4 }
   0xb   :  { %1600 = vmatpush.msrb.mxu3 %v516_v9  ;;  %1213 = vmatpush.msra.mxu0 %v512_v0 }
   0xc   :  { %20 = vsyncpa [#allocation4], 0  ;;  %v924_v15 = vld [vmem:[%s9632_s0 + $0x13] sm:$0xff]  ;;  %v925_v19 = vld [vmem:[%s9632_s0 + $0x1b] sm:$0xff]  ;;  %vm51_vm1 = vcmask 523264   ;;  %vm2928_vm5 = vcmask 261120  }
   0xd   :  { %6441 = vmatmul.msk.f32.gmra.mxu0 %vm550_vm0, %v535_v12  ;;  %1601 = vmatpush.msrb.mxu3 %v515_v10  ;;  %v536_v16 = vld [vmem:[%s9632_s0 + $0x11] sm:$0xff]  ;;  %v537_v20 = vld [vmem:[%s9632_s0 + $0x19] sm:$0xff]  ;;  %v926_v23 = vld [vmem:[%s9632_s0 + $0x23] sm:$0xff]  ;;  %vm6302_vm11 = vcmask 1043456   ;;  %vm6298_vm12 = vcmask 818176   ;;  %vm6326_vm13 = vcmask 73728  }
   0xe   :  { %6457 = vmatmul.msk.f32.gmra.mxu1 %vm550_vm0, %v519_v13  ;;  %1214 = vmatpush.msra.mxu0 %v511_v3  ;;  %v520_v17 = vld [vmem:[%s9632_s0 + $0x10] sm:$0xff]  ;;  %v521_v21 = vld [vmem:[%s9632_s0 + $0x18] sm:$0xff]  ;;  %v538_v24 = vld [vmem:[%s9632_s0 + $0x21] sm:$0xff]  ;;  %v7077_v3 = vmov 0.0   ;;  %s7078_s21 = smov [#allocation3]  }
   0xf   :  { %6473 = vmatmul.msk.f32.gmra.mxu2 %vm550_vm0, %v778_v14  ;;  %v779_v18 = vld [vmem:[%s9632_s0 + $0x12] sm:$0xff]  ;;  %v780_v22 = vld [vmem:[%s9632_s0 + $0x1a] sm:$0xff]  ;;  %v781_v26 = vld [vmem:[%s9632_s0 + $0x22] sm:$0xff]  ;;  %57 = vst.msk [vmem:[#allocation2 + $0x28] sm:$0xff] %vm51_vm1, %v7077_v3 }
  0x10   :  { %v522_v25 = vld [vmem:[%s9632_s0 + $0x20] sm:$0xff]  ;;  %v927_v27 = vld [vmem:[%s9632_s0 + $0x2b] sm:$0xff]  ;;  %v928_v31 = vld [vmem:[%s9632_s0 + $0x33] sm:$0xff]  ;;  %55 = vst.msk [vmem:[#allocation2 + $0x18] sm:$0xff] %vm51_vm1, %v7077_v3 }
  0x11   :  { %6490 = vmatmul.msk.f32.gmra.mxu3 %vm550_vm0, %v924_v15  ;;  %v539_v28 = vld [vmem:[%s9632_s0 + $0x29] sm:$0xff]  ;;  %v540_v32 = vld [vmem:[%s9632_s0 + $0x31] sm:$0xff]  ;;  %v929_v35 = vld [vmem:[%s9632_s0 + $0x3b] sm:$0xff]  ;;  %56 = vst.msk [vmem:[#allocation2 + $0x20] sm:$0xff] %vm51_vm1, %v7077_v3 }
  0x12   :  { %v523_v29 = vld [vmem:[%s9632_s0 + $0x28] sm:$0xff]  ;;  %v524_v33 = vld [vmem:[%s9632_s0 + $0x30] sm:$0xff]  ;;  %v541_v36 = vld [vmem:[%s9632_s0 + $0x39] sm:$0xff]  ;;  %58 = vst.msk [vmem:[#allocation2 + $0x30] sm:$0xff] %vm51_vm1, %v7077_v3 }
  0x13   :  { %v782_v30 = vld [vmem:[%s9632_s0 + $0x2a] sm:$0xff]  ;;  %v783_v34 = vld [vmem:[%s9632_s0 + $0x32] sm:$0xff]  ;;  %v784_v38 = vld [vmem:[%s9632_s0 + $0x3a] sm:$0xff]  ;;  %59 = vst.msk [vmem:[#allocation2 + $0x38] sm:$0xff] %vm51_vm1, %v7077_v3 }
  0x14   :  { %v525_v37 = vld [vmem:[%s9632_s0 + $0x38] sm:$0xff]  ;;  %v930_v39 = vld [vmem:[%s9632_s0 + $0x43] sm:$0xff]  ;;  %v931_v43 = vld [vmem:[%s9632_s0 + $0x4b] sm:$0xff]  ;;  %60 = vst.msk [vmem:[#allocation2 + $0x40] sm:$0xff] %vm51_vm1, %v7077_v3 }
  0x15   :  { %6442 = vmatmul.msk.f32.gmra.mxu0 %vm550_vm0, %v536_v16  ;;  %v542_v40 = vld [vmem:[%s9632_s0 + $0x41] sm:$0xff]  ;;  %v543_v44 = vld [vmem:[%s9632_s0 + $0x49] sm:$0xff]  ;;  %v932_v47 = vld [vmem:[%s9632_s0 + $0x53] sm:$0xff]  ;;  %61 = vst.msk [vmem:[#allocation2 + $0x48] sm:$0xff] %vm51_vm1, %v7077_v3 }
  0x16   :  { %6458 = vmatmul.msk.f32.gmra.mxu1 %vm550_vm0, %v520_v17  ;;  %v526_v41 = vld [vmem:[%s9632_s0 + $0x40] sm:$0xff]  ;;  %v527_v45 = vld [vmem:[%s9632_s0 + $0x48] sm:$0xff]  ;;  %v544_v48 = vld [vmem:[%s9632_s0 + $0x51] sm:$0xff]  ;;  %62 = vst.msk [vmem:[#allocation2 + $0x50] sm:$0xff] %vm51_vm1, %v7077_v3 }
  0x17   :  { %6474 = vmatmul.msk.f32.gmra.mxu2 %vm550_vm0, %v779_v18  ;;  %v785_v42 = vld [vmem:[%s9632_s0 + $0x42] sm:$0xff]  ;;  %v786_v46 = vld [vmem:[%s9632_s0 + $0x4a] sm:$0xff]  ;;  %v787_v50 = vld [vmem:[%s9632_s0 + $0x52] sm:$0xff]  ;;  %63 = vst.msk [vmem:[#allocation2 + $0x58] sm:$0xff] %vm51_vm1, %v7077_v3 }
  0x18   :  { %v528_v49 = vld [vmem:[%s9632_s0 + $0x50] sm:$0xff]  ;;  %v933_v51 = vld [vmem:[%s9632_s0 + $0x5b] sm:$0xff]  ;;  %v934_v55 = vld [vmem:[%s9632_s0 + $0x63] sm:$0xff]  ;;  %64 = vst.msk [vmem:[#allocation2 + $0x60] sm:$0xff] %vm51_vm1, %v7077_v3 }
  0x19   :  { %6491 = vmatmul.msk.f32.gmra.mxu3 %vm550_vm0, %v925_v19  ;;  %v545_v52 = vld [vmem:[%s9632_s0 + $0x59] sm:$0xff]  ;;  %v546_v56 = vld [vmem:[%s9632_s0 + $0x61] sm:$0xff]  ;;  %v935_v59 = vld [vmem:[%s9632_s0 + $0x6b] sm:$0xff]  ;;  %65 = vst.msk [vmem:[#allocation2 + $0x68] sm:$0xff] %vm51_vm1, %v7077_v3 }
  0x1a   :  { %v529_v53 = vld [vmem:[%s9632_s0 + $0x58] sm:$0xff]  ;;  %v530_v57 = vld [vmem:[%s9632_s0 + $0x60] sm:$0xff]  ;;  %v547_v60 = vld [vmem:[%s9632_s0 + $0x69] sm:$0xff]  ;;  %66 = vst.msk [vmem:[#allocation2 + $0x70] sm:$0xff] %vm51_vm1, %v7077_v3 }
  0x1b   :  { %v788_v54 = vld [vmem:[%s9632_s0 + $0x5a] sm:$0xff]  ;;  %v789_v58 = vld [vmem:[%s9632_s0 + $0x62] sm:$0xff]  ;;  %v790_v62 = vld [vmem:[%s9632_s0 + $0x6a] sm:$0xff]  ;;  %67 = vst.msk [vmem:[#allocation2 + $0x78] sm:$0xff] %vm51_vm1, %v7077_v3 }
  0x1c   :  { %v531_v61 = vld [vmem:[%s9632_s0 + $0x68] sm:$0xff]  ;;  %v936_v63 = vld [vmem:[%s9632_s0 + $0x73] sm:$0xff]  ;;  %v937_v4 = vld [vmem:[%s9632_s0 + $0x7b] sm:$0xff]  ;;  %68 = vst.msk [vmem:[#allocation2 + $0x80] sm:$0xff] %vm51_vm1, %v7077_v3 }
  0x1d   :  { %6443 = vmatmul.msk.f32.gmra.mxu0 %vm550_vm0, %v537_v20  ;;  %v548_v0 = vld [vmem:[%s9632_s0 + $0x71] sm:$0xff]  ;;  %v549_v5 = vld [vmem:[%s9632_s0 + $0x79] sm:$0xff]  ;;  %v922_v10 = vld [vmem:[%s9632_s0 + $0x3] sm:$0xff]  ;;  %69 = vst.msk [vmem:[#allocation2 + $0x88] sm:$0xff] %vm51_vm1, %v7077_v3 }
  0x1e   :  { %6459 = vmatmul.msk.f32.gmra.mxu1 %vm550_vm0, %v521_v21  ;;  %v532_v1 = vld [vmem:[%s9632_s0 + $0x70] sm:$0xff]  ;;  %v533_v6 = vld [vmem:[%s9632_s0 + $0x78] sm:$0xff]  ;;  %v6504_v13 = vld [vmem:[%s9632_s0 + $0x88] sm:$0xff]  ;;  %70 = vst.msk [vmem:[#allocation2 + $0x90] sm:$0xff] %vm51_vm1, %v7077_v3 }
  0x1f   :  { %6475 = vmatmul.msk.f32.gmra.mxu2 %vm550_vm0, %v780_v22  ;;  %v791_v2 = vld [vmem:[%s9632_s0 + $0x72] sm:$0xff]  ;;  %v792_v7 = vld [vmem:[%s9632_s0 + $0x7a] sm:$0xff]  ;;  %v6568_v12 = vld [vmem:[%s9632_s0 + $0x8a] sm:$0xff]  ;;  %71 = vst.msk [vmem:[#allocation2 + $0x98] sm:$0xff] %vm51_vm1, %v7077_v3 }
  0x20   :  { %v6600_v8 = vld [vmem:[%s9632_s0 + $0x8b] sm:$0xff]  ;;  %v6601_v14 = vld [vmem:[%s9632_s0 + $0x93] sm:$0xff]  ;;  %72 = vst.msk [vmem:[#allocation2 + $0xa0] sm:$0xff] %vm51_vm1, %v7077_v3 }
  0x21   :  { %6492 = vmatmul.msk.f32.gmra.mxu3 %vm550_vm0, %v926_v23  ;;  %v1846_v16 = vld [vmem:[%s9635_s3 + $0x18] sm:$0xff]  ;;  %v6520_v18 = vld [vmem:[%s9632_s0 + $0x89] sm:$0xff]  ;;  %73 = vst.msk [vmem:[#allocation2 + $0xa8] sm:$0xff] %vm51_vm1, %v7077_v3 }
  0x22   :  { %v6569_v20 = vld [vmem:[%s9632_s0 + $0x92] sm:$0xff]  ;;  %74 = vst.msk [vmem:[#allocation2 + $0xb0] sm:$0xff] %vm51_vm1, %v7077_v3  ;;  %v6602_v23 = vld [vmem:[%s9632_s0 + $0x9b] sm:$0xff] }
  0x23   :  { %v6505_v21 = vld [vmem:[%s9632_s0 + $0x90] sm:$0xff]  ;;  %75 = vst.msk [vmem:[#allocation2 + $0xb8] sm:$0xff] %vm51_vm1, %v7077_v3 }
  0x24   :  { %76 = vst.msk [vmem:[#allocation2 + $0xc0] sm:$0xff] %vm51_vm1, %v7077_v3 }
  0x25   :  { %6444 = vmatmul.msk.f32.gmra.mxu0 %vm550_vm0, %v538_v24  ;;  %77 = vst.msk [vmem:[#allocation2 + $0xc8] sm:$0xff] %vm51_vm1, %v7077_v3 }
  0x26   :  { %6460 = vmatmul.msk.f32.gmra.mxu1 %vm550_vm0, %v522_v25  ;;  %78 = vst.msk [vmem:[#allocation2 + $0xd0] sm:$0xff] %vm51_vm1, %v7077_v3 }
  0x27   :  { %6476 = vmatmul.msk.f32.gmra.mxu2 %vm550_vm0, %v781_v26  ;;  %79 = vst.msk [vmem:[#allocation2 + $0xd8] sm:$0xff] %vm51_vm1, %v7077_v3 }
  0x28   :  { %80 = vst.msk [vmem:[#allocation2 + $0xe0] sm:$0xff] %vm51_vm1, %v7077_v3 }
  0x29   :  { %6493 = vmatmul.msk.f32.gmra.mxu3 %vm550_vm0, %v927_v27  ;;  %81 = vst.msk [vmem:[#allocation2 + $0xe8] sm:$0xff] %vm51_vm1, %v7077_v3 }
  0x2a   :  { %82 = vst.msk [vmem:[#allocation2 + $0xf0] sm:$0xff] %vm51_vm1, %v7077_v3 }
  0x2b   :  { %83 = vst.msk [vmem:[#allocation2 + $0xf8] sm:$0xff] %vm51_vm1, %v7077_v3 }
  0x2c   :  { %84 = vst.msk [vmem:[#allocation2 + $0x100] sm:$0xff] %vm51_vm1, %v7077_v3 }
  0x2d   :  { %6445 = vmatmul.msk.f32.gmra.mxu0 %vm550_vm0, %v539_v28  ;;  %v7534_v28 = vld [vmem:[%s9634_s2] ss:$0 sm:$0xff]  ;;  %85 = vst.msk [vmem:[#allocation2 + $0x108] sm:$0xff] %vm51_vm1, %v7077_v3 }
  0x2e   :  { %6461 = vmatmul.msk.f32.gmra.mxu1 %vm550_vm0, %v523_v29  ;;  %v6521_v29 = vld [vmem:[%s9632_s0 + $0x91] sm:$0xff]  ;;  %86 = vst.msk [vmem:[#allocation2 + $0x110] sm:$0xff] %vm51_vm1, %v7077_v3 }
  0x2f   :  { %6477 = vmatmul.msk.f32.gmra.mxu2 %vm550_vm0, %v782_v30  ;;  %87 = vst.msk [vmem:[#allocation2 + $0x118] sm:$0xff] %vm51_vm1, %v7077_v3 }
  0x30   :  { %88 = vst.msk [vmem:[#allocation2 + $0x120] sm:$0xff] %vm51_vm1, %v7077_v3 }
  0x31   :  { %6494 = vmatmul.msk.f32.gmra.mxu3 %vm550_vm0, %v928_v31  ;;  %v6570_v31 = vld [vmem:[%s9632_s0 + $0x9a] sm:$0xff]  ;;  %89 = vst.msk [vmem:[#allocation2 + $0x128] sm:$0xff] %vm51_vm1, %v7077_v3 }
  0x32   :  { %90 = vst.msk [vmem:[#allocation2 + $0x130] sm:$0xff] %vm51_vm1, %v7077_v3 }
  0x33   :  { %91 = vst.msk [vmem:[#allocation2 + $0x138] sm:$0xff] %vm51_vm1, %v7077_v3 }
  0x35   :  { %6446 = vmatmul.msk.f32.gmra.mxu0 %vm550_vm0, %v540_v32  ;;  %v6506_v32 = vld [vmem:[%s9632_s0 + $0x98] sm:$0xff] }
  0x36   :  { %6462 = vmatmul.msk.f32.gmra.mxu1 %vm550_vm0, %v524_v33 }
  0x37   :  { %6478 = vmatmul.msk.f32.gmra.mxu2 %vm550_vm0, %v783_v34 }
  0x39   :  { %6495 = vmatmul.msk.f32.gmra.mxu3 %vm550_vm0, %v929_v35 }
  0x3d   :  { %6447 = vmatmul.msk.f32.gmra.mxu0 %vm550_vm0, %v541_v36  ;;  %v6603_v36 = vld [vmem:[%s9632_s0 + $0xa3] sm:$0xff] }
  0x3e   :  { %6463 = vmatmul.msk.f32.gmra.mxu1 %vm550_vm0, %v525_v37 }
  0x3f   :  { %6479 = vmatmul.msk.f32.gmra.mxu2 %vm550_vm0, %v784_v38 }
  0x41   :  { %6496 = vmatmul.msk.f32.gmra.mxu3 %vm550_vm0, %v930_v39 }
  0x45   :  { %6448 = vmatmul.msk.f32.gmra.mxu0 %vm550_vm0, %v542_v40 }
  0x46   :  { %6464 = vmatmul.msk.f32.gmra.mxu1 %vm550_vm0, %v526_v41 }
  0x47   :  { %6480 = vmatmul.msk.f32.gmra.mxu2 %vm550_vm0, %v785_v42  ;;  %v6522_v42 = vld [vmem:[%s9632_s0 + $0x99] sm:$0xff] }
  0x49   :  { %6497 = vmatmul.msk.f32.gmra.mxu3 %vm550_vm0, %v931_v43 }
  0x4d   :  { %6449 = vmatmul.msk.f32.gmra.mxu0 %vm550_vm0, %v543_v44  ;;  %v6571_v44 = vld [vmem:[%s9632_s0 + $0xa2] sm:$0xff] }
  0x4e   :  { %6465 = vmatmul.msk.f32.gmra.mxu1 %vm550_vm0, %v527_v45  ;;  %v6507_v45 = vld [vmem:[%s9632_s0 + $0xa0] sm:$0xff] }
  0x4f   :  { %6481 = vmatmul.msk.f32.gmra.mxu2 %vm550_vm0, %v786_v46 }
  0x51   :  { %6498 = vmatmul.msk.f32.gmra.mxu3 %vm550_vm0, %v932_v47 }
  0x55   :  { %6450 = vmatmul.msk.f32.gmra.mxu0 %vm550_vm0, %v544_v48 }
  0x56   :  { %6466 = vmatmul.msk.f32.gmra.mxu1 %vm550_vm0, %v528_v49  ;;  %v6604_v49 = vld [vmem:[%s9632_s0 + $0xab] sm:$0xff] }
  0x57   :  { %6482 = vmatmul.msk.f32.gmra.mxu2 %vm550_vm0, %v787_v50 }
  0x59   :  { %6499 = vmatmul.msk.f32.gmra.mxu3 %vm550_vm0, %v933_v51 }
  0x5d   :  { %6451 = vmatmul.msk.f32.gmra.mxu0 %vm550_vm0, %v545_v52 }
  0x5e   :  { %6467 = vmatmul.msk.f32.gmra.mxu1 %vm550_vm0, %v529_v53  ;;  %v1848_v53 = vld [vmem:[%s9635_s3 + $0x28] sm:$0xff] }
  0x5f   :  { %6483 = vmatmul.msk.f32.gmra.mxu2 %vm550_vm0, %v788_v54  ;;  %v1844_v54 = vld [vmem:[%s9635_s3 + $0x8] sm:$0xff] }
  0x60   :  { %2730 = vmatpush.msra.mxu2 %v1848_v53  ;;  %2521 = vmatpush.msra.mxu1 %v1844_v54 }
  0x61   :  { %6500 = vmatmul.msk.f32.gmra.mxu3 %vm550_vm0, %v934_v55 }
  0x65   :  { %6452 = vmatmul.msk.f32.gmra.mxu0 %vm550_vm0, %v546_v56 }
  0x66   :  { %6468 = vmatmul.msk.f32.gmra.mxu1 %vm550_vm0, %v530_v57  ;;  %v6523_v57 = vld [vmem:[%s9632_s0 + $0xa1] sm:$0xff] }
  0x67   :  { %6484 = vmatmul.msk.f32.gmra.mxu2 %vm550_vm0, %v789_v58 }
  0x69   :  { %6501 = vmatmul.msk.f32.gmra.mxu3 %vm550_vm0, %v935_v59  ;;  %v6572_v59 = vld [vmem:[%s9632_s0 + $0xaa] sm:$0xff] }
  0x6d   :  { %6453 = vmatmul.msk.f32.gmra.mxu0 %vm550_vm0, %v547_v60  ;;  %v6508_v60 = vld [vmem:[%s9632_s0 + $0xa8] sm:$0xff] }
  0x6e   :  { %6469 = vmatmul.msk.f32.gmra.mxu1 %vm550_vm0, %v531_v61 }
  0x6f   :  { %6485 = vmatmul.msk.f32.gmra.mxu2 %vm550_vm0, %v790_v62 }
  0x71   :  { %6502 = vmatmul.msk.f32.gmra.mxu3 %vm550_vm0, %v936_v63 }
  0x75   :  { %6454 = vmatmul.msk.f32.gmra.mxu0 %vm550_vm0, %v548_v0  ;;  %v6605_v0 = vld [vmem:[%s9632_s0 + $0xb3] sm:$0xff] }
  0x76   :  { %6470 = vmatmul.msk.f32.gmra.mxu1 %vm550_vm0, %v532_v1 }
  0x77   :  { %6486 = vmatmul.msk.f32.gmra.mxu2 %vm550_vm0, %v791_v2 }
  0x79   :  { %6503 = vmatmul.msk.f32.gmra.mxu3 %vm550_vm0, %v937_v4 }
  0x7d   :  { %6455 = vmatmul.msk.f32.gmra.mxu0 %vm550_vm0, %v549_v5 }
  0x7e   :  { %6471 = vmatmul.msk.f32.gmra.mxu1 %vm550_vm0, %v533_v6 }
  0x7f   :  { %6487 = vmatmul.msk.f32.gmra.mxu2 %vm550_vm0, %v792_v7  ;;  %v6524_v7 = vld [vmem:[%s9632_s0 + $0xa9] sm:$0xff] }
  0x81   :  { %6616 = vmatmul.msk.f32.vlgmr.msrb.gmra.mxu3 %vm550_vm0, %v6600_v8 }
  0x82   :  { %v7458_v9 = vpop.f32.mrf.mxu0 }
  0x83   :  { %v7466_v11 = vpop.f32.mrf.mxu1 }
  0x85   :  { %6488 = vmatmul.msk.f32.vlgmr.msrb.gmra.mxu0 %vm550_vm0, %v922_v10  ;;  %v6573_v10 = vld [vmem:[%s9632_s0 + $0xb2] sm:$0xff] }
  0x86   :  { %6552 = vmatmul.msk.f32.vlgmr.msrb.gmra.mxu1 %vm550_vm0, %v6504_v13  ;;  %2312 = vmatpush.msrb.mxu0 %v1846_v16 }
  0x87   :  { %6584 = vmatmul.msk.f32.vlgmr.msrb.gmra.mxu2 %vm550_vm0, %v6568_v12  ;;  %v6509_v12 = vld [vmem:[%s9632_s0 + $0xb0] sm:$0xff] }
  0x89   :  { %6617 = vmatmul.msk.f32.gmra.mxu3 %vm550_vm0, %v6601_v14 }
  0x8a   :  { %v7492_v15 = vpop.f32.mrf.mxu2  ;;  %v619_v17 = vpop.f32.mrf.mxu0 }
  0x8b   :  { %v732_v19 = vpop.f32.mrf.mxu1 }
  0x8c   :  { %v1006_v22 = vpop.f32.mrf.mxu3  ;;  %v733_v24 = vadd.f32 %v732_v19, %v619_v17  ;;  %v6606_v17 = vld [vmem:[%s9632_s0 + $0xbb] sm:$0xff] }
  0x8d   :  { %6536 = vmatmul.msk.f32.vlgmr.msra.gmra.mxu0 %vm550_vm0, %v6520_v18 }
  0x8e   :  { %6553 = vmatmul.msk.f32.gmra.mxu1 %vm550_vm0, %v6505_v21 }
  0x8f   :  { %6585 = vmatmul.msk.f32.gmra.mxu2 %vm550_vm0, %v6569_v20 }
  0x91   :  { %6618 = vmatmul.msk.f32.gmra.mxu3 %vm550_vm0, %v6602_v23 }
  0x92   :  { %v861_v25 = vpop.f32.mrf.mxu2  ;;  %v622_v27 = vpop.f32.mrf.mxu0 }
  0x93   :  { %v907_v26 = vadd.f32 %v861_v25, %v733_v24  ;;  %v735_v30 = vpop.f32.mrf.mxu1  ;;  %v6525_v25 = vld [vmem:[%s9632_s0 + $0xb1] sm:$0xff] }
  0x94   :  { %v1009_v34 = vpop.f32.mrf.mxu3  ;;  %v736_v37 = vadd.f32 %v735_v30, %v622_v27  ;;  %v6574_v30 = vld [vmem:[%s9632_s0 + $0xba] sm:$0xff] }
  0x95   :  { %v1052_v33 = vadd.f32 %v1006_v22, %v907_v26  ;;  %6537 = vmatmul.msk.f32.gmra.mxu0 %vm550_vm0, %v6521_v29 }
  0x96   :  { %6554 = vmatmul.msk.f32.gmra.mxu1 %vm550_vm0, %v6506_v32 }
  0x97   :  { %v1071_v35 = vadd.f32 %v7534_v28, %v1052_v33  ;;  %6586 = vmatmul.msk.f32.gmra.mxu2 %vm550_vm0, %v6570_v31  ;;  %v6510_v31 = vld [vmem:[%s9632_s0 + $0xb8] sm:$0xff] }
  0x99   :  { %v1087_v38 = vmax.f32 %v1071_v35, 0.0  ;;  %6619 = vmatmul.msk.f32.gmra.mxu3 %vm550_vm0, %v6603_v36  ;;  %v6607_v35 = vld [vmem:[%s9632_s0 + $0xc3] sm:$0xff] }
  0x9a   :  { %v864_v39 = vpop.f32.mrf.mxu2  ;;  %v625_v41 = vpop.f32.mrf.mxu0 }
  0x9b   :  { %1103 = vst.msk [vmem:[#allocation2 + $0x28] sm:$0xff] %vm550_vm0, %v1087_v38  ;;  %v908_v40 = vadd.f32 %v864_v39, %v736_v37  ;;  %v738_v43 = vpop.f32.mrf.mxu1 }
  0x9c   :  { %v1012_v47 = vpop.f32.mrf.mxu3  ;;  %v739_v50 = vadd.f32 %v738_v43, %v625_v41  ;;  %v6526_v43 = vld [vmem:[%s9632_s0 + $0xb9] sm:$0xff] }
  0x9d   :  { %v1053_v46 = vadd.f32 %v1009_v34, %v908_v40  ;;  %6538 = vmatmul.msk.f32.gmra.mxu0 %vm550_vm0, %v6522_v42 }
  0x9e   :  { %6555 = vmatmul.msk.f32.gmra.mxu1 %vm550_vm0, %v6507_v45 }
  0x9f   :  { %v1072_v48 = vadd.f32 %v7534_v28, %v1053_v46  ;;  %6587 = vmatmul.msk.f32.gmra.mxu2 %vm550_vm0, %v6571_v44  ;;  %v6575_v46 = vld [vmem:[%s9632_s0 + $0xc2] sm:$0xff] }
  0xa1   :  { %v1088_v51 = vmax.f32 %v1072_v48, 0.0  ;;  %6620 = vmatmul.msk.f32.gmra.mxu3 %vm550_vm0, %v6604_v49 }
  0xa2   :  { %v867_v52 = vpop.f32.mrf.mxu2  ;;  %v628_v56 = vpop.f32.mrf.mxu0 }
  0xa3   :  { %1104 = vst.msk [vmem:[#allocation2 + $0x30] sm:$0xff] %vm550_vm0, %v1088_v51  ;;  %v909_v55 = vadd.f32 %v867_v52, %v739_v50  ;;  %v741_v58 = vpop.f32.mrf.mxu1  ;;  %v6608_v51 = vld [vmem:[%s9632_s0 + $0xcb] sm:$0xff] }
  0xa4   :  { %v1015_v62 = vpop.f32.mrf.mxu3  ;;  %v742_v1 = vadd.f32 %v741_v58, %v628_v56 }
  0xa5   :  { %v1054_v61 = vadd.f32 %v1012_v47, %v909_v55  ;;  %6539 = vmatmul.msk.f32.gmra.mxu0 %vm550_vm0, %v6523_v57  ;;  %v6511_v47 = vld [vmem:[%s9632_s0 + $0xc0] sm:$0xff] }
  0xa6   :  { %6556 = vmatmul.msk.f32.gmra.mxu1 %vm550_vm0, %v6508_v60 }
  0xa7   :  { %v1073_v63 = vadd.f32 %v7534_v28, %v1054_v61  ;;  %6588 = vmatmul.msk.f32.gmra.mxu2 %vm550_vm0, %v6572_v59  ;;  %v6527_v59 = vld [vmem:[%s9632_s0 + $0xc1] sm:$0xff] }
  0xa9   :  { %v1089_v2 = vmax.f32 %v1073_v63, 0.0  ;;  %6621 = vmatmul.msk.f32.gmra.mxu3 %vm550_vm0, %v6605_v0  ;;  %v6512_v63 = vld [vmem:[%s9632_s0 + $0xc8] sm:$0xff] }
  0xaa   :  { %v870_v4 = vpop.f32.mrf.mxu2  ;;  %v631_v6 = vpop.f32.mrf.mxu0  ;;  %v1717_v20 = vld [vmem:[#allocation2 + $0x30] sm:$0xff] }
  0xab   :  { %1105 = vst.msk [vmem:[#allocation2 + $0x38] sm:$0xff] %vm550_vm0, %v1089_v2  ;;  %v910_v5 = vadd.f32 %v870_v4, %v742_v1  ;;  %v744_v8 = vpop.f32.mrf.mxu1  ;;  %v7640_v27 = vld [vmem:[#allocation2 + $0x29] sm:$0xff]  ;;  %v6609_v4 = vld [vmem:[%s9632_s0 + $0xd3] sm:$0xff] }
  0xac   :  { %v1018_v14 = vpop.f32.mrf.mxu3  ;;  %v745_v18 = vadd.f32 %v744_v8, %v631_v6 }
  0xad   :  { %v1055_v13 = vadd.f32 %v1015_v62, %v910_v5  ;;  %6540 = vmatmul.msk.f32.gmra.mxu0 %vm550_vm0, %v6524_v7  ;;  %v6576_v62 = vld [vmem:[%s9632_s0 + $0xca] sm:$0xff] }
  0xae   :  { %6557 = vmatmul.msk.f32.gmra.mxu1 %vm550_vm0, %v6509_v12  ;;  %v1845_v12 = vld [vmem:[%s9635_s3 + $0x10] sm:$0xff] }
  0xaf   :  { %v1074_v16 = vadd.f32 %v7534_v28, %v1055_v13  ;;  %6589 = vmatmul.msk.f32.gmra.mxu2 %vm550_vm0, %v6573_v10  ;;  %2313 = vmatpush.msrb.mxu0 %v1845_v12 }
  0xb1   :  { %v1090_v19 = vmax.f32 %v1074_v16, 0.0  ;;  %6622 = vmatmul.msk.f32.gmra.mxu3 %vm550_vm0, %v6606_v17  ;;  %v6528_v16 = vld [vmem:[%s9632_s0 + $0xc9] sm:$0xff] }
  0xb2   :  { %v1749_v21 = vld [vmem:[#allocation2 + $0x31] sm:$0xff]  ;;  %v873_v22 = vpop.f32.mrf.mxu2  ;;  %v634_v24 = vpop.f32.mrf.mxu0 }
  0xb3   :  { %1106 = vst.msk [vmem:[#allocation2 + $0x40] sm:$0xff] %vm550_vm0, %v1090_v19  ;;  %v911_v23 = vadd.f32 %v873_v22, %v745_v18  ;;  %v1781_v26 = vmax.f32 %v1717_v20, %v1749_v21  ;;  %v747_v29 = vpop.f32.mrf.mxu1  ;;  %v1718_v38 = vld [vmem:[#allocation2 + $0x38] sm:$0xff]  ;;  %v6513_v20 = vld [vmem:[%s9632_s0 + $0xd0] sm:$0xff] }
  0xb4   :  { %v1021_v33 = vpop.f32.mrf.mxu3  ;;  %v748_v36 = vadd.f32 %v747_v29, %v634_v24  ;;  %v6577_v19 = vld [vmem:[%s9632_s0 + $0xd2] sm:$0xff]  ;;  %v6610_v24 = vld [vmem:[%s9632_s0 + $0xdb] sm:$0xff] }
  0xb5   :  { %v1056_v32 = vadd.f32 %v1018_v14, %v911_v23  ;;  %1813 = vst.msk [vmem:[#allocation2 + $0x30] sm:$0xff] %vm550_vm0, %v1781_v26  ;;  %6541 = vmatmul.msk.f32.gmra.mxu0 %vm550_vm0, %v6525_v25 }
  0xb6   :  { %6558 = vmatmul.msk.f32.gmra.mxu1 %vm550_vm0, %v6510_v31 }
  0xb7   :  { %v1075_v34 = vadd.f32 %v7534_v28, %v1056_v32  ;;  %6590 = vmatmul.msk.f32.gmra.mxu2 %vm550_vm0, %v6574_v30 }
  0xb9   :  { %v1091_v37 = vmax.f32 %v1075_v34, 0.0  ;;  %6623 = vmatmul.msk.f32.gmra.mxu3 %vm550_vm0, %v6607_v35  ;;  %v6529_v34 = vld [vmem:[%s9632_s0 + $0xd1] sm:$0xff] }
  0xba   :  { %v1750_v39 = vld [vmem:[#allocation2 + $0x39] sm:$0xff]  ;;  %v876_v40 = vpop.f32.mrf.mxu2  ;;  %v637_v42 = vpop.f32.mrf.mxu0 }
  0xbb   :  { %1107 = vst.msk [vmem:[#allocation2 + $0x48] sm:$0xff] %vm550_vm0, %v1091_v37  ;;  %v912_v41 = vadd.f32 %v876_v40, %v748_v36  ;;  %v1782_v44 = vmax.f32 %v1718_v38, %v1750_v39  ;;  %v750_v45 = vpop.f32.mrf.mxu1  ;;  %v1719_v54 = vld [vmem:[#allocation2 + $0x40] sm:$0xff]  ;;  %v6514_v38 = vld [vmem:[%s9632_s0 + $0xd8] sm:$0xff] }
  0xbc   :  { %v1024_v49 = vpop.f32.mrf.mxu3  ;;  %v751_v52 = vadd.f32 %v750_v45, %v637_v42  ;;  %v6578_v37 = vld [vmem:[%s9632_s0 + $0xda] sm:$0xff]  ;;  %v6611_v42 = vld [vmem:[%s9632_s0 + $0xe3] sm:$0xff] }
  0xbd   :  { %v1057_v48 = vadd.f32 %v1021_v33, %v912_v41  ;;  %1814 = vst.msk [vmem:[#allocation2 + $0x38] sm:$0xff] %vm550_vm0, %v1782_v44  ;;  %6542 = vmatmul.msk.f32.gmra.mxu0 %vm550_vm0, %v6526_v43 }
  0xbe   :  { %6559 = vmatmul.msk.f32.gmra.mxu1 %vm550_vm0, %v6511_v47 }
  0xbf   :  { %v1076_v50 = vadd.f32 %v7534_v28, %v1057_v48  ;;  %6591 = vmatmul.msk.f32.gmra.mxu2 %vm550_vm0, %v6575_v46 }
  0xc1   :  { %v1092_v53 = vmax.f32 %v1076_v50, 0.0  ;;  %6624 = vmatmul.msk.f32.gmra.mxu3 %vm550_vm0, %v6608_v51  ;;  %v6530_v50 = vld [vmem:[%s9632_s0 + $0xd9] sm:$0xff] }
  0xc2   :  { %v1751_v55 = vld [vmem:[#allocation2 + $0x41] sm:$0xff]  ;;  %v879_v56 = vpop.f32.mrf.mxu2  ;;  %v640_v58 = vpop.f32.mrf.mxu0 }
  0xc3   :  { %1108 = vst.msk [vmem:[#allocation2 + $0x50] sm:$0xff] %vm550_vm0, %v1092_v53  ;;  %v913_v57 = vadd.f32 %v879_v56, %v751_v52  ;;  %v1783_v60 = vmax.f32 %v1719_v54, %v1751_v55  ;;  %v753_v61 = vpop.f32.mrf.mxu1  ;;  %v1720_v7 = vld [vmem:[#allocation2 + $0x48] sm:$0xff]  ;;  %v6515_v54 = vld [vmem:[%s9632_s0 + $0xe0] sm:$0xff] }
  0xc4   :  { %v1027_v1 = vpop.f32.mrf.mxu3  ;;  %v754_v5 = vadd.f32 %v753_v61, %v640_v58  ;;  %v6579_v53 = vld [vmem:[%s9632_s0 + $0xe2] sm:$0xff]  ;;  %v6612_v58 = vld [vmem:[%s9632_s0 + $0xeb] sm:$0xff] }
  0xc5   :  { %v1058_v0 = vadd.f32 %v1024_v49, %v913_v57  ;;  %1815 = vst.msk [vmem:[#allocation2 + $0x40] sm:$0xff] %vm550_vm0, %v1783_v60  ;;  %6543 = vmatmul.msk.f32.gmra.mxu0 %vm550_vm0, %v6527_v59 }
  0xc6   :  { %6560 = vmatmul.msk.f32.gmra.mxu1 %vm550_vm0, %v6512_v63 }
  0xc7   :  { %v1077_v2 = vadd.f32 %v7534_v28, %v1058_v0  ;;  %6592 = vmatmul.msk.f32.gmra.mxu2 %vm550_vm0, %v6576_v62  ;;  %v1847_v0 = vld [vmem:[%s9635_s3 + $0x20] sm:$0xff] }
  0xc8   :  { %2731 = vmatpush.msra.mxu2 %v1847_v0 }
  0xc9   :  { %v1093_v6 = vmax.f32 %v1077_v2, 0.0  ;;  %6625 = vmatmul.msk.f32.gmra.mxu3 %vm550_vm0, %v6609_v4  ;;  %v6531_v4 = vld [vmem:[%s9632_s0 + $0xe1] sm:$0xff] }
  0xca   :  { %v1752_v8 = vld [vmem:[#allocation2 + $0x49] sm:$0xff]  ;;  %v882_v10 = vpop.f32.mrf.mxu2  ;;  %v643_v14 = vpop.f32.mrf.mxu0 }
  0xcb   :  { %1109 = vst.msk [vmem:[#allocation2 + $0x58] sm:$0xff] %vm550_vm0, %v1093_v6  ;;  %v914_v13 = vadd.f32 %v882_v10, %v754_v5  ;;  %v1784_v17 = vmax.f32 %v1720_v7, %v1752_v8  ;;  %v756_v18 = vpop.f32.mrf.mxu1  ;;  %v1721_v29 = vld [vmem:[#allocation2 + $0x50] sm:$0xff]  ;;  %v1843_v5 = vld [vmem:[%s9635_s3] sm:$0xff]  ;;  %v6516_v10 = vld [vmem:[%s9632_s0 + $0xe8] sm:$0xff] }
  0xcc   :  { %v1030_v22 = vpop.f32.mrf.mxu3  ;;  %v757_v25 = vadd.f32 %v756_v18, %v643_v14  ;;  %v6580_v8 = vld [vmem:[%s9632_s0 + $0xea] sm:$0xff]  ;;  %2522 = vmatpush.msra.mxu1 %v1843_v5 }
  0xcd   :  { %v1059_v21 = vadd.f32 %v1027_v1, %v914_v13  ;;  %1816 = vst.msk [vmem:[#allocation2 + $0x48] sm:$0xff] %vm550_vm0, %v1784_v17  ;;  %6544 = vmatmul.msk.f32.gmra.mxu0 %vm550_vm0, %v6528_v16  ;;  %v6613_v16 = vld [vmem:[%s9632_s0 + $0xf3] sm:$0xff] }
  0xce   :  { %6561 = vmatmul.msk.f32.gmra.mxu1 %vm550_vm0, %v6513_v20 }
  0xcf   :  { %v1078_v23 = vadd.f32 %v7534_v28, %v1059_v21  ;;  %6593 = vmatmul.msk.f32.gmra.mxu2 %vm550_vm0, %v6577_v19 }
  0xd1   :  { %v1094_v26 = vmax.f32 %v1078_v23, 0.0  ;;  %6626 = vmatmul.msk.f32.gmra.mxu3 %vm550_vm0, %v6610_v24  ;;  %v6532_v24 = vld [vmem:[%s9632_s0 + $0xe9] sm:$0xff] }
  0xd2   :  { %v1753_v30 = vld [vmem:[#allocation2 + $0x51] sm:$0xff]  ;;  %v885_v31 = vpop.f32.mrf.mxu2  ;;  %v646_v33 = vpop.f32.mrf.mxu0 }
  0xd3   :  { %1110 = vst.msk [vmem:[#allocation2 + $0x60] sm:$0xff] %vm550_vm0, %v1094_v26  ;;  %v915_v32 = vadd.f32 %v885_v31, %v757_v25  ;;  %v1785_v35 = vmax.f32 %v1721_v29, %v1753_v30  ;;  %v759_v36 = vpop.f32.mrf.mxu1  ;;  %v1722_v45 = vld [vmem:[#allocation2 + $0x58] sm:$0xff]  ;;  %v6517_v30 = vld [vmem:[%s9632_s0 + $0xf0] sm:$0xff] }
  0xd4   :  { %v1033_v40 = vpop.f32.mrf.mxu3  ;;  %v760_v43 = vadd.f32 %v759_v36, %v646_v33  ;;  %v6581_v29 = vld [vmem:[%s9632_s0 + $0xf2] sm:$0xff] }
  0xd5   :  { %v1060_v39 = vadd.f32 %v1030_v22, %v915_v32  ;;  %1817 = vst.msk [vmem:[#allocation2 + $0x50] sm:$0xff] %vm550_vm0, %v1785_v35  ;;  %6545 = vmatmul.msk.f32.gmra.mxu0 %vm550_vm0, %v6529_v34  ;;  %v6614_v34 = vld [vmem:[%s9632_s0 + $0xfb] sm:$0xff] }
  0xd6   :  { %6562 = vmatmul.msk.f32.gmra.mxu1 %vm550_vm0, %v6514_v38 }
  0xd7   :  { %v1079_v41 = vadd.f32 %v7534_v28, %v1060_v39  ;;  %6594 = vmatmul.msk.f32.gmra.mxu2 %vm550_vm0, %v6578_v37 }
  0xd9   :  { %v1095_v44 = vmax.f32 %v1079_v41, 0.0  ;;  %6627 = vmatmul.msk.f32.gmra.mxu3 %vm550_vm0, %v6611_v42  ;;  %v6533_v42 = vld [vmem:[%s9632_s0 + $0xf1] sm:$0xff] }
  0xda   :  { %v1754_v46 = vld [vmem:[#allocation2 + $0x59] sm:$0xff]  ;;  %v888_v47 = vpop.f32.mrf.mxu2  ;;  %v649_v49 = vpop.f32.mrf.mxu0 }
  0xdb   :  { %1111 = vst.msk [vmem:[#allocation2 + $0x68] sm:$0xff] %vm550_vm0, %v1095_v44  ;;  %v916_v48 = vadd.f32 %v888_v47, %v760_v43  ;;  %v1786_v51 = vmax.f32 %v1722_v45, %v1754_v46  ;;  %v762_v52 = vpop.f32.mrf.mxu1  ;;  %v1723_v61 = vld [vmem:[#allocation2 + $0x60] sm:$0xff]  ;;  %v6518_v46 = vld [vmem:[%s9632_s0 + $0xf8] sm:$0xff] }
  0xdc   :  { %v1036_v56 = vpop.f32.mrf.mxu3  ;;  %v763_v59 = vadd.f32 %v762_v52, %v649_v49  ;;  %v6582_v45 = vld [vmem:[%s9632_s0 + $0xfa] sm:$0xff] }
  0xdd   :  { %v1061_v55 = vadd.f32 %v1033_v40, %v916_v48  ;;  %1818 = vst.msk [vmem:[#allocation2 + $0x58] sm:$0xff] %vm550_vm0, %v1786_v51  ;;  %6546 = vmatmul.msk.f32.gmra.mxu0 %vm550_vm0, %v6530_v50  ;;  %v6615_v50 = vld [vmem:[%s9632_s0 + $0x103] sm:$0xff] }
  0xde   :  { %6563 = vmatmul.msk.f32.gmra.mxu1 %vm550_vm0, %v6515_v54 }
  0xdf   :  { %v1080_v57 = vadd.f32 %v7534_v28, %v1061_v55  ;;  %6595 = vmatmul.msk.f32.gmra.mxu2 %vm550_vm0, %v6579_v53 }
  0xe1   :  { %v1096_v60 = vmax.f32 %v1080_v57, 0.0  ;;  %6628 = vmatmul.msk.f32.gmra.mxu3 %vm550_vm0, %v6612_v58  ;;  %v6534_v58 = vld [vmem:[%s9632_s0 + $0xf9] sm:$0xff] }
  0xe2   :  { %v1755_v62 = vld [vmem:[#allocation2 + $0x61] sm:$0xff]  ;;  %v891_v63 = vpop.f32.mrf.mxu2  ;;  %v652_v2 = vpop.f32.mrf.mxu0 }
  0xe3   :  { %1112 = vst.msk [vmem:[#allocation2 + $0x70] sm:$0xff] %vm550_vm0, %v1096_v60  ;;  %v917_v1 = vadd.f32 %v891_v63, %v763_v59  ;;  %v1787_v6 = vmax.f32 %v1723_v61, %v1755_v62  ;;  %v765_v7 = vpop.f32.mrf.mxu1  ;;  %v1724_v19 = vld [vmem:[#allocation2 + $0x68] sm:$0xff]  ;;  %v6519_v62 = vld [vmem:[%s9632_s0 + $0x100] sm:$0xff] }
  0xe4   :  { %v1039_v13 = vpop.f32.mrf.mxu3  ;;  %v766_v17 = vadd.f32 %v765_v7, %v652_v2  ;;  %v6583_v61 = vld [vmem:[%s9632_s0 + $0x102] sm:$0xff]  ;;  %v730_v2 = vadd.f32 %v7466_v11, %v7458_v9  ;;  %v3060_v9 = vld [vmem:[%s9637_s5 + $0x18] sm:$0xff] }
  0xe5   :  { %v1062_v12 = vadd.f32 %v1036_v56, %v917_v1  ;;  %1819 = vst.msk [vmem:[#allocation2 + $0x60] sm:$0xff] %vm550_vm0, %v1787_v6  ;;  %6547 = vmatmul.msk.f32.gmra.mxu0 %vm550_vm0, %v6531_v4 }
  0xe6   :  { %6564 = vmatmul.msk.f32.gmra.mxu1 %vm550_vm0, %v6516_v10  ;;  %v906_v6 = vadd.f32 %v7492_v15, %v730_v2  ;;  %3708 = vmatpush.msra.mxu0 %v3060_v9 }
  0xe7   :  { %v1081_v14 = vadd.f32 %v7534_v28, %v1062_v12  ;;  %6596 = vmatmul.msk.f32.gmra.mxu2 %vm550_vm0, %v6580_v8 }
  0xe9   :  { %v1097_v18 = vmax.f32 %v1081_v14, 0.0  ;;  %6629 = vmatmul.msk.f32.gmra.mxu3 %vm550_vm0, %v6613_v16  ;;  %v6535_v14 = vld [vmem:[%s9632_s0 + $0x101] sm:$0xff] }
  0xea   :  { %v1756_v20 = vld [vmem:[#allocation2 + $0x69] sm:$0xff]  ;;  %v894_v21 = vpop.f32.mrf.mxu2  ;;  %v655_v23 = vpop.f32.mrf.mxu0 }
  0xeb   :  { %1113 = vst.msk [vmem:[#allocation2 + $0x78] sm:$0xff] %vm550_vm0, %v1097_v18  ;;  %v918_v22 = vadd.f32 %v894_v21, %v766_v17  ;;  %v1788_v25 = vmax.f32 %v1724_v19, %v1756_v20  ;;  %v768_v26 = vpop.f32.mrf.mxu1  ;;  %v1725_v37 = vld [vmem:[#allocation2 + $0x70] sm:$0xff] }
  0xec   :  { %v1042_v32 = vpop.f32.mrf.mxu3  ;;  %v769_v35 = vadd.f32 %v768_v26, %v655_v23 }
  0xed   :  { %v1063_v31 = vadd.f32 %v1039_v13, %v918_v22  ;;  %1820 = vst.msk [vmem:[#allocation2 + $0x68] sm:$0xff] %vm550_vm0, %v1788_v25  ;;  %6548 = vmatmul.msk.f32.gmra.mxu0 %vm550_vm0, %v6532_v24 }
  0xee   :  { %6565 = vmatmul.msk.f32.gmra.mxu1 %vm550_vm0, %v6517_v30 }
  0xef   :  { %v1082_v33 = vadd.f32 %v7534_v28, %v1063_v31  ;;  %6597 = vmatmul.msk.f32.gmra.mxu2 %vm550_vm0, %v6581_v29 }
  0xf1   :  { %v1098_v36 = vmax.f32 %v1082_v33, 0.0  ;;  %6630 = vmatmul.msk.f32.gmra.mxu3 %vm550_vm0, %v6614_v34  ;;  %v92_v34 = vlaneseq }
  0xf2   :  { %v1757_v38 = vld [vmem:[#allocation2 + $0x71] sm:$0xff]  ;;  %v897_v39 = vpop.f32.mrf.mxu2  ;;  %v658_v41 = vpop.f32.mrf.mxu0 }
  0xf3   :  { %1114 = vst.msk [vmem:[#allocation2 + $0x80] sm:$0xff] %vm550_vm0, %v1098_v36  ;;  %v919_v40 = vadd.f32 %v897_v39, %v769_v35  ;;  %v1789_v43 = vmax.f32 %v1725_v37, %v1757_v38  ;;  %v771_v44 = vpop.f32.mrf.mxu1  ;;  %v1726_v53 = vld [vmem:[#allocation2 + $0x78] sm:$0xff]  ;;  %v1716_v35 = vld [vmem:[#allocation2 + $0x28] sm:$0xff] }
  0xf4   :  { %v1045_v48 = vpop.f32.mrf.mxu3  ;;  %v772_v51 = vadd.f32 %v771_v44, %v658_v41  ;;  %v1780_v36 = vmax.f32 %v1716_v35, %v7640_v27 }
  0xf5   :  { %v1064_v47 = vadd.f32 %v1042_v32, %v919_v40  ;;  %1821 = vst.msk [vmem:[#allocation2 + $0x70] sm:$0xff] %vm550_vm0, %v1789_v43  ;;  %6549 = vmatmul.msk.f32.gmra.mxu0 %vm550_vm0, %v6533_v42 }
  0xf6   :  { %6566 = vmatmul.msk.f32.gmra.mxu1 %vm550_vm0, %v6518_v46 }
  0xf7   :  { %v1083_v49 = vadd.f32 %v7534_v28, %v1064_v47  ;;  %6598 = vmatmul.msk.f32.gmra.mxu2 %vm550_vm0, %v6582_v45  ;;  %v7853_v45 = vshrl.u32 %v92_v34, 7 }
  0xf9   :  { %v1099_v52 = vmax.f32 %v1083_v49, 0.0  ;;  %6631 = vmatmul.msk.f32.gmra.mxu3 %vm550_vm0, %v6615_v50 }
  0xfa   :  { %v1758_v54 = vld [vmem:[#allocation2 + $0x79] sm:$0xff]  ;;  %v900_v55 = vpop.f32.mrf.mxu2  ;;  %v661_v57 = vpop.f32.mrf.mxu0 }
  0xfb   :  { %1115 = vst.msk [vmem:[#allocation2 + $0x88] sm:$0xff] %vm550_vm0, %v1099_v52  ;;  %v920_v56 = vadd.f32 %v900_v55, %v772_v51  ;;  %v1790_v59 = vmax.f32 %v1726_v53, %v1758_v54  ;;  %v774_v60 = vpop.f32.mrf.mxu1  ;;  %v1727_v7 = vld [vmem:[#allocation2 + $0x80] sm:$0xff]  ;;  %v129_v51 = vand.u32 127, %v7853_v45 }
  0xfc   :  { %v1048_v0 = vpop.f32.mrf.mxu3  ;;  %v775_v4 = vadd.f32 %v774_v60, %v661_v57 }
  0xfd   :  { %v1065_v63 = vadd.f32 %v1045_v48, %v920_v56  ;;  %1822 = vst.msk [vmem:[#allocation2 + $0x78] sm:$0xff] %vm550_vm0, %v1790_v59  ;;  %6550 = vmatmul.msk.f32.gmra.mxu0 %vm550_vm0, %v6534_v58  ;;  %vm7862_vm2 = vcmp.lt.s32.totalorder %v129_v51, 2  ;;  %vm3070_vm7 = vcmp.lt.s32.totalorder %v129_v51, 4  ;;  %v4257_v51 = vld [vmem:[%s9639_s7 + $0x60] sm:$0xff] }
  0xfe   :  { %6567 = vmatmul.msk.f32.gmra.mxu1 %vm550_vm0, %v6519_v62 }
  0xff   :  { %v1084_v1 = vadd.f32 %v7534_v28, %v1065_v63  ;;  %6599 = vmatmul.msk.f32.gmra.mxu2 %vm550_vm0, %v6583_v61 }
 0x101   :  { %v1100_v5 = vmax.f32 %v1084_v1, 0.0 }
 0x102   :  { %v1759_v8 = vld [vmem:[#allocation2 + $0x81] sm:$0xff]  ;;  %v903_v10 = vpop.f32.mrf.mxu2  ;;  %v1003_v13 = vpop.f32.mrf.mxu0 }
 0x103   :  { %1116 = vst.msk [vmem:[#allocation2 + $0x90] sm:$0xff] %vm550_vm0, %v1100_v5  ;;  %v921_v12 = vadd.f32 %v903_v10, %v775_v4  ;;  %v1791_v16 = vmax.f32 %v1727_v7, %v1759_v8  ;;  %v1051_v17 = vadd.f32 %v1003_v13, %v906_v6  ;;  %v1329_v18 = vpop.f32.mrf.mxu1  ;;  %v1728_v23 = vld [vmem:[#allocation2 + $0x88] sm:$0xff] }
 0x104   :  { %v1603_v15 = vpop.f32.mrf.mxu3 }
 0x105   :  { %v1066_v19 = vadd.f32 %v1048_v0, %v921_v12  ;;  %1823 = vst.msk [vmem:[#allocation2 + $0x80] sm:$0xff] %vm550_vm0, %v1791_v16  ;;  %v1070_v11 = vadd.f32 %v7534_v28, %v1051_v17  ;;  %6551 = vmatmul.msk.f32.gmra.mxu0 %vm550_vm0, %v6535_v14 }
 0x107   :  { %v1085_v20 = vadd.f32 %v7534_v28, %v1066_v19  ;;  %v1086_v21 = vmax.f32 %v1070_v11, 0.0 }
 0x109   :  { %v1101_v22 = vmax.f32 %v1085_v20, 0.0  ;;  %1102 = vst.msk [vmem:[#allocation2 + $0x20] sm:$0xff] %vm550_vm0, %v1086_v21 }
 0x10a   :  { %v1760_v24 = vld [vmem:[#allocation2 + $0x89] sm:$0xff]  ;;  %v1458_v25 = vpop.f32.mrf.mxu2  ;;  %v1216_v26 = vpop.f32.mrf.mxu0 }
 0x10b   :  { %1117 = vst.msk [vmem:[#allocation2 + $0x98] sm:$0xff] %vm550_vm0, %v1101_v22  ;;  %v1792_v29 = vmax.f32 %v1728_v23, %v1760_v24  ;;  %v1330_v30 = vadd.f32 %v1329_v18, %v1216_v26  ;;  %v1332_v31 = vpop.f32.mrf.mxu1  ;;  %v1729_v40 = vld [vmem:[#allocation2 + $0x90] sm:$0xff] }
 0x10c   :  { %v1606_v33 = vpop.f32.mrf.mxu3 }
 0x10d   :  { %1824 = vst.msk [vmem:[#allocation2 + $0x88] sm:$0xff] %vm550_vm0, %v1792_v29  ;;  %v1506_v32 = vadd.f32 %v1458_v25, %v1330_v30  ;;  %v2012_v30 = vld [vmem:[#allocation2 + $0x30] sm:$0xff] }
 0x10f   :  { %v1651_v37 = vadd.f32 %v1603_v15, %v1506_v32  ;;  %v3068_v15 = vld [vmem:[%s9637_s5 + $0x58] sm:$0xff] }
 0x110   :  { %v1715_v38 = vld [vmem:[#allocation2 + $0x20] sm:$0xff]  ;;  %3917 = vmatpush.msrb.mxu1 %v3068_v15 }
 0x111   :  { %v1747_v39 = vld [vmem:[#allocation2 + $0x21] sm:$0xff]  ;;  %v1667_v43 = vadd.f32 %v7534_v28, %v1651_v37 }
 0x112   :  { %v1779_v41 = vmax.f32 %v1715_v38, %v1747_v39  ;;  %1812 = vst.msk [vmem:[#allocation2 + $0x28] sm:$0xff] %vm550_vm0, %v1780_v36  ;;  %v1761_v42 = vld [vmem:[#allocation2 + $0x91] sm:$0xff]  ;;  %v1461_v44 = vpop.f32.mrf.mxu2  ;;  %v1219_v46 = vpop.f32.mrf.mxu0  ;;  %v1887_v15 = vld [vmem:[#allocation2 + $0x46] sm:$0xff] }
 0x113   :  { %v1793_v47 = vmax.f32 %v1729_v40, %v1761_v42  ;;  %v1683_v48 = vmax.f32 %v1667_v43, 0.0  ;;  %v1333_v49 = vadd.f32 %v1332_v31, %v1219_v46  ;;  %v1335_v27 = vpop.f32.mrf.mxu1  ;;  %v1730_v0 = vld [vmem:[#allocation2 + $0x98] sm:$0xff] }
 0x114   :  { %1811 = vst.msk [vmem:[#allocation2 + $0x20] sm:$0xff] %vm550_vm0, %v1779_v41  ;;  %v1609_v52 = vpop.f32.mrf.mxu3  ;;  %v2076_v31 = vld [vmem:[#allocation2 + $0x32] sm:$0xff] }
 0x115   :  { %1825 = vst.msk [vmem:[#allocation2 + $0x90] sm:$0xff] %vm550_vm0, %v1793_v47  ;;  %v1507_v50 = vadd.f32 %v1461_v44, %v1333_v49  ;;  %v2013_v46 = vld [vmem:[#allocation2 + $0x38] sm:$0xff] }
 0x116   :  { %1699 = vst.msk [vmem:[#allocation2 + $0xa0] sm:$0xff] %vm550_vm0, %v1683_v48  ;;  %v2077_v47 = vld [vmem:[#allocation2 + $0x3a] sm:$0xff] }
 0x117   :  { %v1652_v53 = vadd.f32 %v1606_v33, %v1507_v50 }
 0x119   :  { %v1668_v54 = vadd.f32 %v7534_v28, %v1652_v53  ;;  %v2011_v14 = vld [vmem:[#allocation2 + $0x28] sm:$0xff] }
 0x11a   :  { %v1464_v55 = vpop.f32.mrf.mxu2  ;;  %v1222_v58 = vpop.f32.mrf.mxu0  ;;  %v2075_v16 = vld [vmem:[#allocation2 + $0x2a] sm:$0xff] }
 0x11b   :  { %v2074_v57 = vld [vmem:[#allocation2 + $0x22] sm:$0xff]  ;;  %v1684_v60 = vmax.f32 %v1668_v54, 0.0  ;;  %v1336_v61 = vadd.f32 %v1335_v27, %v1222_v58  ;;  %v1338_v63 = vpop.f32.mrf.mxu1  ;;  %v1884_v36 = vld [vmem:[#allocation2 + $0x2e] sm:$0xff] }
 0x11c   :  { %v2010_v59 = vld [vmem:[#allocation2 + $0x20] sm:$0xff]  ;;  %6696 = vmatmul.msk.f32.vlgmr.msra.gmra.mxu2 %vm550_vm0, %v2074_v57  ;;  %v1612_v5 = vpop.f32.mrf.mxu3 }
 0x11d   :  { %6632 = vmatmul.msk.f32.vlgmr.msrb.gmra.mxu0 %vm550_vm0, %v2010_v59  ;;  %v1882_v62 = vld [vmem:[#allocation2 + $0x1e] sm:$0xff]  ;;  %1700 = vst.msk [vmem:[#allocation2 + $0xa8] sm:$0xff] %vm550_vm0, %v1684_v60  ;;  %v1508_v4 = vadd.f32 %v1464_v55, %v1336_v61  ;;  %v1883_v9 = vld [vmem:[#allocation2 + $0x26] sm:$0xff] }
 0x11e   :  { %v1762_v1 = vld [vmem:[#allocation2 + $0x99] sm:$0xff]  ;;  %v1978_v2 = vsel %vm7862_vm2, 0.0, %v1882_v62  ;;  %v2078_v62 = vld [vmem:[#allocation2 + $0x42] sm:$0xff] }
 0x11f   :  { %6664 = vmatmul.msk.f32.vlgmr.msra.gmra.mxu1 %vm550_vm0, %v1978_v2  ;;  %v1794_v6 = vmax.f32 %v1730_v0, %v1762_v1  ;;  %v1653_v7 = vadd.f32 %v1609_v52, %v1508_v4  ;;  %v1731_v12 = vld [vmem:[#allocation2 + $0xa0] sm:$0xff]  ;;  %v1885_v52 = vld [vmem:[#allocation2 + $0x36] sm:$0xff] }
 0x120   :  { %v2014_v61 = vld [vmem:[#allocation2 + $0x40] sm:$0xff] }
 0x121   :  { %1826 = vst.msk [vmem:[#allocation2 + $0x98] sm:$0xff] %vm550_vm0, %v1794_v6  ;;  %v1669_v8 = vadd.f32 %v7534_v28, %v1653_v7  ;;  %v1886_v4 = vld [vmem:[#allocation2 + $0x3e] sm:$0xff] }
 0x122   :  { %v1467_v10 = vpop.f32.mrf.mxu2  ;;  %v1225_v13 = vpop.f32.mrf.mxu0 }
 0x123   :  { %v1685_v17 = vmax.f32 %v1669_v8, 0.0  ;;  %v1339_v18 = vadd.f32 %v1338_v63, %v1225_v13  ;;  %v1341_v19 = vpop.f32.mrf.mxu1 }
 0x124   :  { %6697 = vmatmul.msk.f32.gmra.mxu2 %vm550_vm0, %v2075_v16  ;;  %v1763_v11 = vld [vmem:[#allocation2 + $0xa1] sm:$0xff]  ;;  %v1615_v21 = vpop.f32.mrf.mxu3 }
 0x125   :  { %6633 = vmatmul.msk.f32.gmra.mxu0 %vm550_vm0, %v2011_v14  ;;  %1701 = vst.msk [vmem:[#allocation2 + $0xb0] sm:$0xff] %vm550_vm0, %v1685_v17  ;;  %v1509_v20 = vadd.f32 %v1467_v10, %v1339_v18  ;;  %v1795_v22 = vmax.f32 %v1731_v12, %v1763_v11  ;;  %v1732_v26 = vld [vmem:[#allocation2 + $0xa8] sm:$0xff] }
 0x126   :  { %v2015_v16 = vld [vmem:[#allocation2 + $0x48] sm:$0xff] }
 0x127   :  { %6665 = vmatmul.msk.f32.gmra.mxu1 %vm550_vm0, %v1883_v9  ;;  %v1654_v23 = vadd.f32 %v1612_v5, %v1509_v20  ;;  %1827 = vst.msk [vmem:[#allocation2 + $0xa0] sm:$0xff] %vm550_vm0, %v1795_v22  ;;  %v2079_v17 = vld [vmem:[#allocation2 + $0x4a] sm:$0xff]  ;;  %v3064_v20 = vld [vmem:[%s9637_s5 + $0x38] sm:$0xff] }
 0x128   :  { %3499 = vmatpush.msra.mxu3 %v3064_v20 }
 0x129   :  { %v1670_v24 = vadd.f32 %v7534_v28, %v1654_v23  ;;  %v3059_v23 = vld [vmem:[%s9637_s5 + $0x10] sm:$0xff] }
 0x12a   :  { %v1470_v25 = vpop.f32.mrf.mxu2  ;;  %v1228_v29 = vpop.f32.mrf.mxu0  ;;  %3709 = vmatpush.msra.mxu0 %v3059_v23 }
 0x12b   :  { %v1686_v32 = vmax.f32 %v1670_v24, 0.0  ;;  %v1342_v33 = vadd.f32 %v1341_v19, %v1228_v29  ;;  %v1344_v34 = vpop.f32.mrf.mxu1 }
 0x12c   :  { %6698 = vmatmul.msk.f32.gmra.mxu2 %vm550_vm0, %v2076_v31  ;;  %v1764_v35 = vld [vmem:[#allocation2 + $0xa9] sm:$0xff]  ;;  %v1618_v38 = vpop.f32.mrf.mxu3 }
 0x12d   :  { %6634 = vmatmul.msk.f32.gmra.mxu0 %vm550_vm0, %v2012_v30  ;;  %1702 = vst.msk [vmem:[#allocation2 + $0xb8] sm:$0xff] %vm550_vm0, %v1686_v32  ;;  %v1510_v37 = vadd.f32 %v1470_v25, %v1342_v33  ;;  %v1796_v39 = vmax.f32 %v1732_v26, %v1764_v35  ;;  %v1733_v43 = vld [vmem:[#allocation2 + $0xb0] sm:$0xff] }
 0x12e   :  { %v2016_v32 = vld [vmem:[#allocation2 + $0x50] sm:$0xff] }
 0x12f   :  { %6666 = vmatmul.msk.f32.gmra.mxu1 %vm550_vm0, %v1884_v36  ;;  %v1655_v40 = vadd.f32 %v1615_v21, %v1510_v37  ;;  %1828 = vst.msk [vmem:[#allocation2 + $0xa8] sm:$0xff] %vm550_vm0, %v1796_v39  ;;  %v2080_v33 = vld [vmem:[#allocation2 + $0x52] sm:$0xff] }
 0x131   :  { %v1671_v41 = vadd.f32 %v7534_v28, %v1655_v40 }
 0x132   :  { %v1473_v42 = vpop.f32.mrf.mxu2  ;;  %v1231_v44 = vpop.f32.mrf.mxu0 }
 0x133   :  { %v1687_v48 = vmax.f32 %v1671_v41, 0.0  ;;  %v1345_v49 = vadd.f32 %v1344_v34, %v1231_v44  ;;  %v1347_v27 = vpop.f32.mrf.mxu1 }
 0x134   :  { %6699 = vmatmul.msk.f32.gmra.mxu2 %vm550_vm0, %v2077_v47  ;;  %v1765_v50 = vld [vmem:[#allocation2 + $0xb1] sm:$0xff]  ;;  %v1621_v54 = vpop.f32.mrf.mxu3 }
 0x135   :  { %6635 = vmatmul.msk.f32.gmra.mxu0 %vm550_vm0, %v2013_v46  ;;  %1703 = vst.msk [vmem:[#allocation2 + $0xc0] sm:$0xff] %vm550_vm0, %v1687_v48  ;;  %v1511_v53 = vadd.f32 %v1473_v42, %v1345_v49  ;;  %v1797_v55 = vmax.f32 %v1733_v43, %v1765_v50  ;;  %v1734_v59 = vld [vmem:[#allocation2 + $0xb8] sm:$0xff]  ;;  %v7921_v42 = vld [vmem:[%s9634_s2] ss:$0 sm:$0xff]  ;;  %s6431_s2 = sshll.u32 %s9647_s15, 4  ;;  %s6432_s2 = int_to_ptr.hbm [resolvable:$true] %s6431_s2 }
 0x136   :  { %v2017_v48 = vld [vmem:[#allocation2 + $0x58] sm:$0xff] }
 0x137   :  { %6667 = vmatmul.msk.f32.gmra.mxu1 %vm550_vm0, %v1885_v52  ;;  %v1656_v56 = vadd.f32 %v1618_v38, %v1511_v53  ;;  %1829 = vst.msk [vmem:[#allocation2 + $0xb0] sm:$0xff] %vm550_vm0, %v1797_v55  ;;  %v1888_v38 = vld [vmem:[#allocation2 + $0x4e] sm:$0xff]  ;;  %v2081_v49 = vld [vmem:[#allocation2 + $0x5a] sm:$0xff] }
 0x139   :  { %v1672_v57 = vadd.f32 %v7534_v28, %v1656_v56 }
 0x13a   :  { %v1476_v58 = vpop.f32.mrf.mxu2  ;;  %v1234_v60 = vpop.f32.mrf.mxu0 }
 0x13b   :  { %v1688_v63 = vmax.f32 %v1672_v57, 0.0  ;;  %v1348_v0 = vadd.f32 %v1347_v27, %v1234_v60  ;;  %v1350_v1 = vpop.f32.mrf.mxu1 }
 0x13c   :  { %6700 = vmatmul.msk.f32.gmra.mxu2 %vm550_vm0, %v2078_v62  ;;  %v1766_v2 = vld [vmem:[#allocation2 + $0xb9] sm:$0xff]  ;;  %v1624_v6 = vpop.f32.mrf.mxu3 }
 0x13d   :  { %6636 = vmatmul.msk.f32.gmra.mxu0 %vm550_vm0, %v2014_v61  ;;  %1704 = vst.msk [vmem:[#allocation2 + $0xc8] sm:$0xff] %vm550_vm0, %v1688_v63  ;;  %v1512_v5 = vadd.f32 %v1476_v58, %v1348_v0  ;;  %v1798_v7 = vmax.f32 %v1734_v59, %v1766_v2  ;;  %v1735_v13 = vld [vmem:[#allocation2 + $0xc0] sm:$0xff] }
 0x13e   :  { %v2018_v63 = vld [vmem:[#allocation2 + $0x60] sm:$0xff] }
 0x13f   :  { %6668 = vmatmul.msk.f32.gmra.mxu1 %vm550_vm0, %v1886_v4  ;;  %v1657_v8 = vadd.f32 %v1621_v54, %v1512_v5  ;;  %1830 = vst.msk [vmem:[#allocation2 + $0xb8] sm:$0xff] %vm550_vm0, %v1798_v7  ;;  %v1889_v54 = vld [vmem:[#allocation2 + $0x56] sm:$0xff]  ;;  %v2082_v0 = vld [vmem:[#allocation2 + $0x62] sm:$0xff] }
 0x141   :  { %v1673_v10 = vadd.f32 %v7534_v28, %v1657_v8 }
 0x142   :  { %v1479_v12 = vpop.f32.mrf.mxu2  ;;  %v1237_v14 = vpop.f32.mrf.mxu0 }
 0x143   :  { %v1689_v18 = vmax.f32 %v1673_v10, 0.0  ;;  %v1351_v19 = vadd.f32 %v1350_v1, %v1237_v14  ;;  %v1353_v9 = vpop.f32.mrf.mxu1 }
 0x144   :  { %6701 = vmatmul.msk.f32.gmra.mxu2 %vm550_vm0, %v2079_v17  ;;  %v1767_v11 = vld [vmem:[#allocation2 + $0xc1] sm:$0xff]  ;;  %v1627_v22 = vpop.f32.mrf.mxu3 }
 0x145   :  { %6637 = vmatmul.msk.f32.gmra.mxu0 %vm550_vm0, %v2015_v16  ;;  %1705 = vst.msk [vmem:[#allocation2 + $0xd0] sm:$0xff] %vm550_vm0, %v1689_v18  ;;  %v1513_v21 = vadd.f32 %v1479_v12, %v1351_v19  ;;  %v1799_v24 = vmax.f32 %v1735_v13, %v1767_v11  ;;  %v1736_v30 = vld [vmem:[#allocation2 + $0xc8] sm:$0xff] }
 0x146   :  { %v2019_v18 = vld [vmem:[#allocation2 + $0x68] sm:$0xff] }
 0x147   :  { %6669 = vmatmul.msk.f32.gmra.mxu1 %vm550_vm0, %v1887_v15  ;;  %v1658_v25 = vadd.f32 %v1624_v6, %v1513_v21  ;;  %1831 = vst.msk [vmem:[#allocation2 + $0xc0] sm:$0xff] %vm550_vm0, %v1799_v24  ;;  %v1890_v6 = vld [vmem:[#allocation2 + $0x5e] sm:$0xff]  ;;  %v2083_v19 = vld [vmem:[#allocation2 + $0x6a] sm:$0xff] }
 0x148   :  { %v1891_v21 = vld [vmem:[#allocation2 + $0x66] sm:$0xff]  ;;  %v3067_v24 = vld [vmem:[%s9637_s5 + $0x50] sm:$0xff] }
 0x149   :  { %v1674_v26 = vadd.f32 %v7534_v28, %v1658_v25  ;;  %3918 = vmatpush.msrb.mxu1 %v3067_v24 }
 0x14a   :  { %v1482_v29 = vpop.f32.mrf.mxu2  ;;  %v1240_v31 = vpop.f32.mrf.mxu0 }
 0x14b   :  { %v1690_v34 = vmax.f32 %v1674_v26, 0.0  ;;  %v1354_v35 = vadd.f32 %v1353_v9, %v1240_v31  ;;  %v1356_v36 = vpop.f32.mrf.mxu1 }
 0x14c   :  { %6702 = vmatmul.msk.f32.gmra.mxu2 %vm550_vm0, %v2080_v33  ;;  %v1768_v37 = vld [vmem:[#allocation2 + $0xc9] sm:$0xff]  ;;  %v1630_v28 = vpop.f32.mrf.mxu3 }
 0x14d   :  { %6638 = vmatmul.msk.f32.gmra.mxu0 %vm550_vm0, %v2016_v32  ;;  %1706 = vst.msk [vmem:[#allocation2 + $0xd8] sm:$0xff] %vm550_vm0, %v1690_v34  ;;  %v1514_v39 = vadd.f32 %v1482_v29, %v1354_v35  ;;  %v1800_v40 = vmax.f32 %v1736_v30, %v1768_v37  ;;  %v1737_v46 = vld [vmem:[#allocation2 + $0xd0] sm:$0xff] }
 0x14e   :  { %v2020_v34 = vld [vmem:[#allocation2 + $0x70] sm:$0xff] }
 0x14f   :  { %6670 = vmatmul.msk.f32.gmra.mxu1 %vm550_vm0, %v1888_v38  ;;  %v1659_v41 = vadd.f32 %v1627_v22, %v1514_v39  ;;  %1832 = vst.msk [vmem:[#allocation2 + $0xc8] sm:$0xff] %vm550_vm0, %v1800_v40  ;;  %v3063_v22 = vld [vmem:[%s9637_s5 + $0x30] sm:$0xff] }
 0x150   :  { %3500 = vmatpush.msra.mxu3 %v3063_v22  ;;  %v2084_v35 = vld [vmem:[#allocation2 + $0x72] sm:$0xff] }
 0x151   :  { %v1675_v43 = vadd.f32 %v7921_v42, %v1659_v41  ;;  %v1892_v39 = vld [vmem:[#allocation2 + $0x6e] sm:$0xff] }
 0x152   :  { %v1485_v44 = vpop.f32.mrf.mxu2  ;;  %v1243_v47 = vpop.f32.mrf.mxu0 }
 0x153   :  { %v1691_v27 = vmax.f32 %v1675_v43, 0.0  ;;  %v1357_v50 = vadd.f32 %v1356_v36, %v1243_v47  ;;  %v1359_v52 = vpop.f32.mrf.mxu1 }
 0x154   :  { %6703 = vmatmul.msk.f32.gmra.mxu2 %vm550_vm0, %v2081_v49  ;;  %v1769_v53 = vld [vmem:[#allocation2 + $0xd1] sm:$0xff]  ;;  %v1633_v56 = vpop.f32.mrf.mxu3 }
 0x155   :  { %6639 = vmatmul.msk.f32.gmra.mxu0 %vm550_vm0, %v2017_v48  ;;  %1707 = vst.msk [vmem:[#allocation2 + $0xe0] sm:$0xff] %vm550_vm0, %v1691_v27  ;;  %v1515_v55 = vadd.f32 %v1485_v44, %v1357_v50  ;;  %v1801_v57 = vmax.f32 %v1737_v46, %v1769_v53  ;;  %v1738_v61 = vld [vmem:[#allocation2 + $0xd8] sm:$0xff] }
 0x156   :  { %v2021_v27 = vld [vmem:[#allocation2 + $0x78] sm:$0xff] }
 0x157   :  { %6671 = vmatmul.msk.f32.gmra.mxu1 %vm550_vm0, %v1889_v54  ;;  %v1660_v58 = vadd.f32 %v1630_v28, %v1515_v55  ;;  %1833 = vst.msk [vmem:[#allocation2 + $0xd0] sm:$0xff] %vm550_vm0, %v1801_v57  ;;  %v2085_v50 = vld [vmem:[#allocation2 + $0x7a] sm:$0xff] }
 0x158   :  { %v1893_v55 = vld [vmem:[#allocation2 + $0x76] sm:$0xff] }
 0x159   :  { %v1676_v59 = vadd.f32 %v7921_v42, %v1660_v58 }
 0x15a   :  { %v1488_v60 = vpop.f32.mrf.mxu2  ;;  %v1246_v62 = vpop.f32.mrf.mxu0 }
 0x15b   :  { %v1692_v1 = vmax.f32 %v1676_v59, 0.0  ;;  %v1360_v2 = vadd.f32 %v1359_v52, %v1246_v62  ;;  %v1362_v4 = vpop.f32.mrf.mxu1 }
 0x15c   :  { %6704 = vmatmul.msk.f32.gmra.mxu2 %vm550_vm0, %v2082_v0  ;;  %v1770_v5 = vld [vmem:[#allocation2 + $0xd9] sm:$0xff]  ;;  %v1636_v8 = vpop.f32.mrf.mxu3 }
 0x15d   :  { %6640 = vmatmul.msk.f32.gmra.mxu0 %vm550_vm0, %v2018_v63  ;;  %1708 = vst.msk [vmem:[#allocation2 + $0xe8] sm:$0xff] %vm550_vm0, %v1692_v1  ;;  %v1516_v7 = vadd.f32 %v1488_v60, %v1360_v2  ;;  %v1802_v10 = vmax.f32 %v1738_v61, %v1770_v5  ;;  %v1739_v16 = vld [vmem:[#allocation2 + $0xe0] sm:$0xff] }
 0x15e   :  { %v2022_v0 = vld [vmem:[#allocation2 + $0x80] sm:$0xff] }
 0x15f   :  { %6672 = vmatmul.msk.f32.gmra.mxu1 %vm550_vm0, %v1890_v6  ;;  %v1661_v12 = vadd.f32 %v1633_v56, %v1516_v7  ;;  %1834 = vst.msk [vmem:[#allocation2 + $0xd8] sm:$0xff] %vm550_vm0, %v1802_v10  ;;  %v2086_v1 = vld [vmem:[#allocation2 + $0x82] sm:$0xff] }
 0x160   :  { %v1894_v7 = vld [vmem:[#allocation2 + $0x7e] sm:$0xff] }
 0x161   :  { %v1677_v13 = vadd.f32 %v7921_v42, %v1661_v12 }
 0x162   :  { %v1491_v14 = vpop.f32.mrf.mxu2  ;;  %v1249_v17 = vpop.f32.mrf.mxu0 }
 0x163   :  { %v1693_v9 = vmax.f32 %v1677_v13, 0.0  ;;  %v1363_v11 = vadd.f32 %v1362_v4, %v1249_v17  ;;  %v1365_v15 = vpop.f32.mrf.mxu1  ;;  %v3062_v13 = vld [vmem:[%s9637_s5 + $0x28] sm:$0xff] }
 0x164   :  { %6705 = vmatmul.msk.f32.gmra.mxu2 %vm550_vm0, %v2083_v19  ;;  %v1771_v20 = vld [vmem:[#allocation2 + $0xe1] sm:$0xff]  ;;  %v1639_v26 = vpop.f32.mrf.mxu3  ;;  %3501 = vmatpush.msra.mxu3 %v3062_v13 }
 0x165   :  { %6641 = vmatmul.msk.f32.gmra.mxu0 %vm550_vm0, %v2019_v18  ;;  %1709 = vst.msk [vmem:[#allocation2 + $0xf0] sm:$0xff] %vm550_vm0, %v1693_v9  ;;  %v1517_v23 = vadd.f32 %v1491_v14, %v1363_v11  ;;  %v1803_v25 = vmax.f32 %v1739_v16, %v1771_v20  ;;  %v1740_v32 = vld [vmem:[#allocation2 + $0xe8] sm:$0xff] }
 0x166   :  { %v3058_v14 = vld [vmem:[%s9637_s5 + $0x8] sm:$0xff] }
 0x167   :  { %6673 = vmatmul.msk.f32.gmra.mxu1 %vm550_vm0, %v1891_v21  ;;  %v1662_v29 = vadd.f32 %v1636_v8, %v1517_v23  ;;  %1835 = vst.msk [vmem:[#allocation2 + $0xe0] sm:$0xff] %vm550_vm0, %v1803_v25  ;;  %3710 = vmatpush.msra.mxu0 %v3058_v14  ;;  %v2023_v9 = vld [vmem:[#allocation2 + $0x88] sm:$0xff] }
 0x168   :  { %v2087_v11 = vld [vmem:[#allocation2 + $0x8a] sm:$0xff] }
 0x169   :  { %v1678_v30 = vadd.f32 %v7921_v42, %v1662_v29  ;;  %v1895_v23 = vld [vmem:[#allocation2 + $0x86] sm:$0xff] }
 0x16a   :  { %v1494_v31 = vpop.f32.mrf.mxu2  ;;  %v1252_v33 = vpop.f32.mrf.mxu0 }
 0x16b   :  { %v1694_v36 = vmax.f32 %v1678_v30, 0.0  ;;  %v1366_v37 = vadd.f32 %v1365_v15, %v1252_v33  ;;  %v1368_v28 = vpop.f32.mrf.mxu1  ;;  %v7977_v30 = vadd.s32 120, %v7853_v45  ;;  %v2024_v33 = vld [vmem:[#allocation2 + $0x90] sm:$0xff] }
 0x16c   :  { %6706 = vmatmul.msk.f32.gmra.mxu2 %vm550_vm0, %v2084_v35  ;;  %v1772_v38 = vld [vmem:[#allocation2 + $0xe9] sm:$0xff]  ;;  %v1642_v44 = vpop.f32.mrf.mxu3 }
 0x16d   :  { %6642 = vmatmul.msk.f32.gmra.mxu0 %vm550_vm0, %v2020_v34  ;;  %1710 = vst.msk [vmem:[#allocation2 + $0xf8] sm:$0xff] %vm550_vm0, %v1694_v36  ;;  %v1518_v40 = vadd.f32 %v1494_v31, %v1366_v37  ;;  %v1804_v41 = vmax.f32 %v1740_v32, %v1772_v38  ;;  %v1741_v48 = vld [vmem:[#allocation2 + $0xf0] sm:$0xff]  ;;  %v234_v36 = vand.u32 127, %v7977_v30 }
 0x16e   :  { %v2088_v34 = vld [vmem:[#allocation2 + $0x92] sm:$0xff] }
 0x16f   :  { %6674 = vmatmul.msk.f32.gmra.mxu1 %vm550_vm0, %v1892_v39  ;;  %v1663_v43 = vadd.f32 %v1639_v26, %v1518_v40  ;;  %1836 = vst.msk [vmem:[#allocation2 + $0xe8] sm:$0xff] %vm550_vm0, %v1804_v41  ;;  %v1896_v38 = vld [vmem:[#allocation2 + $0x8e] sm:$0xff]  ;;  %vm2057_vm3 = vcmp.ge.s32.totalorder %v234_v36, 126  ;;  %v2025_v41 = vld [vmem:[#allocation2 + $0x98] sm:$0xff]  ;;  %vm3277_vm8 = vcmp.ge.s32.totalorder %v234_v36, 124 }
 0x171   :  { %v1679_v46 = vadd.f32 %v7921_v42, %v1663_v43 }
 0x172   :  { %v1497_v47 = vpop.f32.mrf.mxu2  ;;  %v1255_v49 = vpop.f32.mrf.mxu0 }
 0x173   :  { %v1695_v52 = vmax.f32 %v1679_v46, 0.0  ;;  %v1369_v53 = vadd.f32 %v1368_v28, %v1255_v49  ;;  %v1371_v58 = vpop.f32.mrf.mxu1  ;;  %v7990_v28 = vadd.s32 128, %v7853_v45 }
 0x174   :  { %6707 = vmatmul.msk.f32.gmra.mxu2 %vm550_vm0, %v2085_v50  ;;  %v1773_v54 = vld [vmem:[#allocation2 + $0xf1] sm:$0xff]  ;;  %v1645_v2 = vpop.f32.mrf.mxu3 }
 0x175   :  { %6643 = vmatmul.msk.f32.gmra.mxu0 %vm550_vm0, %v2021_v27  ;;  %1711 = vst.msk [vmem:[#allocation2 + $0x100] sm:$0xff] %vm550_vm0, %v1695_v52  ;;  %v1519_v56 = vadd.f32 %v1497_v47, %v1369_v53  ;;  %v1805_v57 = vmax.f32 %v1741_v48, %v1773_v54  ;;  %v1742_v62 = vld [vmem:[#allocation2 + $0xf8] sm:$0xff]  ;;  %v241_v50 = vand.u32 127, %v7990_v28 }
 0x176   :  { %v1898_v53 = vld [vmem:[#allocation2 + $0x9e] sm:$0xff] }
 0x177   :  { %6675 = vmatmul.msk.f32.gmra.mxu1 %vm550_vm0, %v1893_v55  ;;  %v1664_v59 = vadd.f32 %v1642_v44, %v1519_v56  ;;  %1837 = vst.msk [vmem:[#allocation2 + $0xf0] sm:$0xff] %vm550_vm0, %v1805_v57  ;;  %v1897_v44 = vld [vmem:[#allocation2 + $0x96] sm:$0xff]  ;;  %vm1866_vm4 = vcmp.lt.s32.totalorder %v241_v50, 2  ;;  %v2026_v55 = vld [vmem:[#allocation2 + $0xa0] sm:$0xff]  ;;  %vm3086_vm9 = vcmp.lt.s32.totalorder %v241_v50, 4 }
 0x178   :  { %v2090_v56 = vld [vmem:[#allocation2 + $0xa2] sm:$0xff]  ;;  %v1994_v57 = vsel %vm1866_vm4, 0.0, %v1898_v53 }
 0x179   :  { %v1680_v60 = vadd.f32 %v7921_v42, %v1664_v59  ;;  %v8006_v59 = vld [vmem:[%s9636_s4] ss:$0 sm:$0xff] }
 0x17a   :  { %v1500_v61 = vpop.f32.mrf.mxu2  ;;  %v1258_v63 = vpop.f32.mrf.mxu0 }
 0x17b   :  { %v1696_v4 = vmax.f32 %v1680_v60, 0.0  ;;  %v1372_v5 = vadd.f32 %v1371_v58, %v1258_v63  ;;  %v1374_v16 = vpop.f32.mrf.mxu1  ;;  %v3061_v60 = vld [vmem:[%s9637_s5 + $0x20] sm:$0xff] }
 0x17c   :  { %6708 = vmatmul.msk.f32.gmra.mxu2 %vm550_vm0, %v2086_v1  ;;  %v1774_v6 = vld [vmem:[#allocation2 + $0xf9] sm:$0xff]  ;;  %v1648_v24 = vpop.f32.mrf.mxu3  ;;  %3502 = vmatpush.msra.mxu3 %v3061_v60  ;;  %v2095_v60 = vld [vmem:[#allocation2 + $0xca] sm:$0xff] }
 0x17d   :  { %6644 = vmatmul.msk.f32.gmra.mxu0 %vm550_vm0, %v2022_v0  ;;  %1712 = vst.msk [vmem:[#allocation2 + $0x108] sm:$0xff] %vm550_vm0, %v1696_v4  ;;  %v1520_v8 = vadd.f32 %v1500_v61, %v1372_v5  ;;  %v1806_v10 = vmax.f32 %v1742_v62, %v1774_v6  ;;  %v1743_v18 = vld [vmem:[#allocation2 + $0x100] sm:$0xff]  ;;  %v3066_v61 = vld [vmem:[%s9637_s5 + $0x48] sm:$0xff] }
 0x17e   :  { %3919 = vmatpush.msrb.mxu1 %v3066_v61  ;;  %v2027_v4 = vld [vmem:[#allocation2 + $0xa8] sm:$0xff] }
 0x17f   :  { %6676 = vmatmul.msk.f32.gmra.mxu1 %vm550_vm0, %v1894_v7  ;;  %v1665_v12 = vadd.f32 %v1645_v2, %v1520_v8  ;;  %1838 = vst.msk [vmem:[#allocation2 + $0xf8] sm:$0xff] %vm550_vm0, %v1806_v10  ;;  %v2091_v5 = vld [vmem:[#allocation2 + $0xaa] sm:$0xff] }
 0x180   :  { %v1899_v7 = vld [vmem:[#allocation2 + $0xa6] sm:$0xff] }
 0x181   :  { %v1681_v17 = vadd.f32 %v7921_v42, %v1665_v12 }
 0x182   :  { %v1261_v19 = vpop.f32.mrf.mxu0  ;;  %v1503_v15 = vpop.f32.mrf.mxu2 }
 0x183   :  { %v1697_v20 = vmax.f32 %v1681_v17, 0.0  ;;  %v1375_v21 = vadd.f32 %v1374_v16, %v1261_v19  ;;  %v2028_v17 = vld [vmem:[#allocation2 + $0xb0] sm:$0xff] }
 0x184   :  { %6709 = vmatmul.msk.f32.gmra.mxu2 %vm550_vm0, %v2087_v11  ;;  %v1775_v22 = vld [vmem:[#allocation2 + $0x101] sm:$0xff] }
 0x185   :  { %6645 = vmatmul.msk.f32.gmra.mxu0 %vm550_vm0, %v2023_v9  ;;  %1713 = vst.msk [vmem:[#allocation2 + $0x110] sm:$0xff] %vm550_vm0, %v1697_v20  ;;  %v1521_v25 = vadd.f32 %v1503_v15, %v1375_v21  ;;  %v1807_v26 = vmax.f32 %v1743_v18, %v1775_v22  ;;  %v1744_v32 = vld [vmem:[#allocation2 + $0x108] sm:$0xff]  ;;  %v2092_v18 = vld [vmem:[#allocation2 + $0xb2] sm:$0xff] }
 0x186   :  { %v1900_v9 = vld [vmem:[#allocation2 + $0xae] sm:$0xff] }
 0x187   :  { %6677 = vmatmul.msk.f32.gmra.mxu1 %vm550_vm0, %v1895_v23  ;;  %v1666_v29 = vadd.f32 %v1648_v24, %v1521_v25  ;;  %1839 = vst.msk [vmem:[#allocation2 + $0x100] sm:$0xff] %vm550_vm0, %v1807_v26  ;;  %v2029_v24 = vld [vmem:[#allocation2 + $0xb8] sm:$0xff] }
 0x188   :  { %v2093_v25 = vld [vmem:[#allocation2 + $0xba] sm:$0xff] }
 0x189   :  { %v1682_v31 = vadd.f32 %v7921_v42, %v1666_v29  ;;  %v2089_v42 = vld [vmem:[#allocation2 + $0x9a] sm:$0xff] }
 0x18a   :  { %v2185_v43 = vsel %vm2057_vm3, 0.0, %v2089_v42  ;;  %v1901_v29 = vld [vmem:[#allocation2 + $0xb6] sm:$0xff]  ;;  %v2030_v42 = vld [vmem:[#allocation2 + $0xc0] sm:$0xff] }
 0x18b   :  { %v1698_v35 = vmax.f32 %v1682_v31, 0.0 }
 0x18c   :  { %6710 = vmatmul.msk.f32.gmra.mxu2 %vm550_vm0, %v2088_v34  ;;  %v1776_v37 = vld [vmem:[#allocation2 + $0x109] sm:$0xff] }
 0x18d   :  { %6646 = vmatmul.msk.f32.gmra.mxu0 %vm550_vm0, %v2024_v33  ;;  %1714 = vst.msk [vmem:[#allocation2 + $0x118] sm:$0xff] %vm550_vm0, %v1698_v35  ;;  %v1808_v39 = vmax.f32 %v1744_v32, %v1776_v37  ;;  %v1745_v40 = vld [vmem:[#allocation2 + $0x110] sm:$0xff] }
 0x18f   :  { %6678 = vmatmul.msk.f32.gmra.mxu1 %vm550_vm0, %v1896_v38  ;;  %1840 = vst.msk [vmem:[#allocation2 + $0x108] sm:$0xff] %vm550_vm0, %v1808_v39 }
 0x194   :  { %6711 = vmatmul.msk.f32.gmra.mxu2 %vm550_vm0, %v2185_v43  ;;  %v1746_v46 = vld [vmem:[#allocation2 + $0x118] sm:$0xff] }
 0x195   :  { %6647 = vmatmul.msk.f32.gmra.mxu0 %vm550_vm0, %v2025_v41  ;;  %v1777_v47 = vld [vmem:[#allocation2 + $0x111] sm:$0xff]  ;;  %v1778_v48 = vld [vmem:[#allocation2 + $0x119] sm:$0xff] }
 0x196   :  { %v1809_v49 = vmax.f32 %v1745_v40, %v1777_v47  ;;  %v1810_v27 = vmax.f32 %v1746_v46, %v1778_v48  ;;  %v2094_v40 = vld [vmem:[#allocation2 + $0xc2] sm:$0xff]  ;;  %v4260_v48 = vld [vmem:[%s9639_s7 + $0x78] sm:$0xff] }
 0x197   :  { %6679 = vmatmul.msk.f32.gmra.mxu1 %vm550_vm0, %v1897_v44  ;;  %v1902_v43 = vld [vmem:[#allocation2 + $0xbe] sm:$0xff]  ;;  %4664 = vmatpush.msrb.mxu2 %v4260_v48 }
 0x198   :  { %1841 = vst.msk [vmem:[#allocation2 + $0x110] sm:$0xff] %vm550_vm0, %v1809_v49  ;;  %v4252_v49 = vld [vmem:[%s9639_s7 + $0x38] sm:$0xff]  ;;  %v3065_v48 = vld [vmem:[%s9637_s5 + $0x40] sm:$0xff] }
 0x199   :  { %1842 = vst.msk [vmem:[#allocation2 + $0x118] sm:$0xff] %vm550_vm0, %v1810_v27  ;;  %v3057_v27 = vld [vmem:[%s9637_s5] sm:$0xff]  ;;  %4873 = vmatpush.msrb.mxu3 %v4252_v49  ;;  %v4251_v49 = vld [vmem:[%s9639_s7 + $0x30] sm:$0xff]  ;;  %3920 = vmatpush.msrb.mxu1 %v3065_v48  ;;  %v4268_v48 = vld [vmem:[%s9639_s7 + $0xb8] sm:$0xff] }
 0x19a   :  { %v2315_v52 = vpop.f32.mrf.mxu0  ;;  %3711 = vmatpush.msra.mxu0 %v3057_v27 }
 0x19b   :  { %4874 = vmatpush.msrb.mxu3 %v4251_v49 }
 0x19c   :  { %v2524_v54 = vpop.f32.mrf.mxu1  ;;  %6712 = vmatmul.msk.f32.gmra.mxu2 %vm550_vm0, %v2090_v56  ;;  %5082 = vmatpush.msrb.mxu0 %v4268_v48  ;;  %v4267_v48 = vld [vmem:[%s9639_s7 + $0xb0] sm:$0xff] }
 0x19d   :  { %6648 = vmatmul.msk.f32.gmra.mxu0 %vm550_vm0, %v2026_v55  ;;  %v2525_v58 = vadd.f32 %v2524_v54, %v2315_v52 }
 0x19e   :  { %5083 = vmatpush.msrb.mxu0 %v4267_v48 }
 0x19f   :  { %6680 = vmatmul.msk.f32.gmra.mxu1 %vm550_vm0, %v1994_v57  ;;  %v2733_v62 = vpop.f32.mrf.mxu2 }
 0x1a0   :  { %v2829_v63 = vadd.f32 %v2733_v62, %v2525_v58  ;;  %v2031_v58 = vld [vmem:[#allocation2 + $0xc8] sm:$0xff] }
 0x1a1   :  { %v1903_v62 = vld [vmem:[#allocation2 + $0xc6] sm:$0xff] }
 0x1a2   :  { %v2318_v0 = vpop.f32.mrf.mxu0  ;;  %v2864_v1 = vadd.f32 %v8006_v59, %v2829_v63 }
 0x1a4   :  { %v2527_v2 = vpop.f32.mrf.mxu1  ;;  %v2896_v6 = vmax.f32 %v2864_v1, 0.0  ;;  %6713 = vmatmul.msk.f32.gmra.mxu2 %vm550_vm0, %v2091_v5 }
 0x1a5   :  { %6649 = vmatmul.msk.f32.gmra.mxu0 %vm550_vm0, %v2027_v4  ;;  %v2528_v8 = vadd.f32 %v2527_v2, %v2318_v0 }
 0x1a6   :  { %2929 = vst.msk [vmem:[#allocation2 + $0x20] sm:$0xff] %vm2928_vm5, %v2896_v6 }
 0x1a7   :  { %6681 = vmatmul.msk.f32.gmra.mxu1 %vm550_vm0, %v1899_v7  ;;  %v2736_v10 = vpop.f32.mrf.mxu2 }
 0x1a8   :  { %v2830_v12 = vadd.f32 %v2736_v10, %v2528_v8  ;;  %v2032_v10 = vld [vmem:[#allocation2 + $0xd0] sm:$0xff] }
 0x1aa   :  { %v2321_v13 = vpop.f32.mrf.mxu0  ;;  %v2865_v14 = vadd.f32 %v8006_v59, %v2830_v12  ;;  %v2096_v12 = vld [vmem:[#allocation2 + $0xd2] sm:$0xff] }
 0x1ac   :  { %v2530_v16 = vpop.f32.mrf.mxu1  ;;  %v2897_v19 = vmax.f32 %v2865_v14, 0.0  ;;  %6714 = vmatmul.msk.f32.gmra.mxu2 %vm550_vm0, %v2092_v18  ;;  %v1904_v14 = vld [vmem:[#allocation2 + $0xce] sm:$0xff] }
 0x1ad   :  { %6650 = vmatmul.msk.f32.gmra.mxu0 %vm550_vm0, %v2028_v17  ;;  %v2531_v11 = vadd.f32 %v2530_v16, %v2321_v13 }
 0x1ae   :  { %2930 = vst.msk [vmem:[#allocation2 + $0x28] sm:$0xff] %vm2928_vm5, %v2897_v19 }
 0x1af   :  { %6682 = vmatmul.msk.f32.gmra.mxu1 %vm550_vm0, %v1900_v9  ;;  %v2739_v15 = vpop.f32.mrf.mxu2 }
 0x1b0   :  { %v2831_v20 = vadd.f32 %v2739_v15, %v2531_v11 }
 0x1b2   :  { %v2324_v21 = vpop.f32.mrf.mxu0  ;;  %v2866_v22 = vadd.f32 %v8006_v59, %v2831_v20 }
 0x1b4   :  { %v2533_v23 = vpop.f32.mrf.mxu1  ;;  %v2898_v26 = vmax.f32 %v2866_v22, 0.0  ;;  %6715 = vmatmul.msk.f32.gmra.mxu2 %vm550_vm0, %v2093_v25  ;;  %v2033_v22 = vld [vmem:[#allocation2 + $0xd8] sm:$0xff] }
 0x1b5   :  { %6651 = vmatmul.msk.f32.gmra.mxu0 %vm550_vm0, %v2029_v24  ;;  %v2961_v31 = vld [vmem:[#allocation2 + $0x22] sm:$0xff]  ;;  %v2534_v32 = vadd.f32 %v2533_v23, %v2324_v21  ;;  %v2097_v23 = vld [vmem:[#allocation2 + $0xda] sm:$0xff] }
 0x1b6   :  { %2931 = vst.msk [vmem:[#allocation2 + $0x30] sm:$0xff] %vm2928_vm5, %v2898_v26  ;;  %v2993_v33 = vmax.f32 %v2896_v6, %v2961_v31  ;;  %v1905_v25 = vld [vmem:[#allocation2 + $0xd6] sm:$0xff] }
 0x1b7   :  { %6683 = vmatmul.msk.f32.gmra.mxu1 %vm550_vm0, %v1901_v29  ;;  %v2742_v34 = vpop.f32.mrf.mxu2 }
 0x1b8   :  { %v2832_v35 = vadd.f32 %v2742_v34, %v2534_v32  ;;  %3025 = vst.msk [vmem:[#allocation2 + $0x20] sm:$0xff] %vm2928_vm5, %v2993_v33 }
 0x1ba   :  { %v2327_v37 = vpop.f32.mrf.mxu0  ;;  %v2867_v38 = vadd.f32 %v8006_v59, %v2832_v35 }
 0x1bc   :  { %v2536_v39 = vpop.f32.mrf.mxu1  ;;  %v2899_v41 = vmax.f32 %v2867_v38, 0.0  ;;  %6716 = vmatmul.msk.f32.gmra.mxu2 %vm550_vm0, %v2094_v40 }
 0x1bd   :  { %6652 = vmatmul.msk.f32.gmra.mxu0 %vm550_vm0, %v2030_v42  ;;  %v2962_v44 = vld [vmem:[#allocation2 + $0x2a] sm:$0xff]  ;;  %v2537_v46 = vadd.f32 %v2536_v39, %v2327_v37  ;;  %v2034_v39 = vld [vmem:[#allocation2 + $0xe0] sm:$0xff] }
 0x1be   :  { %2932 = vst.msk [vmem:[#allocation2 + $0x38] sm:$0xff] %vm2928_vm5, %v2899_v41  ;;  %v2994_v47 = vmax.f32 %v2897_v19, %v2962_v44  ;;  %v2098_v42 = vld [vmem:[#allocation2 + $0xe2] sm:$0xff] }
 0x1bf   :  { %6684 = vmatmul.msk.f32.gmra.mxu1 %vm550_vm0, %v1902_v43  ;;  %v2745_v52 = vpop.f32.mrf.mxu2  ;;  %v3230_v53 = vld [vmem:[#allocation2 + $0x20] sm:$0xff] }
 0x1c0   :  { %v2833_v54 = vadd.f32 %v2745_v52, %v2537_v46  ;;  %6728 = vmatmul.msk.f32.vlgmr.msra.gmra.mxu3 %vm2928_vm5, %v3230_v53  ;;  %3026 = vst.msk [vmem:[#allocation2 + $0x28] sm:$0xff] %vm2928_vm5, %v2994_v47  ;;  %v4259_v47 = vld [vmem:[%s9639_s7 + $0x70] sm:$0xff] }
 0x1c1   :  { %4665 = vmatpush.msrb.mxu2 %v4259_v47  ;;  %v4250_v47 = vld [vmem:[%s9639_s7 + $0x28] sm:$0xff] }
 0x1c2   :  { %v2330_v55 = vpop.f32.mrf.mxu0  ;;  %v2868_v56 = vadd.f32 %v8006_v59, %v2833_v54  ;;  %4875 = vmatpush.msrb.mxu3 %v4250_v47  ;;  %v4249_v47 = vld [vmem:[%s9639_s7 + $0x20] sm:$0xff] }
 0x1c4   :  { %v2539_v57 = vpop.f32.mrf.mxu1  ;;  %v2900_v61 = vmax.f32 %v2868_v56, 0.0  ;;  %6717 = vmatmul.msk.f32.gmra.mxu2 %vm550_vm0, %v2095_v60  ;;  %4876 = vmatpush.msrb.mxu3 %v4249_v47 }
 0x1c5   :  { %6653 = vmatmul.msk.f32.gmra.mxu0 %vm550_vm0, %v2031_v58  ;;  %v2963_v63 = vld [vmem:[#allocation2 + $0x32] sm:$0xff]  ;;  %v2540_v0 = vadd.f32 %v2539_v57, %v2330_v55  ;;  %v2035_v57 = vld [vmem:[#allocation2 + $0xe8] sm:$0xff] }
 0x1c6   :  { %2933 = vst.msk [vmem:[#allocation2 + $0x40] sm:$0xff] %vm2928_vm5, %v2900_v61  ;;  %v2995_v1 = vmax.f32 %v2898_v26, %v2963_v63  ;;  %v2099_v58 = vld [vmem:[#allocation2 + $0xea] sm:$0xff] }
 0x1c7   :  { %6685 = vmatmul.msk.f32.gmra.mxu1 %vm550_vm0, %v1903_v62  ;;  %v2748_v2 = vpop.f32.mrf.mxu2  ;;  %v3231_v4 = vld [vmem:[#allocation2 + $0x28] sm:$0xff] }
 0x1c8   :  { %v2834_v5 = vadd.f32 %v2748_v2, %v2540_v0  ;;  %6729 = vmatmul.msk.f32.gmra.mxu3 %vm2928_vm5, %v3231_v4  ;;  %3027 = vst.msk [vmem:[#allocation2 + $0x30] sm:$0xff] %vm2928_vm5, %v2995_v1 }
 0x1ca   :  { %v2333_v6 = vpop.f32.mrf.mxu0  ;;  %v2869_v7 = vadd.f32 %v8006_v59, %v2834_v5 }
 0x1cc   :  { %v2542_v8 = vpop.f32.mrf.mxu1  ;;  %v2901_v13 = vmax.f32 %v2869_v7, 0.0  ;;  %6718 = vmatmul.msk.f32.gmra.mxu2 %vm550_vm0, %v2096_v12 }
 0x1cd   :  { %6654 = vmatmul.msk.f32.gmra.mxu0 %vm550_vm0, %v2032_v10  ;;  %v2964_v16 = vld [vmem:[#allocation2 + $0x3a] sm:$0xff]  ;;  %v2543_v17 = vadd.f32 %v2542_v8, %v2333_v6  ;;  %v2036_v8 = vld [vmem:[#allocation2 + $0xf0] sm:$0xff] }
 0x1ce   :  { %2934 = vst.msk [vmem:[#allocation2 + $0x48] sm:$0xff] %vm2928_vm5, %v2901_v13  ;;  %v2996_v18 = vmax.f32 %v2899_v41, %v2964_v16  ;;  %v1906_v41 = vld [vmem:[#allocation2 + $0xde] sm:$0xff]  ;;  %v2100_v10 = vld [vmem:[#allocation2 + $0xf2] sm:$0xff] }
 0x1cf   :  { %6686 = vmatmul.msk.f32.gmra.mxu1 %vm550_vm0, %v1904_v14  ;;  %v2751_v19 = vpop.f32.mrf.mxu2  ;;  %v3232_v9 = vld [vmem:[#allocation2 + $0x30] sm:$0xff] }
 0x1d0   :  { %v2835_v11 = vadd.f32 %v2751_v19, %v2543_v17  ;;  %6730 = vmatmul.msk.f32.gmra.mxu3 %vm2928_vm5, %v3232_v9  ;;  %3028 = vst.msk [vmem:[#allocation2 + $0x38] sm:$0xff] %vm2928_vm5, %v2996_v18 }
 0x1d2   :  { %v2336_v15 = vpop.f32.mrf.mxu0  ;;  %v2870_v20 = vadd.f32 %v8006_v59, %v2835_v11 }
 0x1d4   :  { %v2545_v21 = vpop.f32.mrf.mxu1  ;;  %v2902_v24 = vmax.f32 %v2870_v20, 0.0  ;;  %6719 = vmatmul.msk.f32.gmra.mxu2 %vm550_vm0, %v2097_v23 }
 0x1d5   :  { %6655 = vmatmul.msk.f32.gmra.mxu0 %vm550_vm0, %v2033_v22  ;;  %v2965_v26 = vld [vmem:[#allocation2 + $0x42] sm:$0xff]  ;;  %v2546_v29 = vadd.f32 %v2545_v21, %v2336_v15  ;;  %v2037_v21 = vld [vmem:[#allocation2 + $0xf8] sm:$0xff] }
 0x1d6   :  { %2935 = vst.msk [vmem:[#allocation2 + $0x50] sm:$0xff] %vm2928_vm5, %v2902_v24  ;;  %v2997_v31 = vmax.f32 %v2900_v61, %v2965_v26  ;;  %v1907_v61 = vld [vmem:[#allocation2 + $0xe6] sm:$0xff]  ;;  %v2101_v22 = vld [vmem:[#allocation2 + $0xfa] sm:$0xff] }
 0x1d7   :  { %6687 = vmatmul.msk.f32.gmra.mxu1 %vm550_vm0, %v1905_v25  ;;  %v2754_v32 = vpop.f32.mrf.mxu2  ;;  %v3233_v33 = vld [vmem:[#allocation2 + $0x38] sm:$0xff] }
 0x1d8   :  { %v2836_v34 = vadd.f32 %v2754_v32, %v2546_v29  ;;  %6731 = vmatmul.msk.f32.gmra.mxu3 %vm2928_vm5, %v3233_v33  ;;  %3029 = vst.msk [vmem:[#allocation2 + $0x40] sm:$0xff] %vm2928_vm5, %v2997_v31 }
 0x1da   :  { %v2339_v35 = vpop.f32.mrf.mxu0  ;;  %v2871_v37 = vadd.f32 %v8006_v59, %v2836_v34 }
 0x1dc   :  { %v2548_v38 = vpop.f32.mrf.mxu1  ;;  %v2903_v40 = vmax.f32 %v2871_v37, 0.0  ;;  %6720 = vmatmul.msk.f32.gmra.mxu2 %vm550_vm0, %v2098_v42 }
 0x1dd   :  { %6656 = vmatmul.msk.f32.gmra.mxu0 %vm550_vm0, %v2034_v39  ;;  %v2966_v43 = vld [vmem:[#allocation2 + $0x4a] sm:$0xff]  ;;  %v2549_v44 = vadd.f32 %v2548_v38, %v2339_v35  ;;  %v2038_v38 = vld [vmem:[#allocation2 + $0x100] sm:$0xff] }
 0x1de   :  { %2936 = vst.msk [vmem:[#allocation2 + $0x58] sm:$0xff] %vm2928_vm5, %v2903_v40  ;;  %v2998_v46 = vmax.f32 %v2901_v13, %v2966_v43  ;;  %v1908_v13 = vld [vmem:[#allocation2 + $0xee] sm:$0xff]  ;;  %v2102_v39 = vld [vmem:[#allocation2 + $0x102] sm:$0xff] }
 0x1df   :  { %6688 = vmatmul.msk.f32.gmra.mxu1 %vm550_vm0, %v1906_v41  ;;  %v2757_v27 = vpop.f32.mrf.mxu2  ;;  %v3234_v52 = vld [vmem:[#allocation2 + $0x40] sm:$0xff] }
 0x1e0   :  { %v2837_v53 = vadd.f32 %v2757_v27, %v2549_v44  ;;  %6732 = vmatmul.msk.f32.gmra.mxu3 %vm2928_vm5, %v3234_v52  ;;  %3030 = vst.msk [vmem:[#allocation2 + $0x48] sm:$0xff] %vm2928_vm5, %v2998_v46  ;;  %v4258_v46 = vld [vmem:[%s9639_s7 + $0x68] sm:$0xff] }
 0x1e1   :  { %4666 = vmatpush.msrb.mxu2 %v4258_v46 }
 0x1e2   :  { %v2342_v54 = vpop.f32.mrf.mxu0  ;;  %v2872_v55 = vadd.f32 %v8006_v59, %v2837_v53 }
 0x1e3   :  { %4667 = vmatpush.msrb.mxu2 %v4257_v51 }
 0x1e4   :  { %v2551_v56 = vpop.f32.mrf.mxu1  ;;  %v2904_v60 = vmax.f32 %v2872_v55, 0.0  ;;  %6721 = vmatmul.msk.f32.gmra.mxu2 %vm550_vm0, %v2099_v58 }
 0x1e5   :  { %6657 = vmatmul.msk.f32.gmra.mxu0 %vm550_vm0, %v2035_v57  ;;  %v2967_v62 = vld [vmem:[#allocation2 + $0x52] sm:$0xff]  ;;  %v2552_v63 = vadd.f32 %v2551_v56, %v2342_v54  ;;  %v2039_v56 = vld [vmem:[#allocation2 + $0x108] sm:$0xff] }
 0x1e6   :  { %2937 = vst.msk [vmem:[#allocation2 + $0x60] sm:$0xff] %vm2928_vm5, %v2904_v60  ;;  %v2999_v0 = vmax.f32 %v2902_v24, %v2967_v62  ;;  %v1909_v24 = vld [vmem:[#allocation2 + $0xf6] sm:$0xff]  ;;  %v2103_v57 = vld [vmem:[#allocation2 + $0x10a] sm:$0xff] }
 0x1e7   :  { %6689 = vmatmul.msk.f32.gmra.mxu1 %vm550_vm0, %v1907_v61  ;;  %v2760_v1 = vpop.f32.mrf.mxu2  ;;  %v3235_v2 = vld [vmem:[#allocation2 + $0x48] sm:$0xff] }
 0x1e8   :  { %v2838_v4 = vadd.f32 %v2760_v1, %v2552_v63  ;;  %6733 = vmatmul.msk.f32.gmra.mxu3 %vm2928_vm5, %v3235_v2  ;;  %3031 = vst.msk [vmem:[#allocation2 + $0x50] sm:$0xff] %vm2928_vm5, %v2999_v0 }
 0x1ea   :  { %v2345_v5 = vpop.f32.mrf.mxu0  ;;  %v2873_v6 = vadd.f32 %v8006_v59, %v2838_v4  ;;  %v8128_v4 = vadd.s32 248, %v7853_v45 }
 0x1ec   :  { %v2554_v7 = vpop.f32.mrf.mxu1  ;;  %v2905_v12 = vmax.f32 %v2873_v6, 0.0  ;;  %6722 = vmatmul.msk.f32.gmra.mxu2 %vm550_vm0, %v2100_v10  ;;  %v2040_v10 = vld [vmem:[#allocation2 + $0x110] sm:$0xff] }
 0x1ed   :  { %6658 = vmatmul.msk.f32.gmra.mxu0 %vm550_vm0, %v2036_v8  ;;  %v2968_v14 = vld [vmem:[#allocation2 + $0x5a] sm:$0xff]  ;;  %v2555_v16 = vadd.f32 %v2554_v7, %v2345_v5  ;;  %v2104_v7 = vld [vmem:[#allocation2 + $0x112] sm:$0xff] }
 0x1ee   :  { %2938 = vst.msk [vmem:[#allocation2 + $0x68] sm:$0xff] %vm2928_vm5, %v2905_v12  ;;  %v3000_v17 = vmax.f32 %v2903_v40, %v2968_v14  ;;  %v1910_v40 = vld [vmem:[#allocation2 + $0xfe] sm:$0xff]  ;;  %v1912_v14 = vld [vmem:[#allocation2 + $0x10e] sm:$0xff] }
 0x1ef   :  { %6690 = vmatmul.msk.f32.gmra.mxu1 %vm550_vm0, %v1908_v13  ;;  %v2763_v18 = vpop.f32.mrf.mxu2  ;;  %v3236_v19 = vld [vmem:[#allocation2 + $0x50] sm:$0xff]  ;;  %v346_v13 = vand.u32 127, %v8128_v4 }
 0x1f0   :  { %v2839_v9 = vadd.f32 %v2763_v18, %v2555_v16  ;;  %6734 = vmatmul.msk.f32.gmra.mxu3 %vm2928_vm5, %v3236_v19  ;;  %3032 = vst.msk [vmem:[#allocation2 + $0x58] sm:$0xff] %vm2928_vm5, %v3000_v17  ;;  %v3108_v48 = vld [vmem:[#allocation2 + $0x4c] sm:$0xff] }
 0x1f1   :  { %vm2073_vm6 = vcmp.ge.s32.totalorder %v346_v13, 126  ;;  %vm3293_vm10 = vcmp.ge.s32.totalorder %v346_v13, 124 }
 0x1f2   :  { %v2348_v11 = vpop.f32.mrf.mxu0  ;;  %v2874_v15 = vadd.f32 %v8006_v59, %v2839_v9 }
 0x1f4   :  { %v2557_v20 = vpop.f32.mrf.mxu1  ;;  %v2906_v23 = vmax.f32 %v2874_v15, 0.0  ;;  %6723 = vmatmul.msk.f32.gmra.mxu2 %vm550_vm0, %v2101_v22  ;;  %v2105_v15 = vld [vmem:[#allocation2 + $0x11a] sm:$0xff] }
 0x1f5   :  { %6659 = vmatmul.msk.f32.gmra.mxu0 %vm550_vm0, %v2037_v21  ;;  %v2969_v25 = vld [vmem:[#allocation2 + $0x62] sm:$0xff]  ;;  %v2558_v26 = vadd.f32 %v2557_v20, %v2348_v11 }
 0x1f6   :  { %2939 = vst.msk [vmem:[#allocation2 + $0x70] sm:$0xff] %vm2928_vm5, %v2906_v23  ;;  %v3001_v29 = vmax.f32 %v2904_v60, %v2969_v25  ;;  %v1911_v60 = vld [vmem:[#allocation2 + $0x106] sm:$0xff] }
 0x1f7   :  { %6691 = vmatmul.msk.f32.gmra.mxu1 %vm550_vm0, %v1909_v24  ;;  %v2766_v31 = vpop.f32.mrf.mxu2  ;;  %v3237_v32 = vld [vmem:[#allocation2 + $0x58] sm:$0xff]  ;;  %v2201_v24 = vsel %vm2073_vm6, 0.0, %v2105_v15 }
 0x1f8   :  { %v2840_v33 = vadd.f32 %v2766_v31, %v2558_v26  ;;  %6735 = vmatmul.msk.f32.gmra.mxu3 %vm2928_vm5, %v3237_v32  ;;  %3033 = vst.msk [vmem:[#allocation2 + $0x60] sm:$0xff] %vm2928_vm5, %v3001_v29  ;;  %v1913_v26 = vld [vmem:[#allocation2 + $0x116] sm:$0xff] }
 0x1f9   :  { %v3106_v15 = vld [vmem:[#allocation2 + $0x3c] sm:$0xff] }
 0x1fa   :  { %v2351_v34 = vpop.f32.mrf.mxu0  ;;  %v2875_v35 = vadd.f32 %v8006_v59, %v2840_v33 }
 0x1fc   :  { %v2560_v37 = vpop.f32.mrf.mxu1  ;;  %v2907_v42 = vmax.f32 %v2875_v35, 0.0  ;;  %6724 = vmatmul.msk.f32.gmra.mxu2 %vm550_vm0, %v2102_v39 }
 0x1fd   :  { %6660 = vmatmul.msk.f32.gmra.mxu0 %vm550_vm0, %v2038_v38  ;;  %v2970_v41 = vld [vmem:[#allocation2 + $0x6a] sm:$0xff]  ;;  %v2561_v43 = vadd.f32 %v2560_v37, %v2351_v34  ;;  %v3102_v37 = vld [vmem:[#allocation2 + $0x1c] sm:$0xff] }
 0x1fe   :  { %2940 = vst.msk [vmem:[#allocation2 + $0x78] sm:$0xff] %vm2928_vm5, %v2907_v42  ;;  %v3002_v44 = vmax.f32 %v2905_v12, %v2970_v41 }
 0x1ff   :  { %6692 = vmatmul.msk.f32.gmra.mxu1 %vm550_vm0, %v1910_v40  ;;  %v2769_v49 = vpop.f32.mrf.mxu2  ;;  %v3238_v27 = vld [vmem:[#allocation2 + $0x60] sm:$0xff]  ;;  %v3198_v40 = vsel %vm3070_vm7, 0.0, %v3102_v37 }
 0x200   :  { %v2841_v52 = vadd.f32 %v2769_v49, %v2561_v43  ;;  %6736 = vmatmul.msk.f32.gmra.mxu3 %vm2928_vm5, %v3238_v27  ;;  %3034 = vst.msk [vmem:[#allocation2 + $0x68] sm:$0xff] %vm2928_vm5, %v3002_v44  ;;  %v3103_v43 = vld [vmem:[#allocation2 + $0x24] sm:$0xff] }
 0x202   :  { %v2354_v53 = vpop.f32.mrf.mxu0  ;;  %v2876_v54 = vadd.f32 %v8006_v59, %v2841_v52 }
 0x204   :  { %v2563_v55 = vpop.f32.mrf.mxu1  ;;  %v2908_v58 = vmax.f32 %v2876_v54, 0.0  ;;  %6725 = vmatmul.msk.f32.gmra.mxu2 %vm550_vm0, %v2103_v57  ;;  %v3104_v57 = vld [vmem:[#allocation2 + $0x2c] sm:$0xff] }
 0x205   :  { %6661 = vmatmul.msk.f32.gmra.mxu0 %vm550_vm0, %v2039_v56  ;;  %v2971_v61 = vld [vmem:[#allocation2 + $0x72] sm:$0xff]  ;;  %v2564_v62 = vadd.f32 %v2563_v55, %v2354_v53 }
 0x206   :  { %2941 = vst.msk [vmem:[#allocation2 + $0x80] sm:$0xff] %vm2928_vm5, %v2908_v58  ;;  %v3003_v63 = vmax.f32 %v2906_v23, %v2971_v61  ;;  %v2041_v23 = vld [vmem:[#allocation2 + $0x118] sm:$0xff] }
 0x207   :  { %6693 = vmatmul.msk.f32.gmra.mxu1 %vm550_vm0, %v1911_v60  ;;  %v2772_v0 = vpop.f32.mrf.mxu2  ;;  %v3239_v1 = vld [vmem:[#allocation2 + $0x68] sm:$0xff] }
 0x208   :  { %v2842_v2 = vadd.f32 %v2772_v0, %v2564_v62  ;;  %6737 = vmatmul.msk.f32.gmra.mxu3 %vm2928_vm5, %v3239_v1  ;;  %3035 = vst.msk [vmem:[#allocation2 + $0x70] sm:$0xff] %vm2928_vm5, %v3003_v63 }
 0x20a   :  { %v2357_v5 = vpop.f32.mrf.mxu0  ;;  %v2877_v6 = vadd.f32 %v8006_v59, %v2842_v2 }
 0x20c   :  { %v2566_v8 = vpop.f32.mrf.mxu1  ;;  %v2909_v12 = vmax.f32 %v2877_v6, 0.0  ;;  %6726 = vmatmul.msk.f32.gmra.mxu2 %vm550_vm0, %v2104_v7  ;;  %v3105_v7 = vld [vmem:[#allocation2 + $0x34] sm:$0xff] }
 0x20d   :  { %6662 = vmatmul.msk.f32.gmra.mxu0 %vm550_vm0, %v2040_v10  ;;  %v2972_v16 = vld [vmem:[#allocation2 + $0x7a] sm:$0xff]  ;;  %v2567_v17 = vadd.f32 %v2566_v8, %v2357_v5 }
 0x20e   :  { %2942 = vst.msk [vmem:[#allocation2 + $0x88] sm:$0xff] %vm2928_vm5, %v2909_v12  ;;  %v3004_v18 = vmax.f32 %v2907_v42, %v2972_v16 }
 0x20f   :  { %6694 = vmatmul.msk.f32.gmra.mxu1 %vm550_vm0, %v1912_v14  ;;  %v2775_v19 = vpop.f32.mrf.mxu2  ;;  %v3240_v9 = vld [vmem:[#allocation2 + $0x70] sm:$0xff] }
 0x210   :  { %v2843_v11 = vadd.f32 %v2775_v19, %v2567_v17  ;;  %6738 = vmatmul.msk.f32.gmra.mxu3 %vm2928_vm5, %v3240_v9  ;;  %3036 = vst.msk [vmem:[#allocation2 + $0x78] sm:$0xff] %vm2928_vm5, %v3004_v18 }
 0x212   :  { %v2360_v20 = vpop.f32.mrf.mxu0  ;;  %v2878_v21 = vadd.f32 %v8006_v59, %v2843_v11 }
 0x214   :  { %v2569_v22 = vpop.f32.mrf.mxu1  ;;  %v2910_v25 = vmax.f32 %v2878_v21, 0.0  ;;  %6727 = vmatmul.msk.f32.gmra.mxu2 %vm550_vm0, %v2201_v24 }
 0x215   :  { %6663 = vmatmul.msk.f32.gmra.mxu0 %vm550_vm0, %v2041_v23  ;;  %v2973_v29 = vld [vmem:[#allocation2 + $0x82] sm:$0xff]  ;;  %v2570_v31 = vadd.f32 %v2569_v22, %v2360_v20 }
 0x216   :  { %2943 = vst.msk [vmem:[#allocation2 + $0x90] sm:$0xff] %vm2928_vm5, %v2910_v25  ;;  %v3005_v32 = vmax.f32 %v2908_v58, %v2973_v29 }
 0x217   :  { %6695 = vmatmul.msk.f32.gmra.mxu1 %vm550_vm0, %v1913_v26  ;;  %v2778_v33 = vpop.f32.mrf.mxu2  ;;  %v3241_v34 = vld [vmem:[#allocation2 + $0x78] sm:$0xff] }
 0x218   :  { %v2844_v35 = vadd.f32 %v2778_v33, %v2570_v31  ;;  %6739 = vmatmul.msk.f32.gmra.mxu3 %vm2928_vm5, %v3241_v34  ;;  %3037 = vst.msk [vmem:[#allocation2 + $0x80] sm:$0xff] %vm2928_vm5, %v3005_v32  ;;  %v3107_v33 = vld [vmem:[#allocation2 + $0x44] sm:$0xff] }
 0x21a   :  { %v2363_v38 = vpop.f32.mrf.mxu0  ;;  %v2879_v39 = vadd.f32 %v8006_v59, %v2844_v35 }
 0x21c   :  { %v2572_v42 = vpop.f32.mrf.mxu1  ;;  %v2911_v41 = vmax.f32 %v2879_v39, 0.0  ;;  %v4248_v39 = vld [vmem:[%s9639_s7 + $0x18] sm:$0xff] }
 0x21d   :  { %6760 = vmatmul.msk.f32.vlgmr.msra.gmra.mxu0 %vm2928_vm5, %v3198_v40  ;;  %v2974_v44 = vld [vmem:[#allocation2 + $0x8a] sm:$0xff]  ;;  %v2573_v46 = vadd.f32 %v2572_v42, %v2363_v38  ;;  %v4256_v38 = vld [vmem:[%s9639_s7 + $0x58] sm:$0xff]  ;;  %4877 = vmatpush.msrb.mxu3 %v4248_v39 }
 0x21e   :  { %2944 = vst.msk [vmem:[#allocation2 + $0x98] sm:$0xff] %vm2928_vm5, %v2911_v41  ;;  %v3006_v45 = vmax.f32 %v2909_v12, %v2974_v44  ;;  %v4266_v42 = vld [vmem:[%s9639_s7 + $0xa8] sm:$0xff]  ;;  %4668 = vmatpush.msrb.mxu2 %v4256_v38 }
 0x21f   :  { %6792 = vmatmul.msk.f32.vlgmr.msrb.gmra.mxu1 %vm2928_vm5, %v3103_v43  ;;  %v2781_v49 = vpop.f32.mrf.mxu2  ;;  %v3242_v27 = vld [vmem:[#allocation2 + $0x80] sm:$0xff]  ;;  %5084 = vmatpush.msrb.mxu0 %v4266_v42 }
 0x220   :  { %v2845_v52 = vadd.f32 %v2781_v49, %v2573_v46  ;;  %6740 = vmatmul.msk.f32.gmra.mxu3 %vm2928_vm5, %v3242_v27  ;;  %3038 = vst.msk [vmem:[#allocation2 + $0x88] sm:$0xff] %vm2928_vm5, %v3006_v45 }
 0x222   :  { %v2366_v53 = vpop.f32.mrf.mxu0  ;;  %v2880_v54 = vadd.f32 %v8006_v59, %v2845_v52 }
 0x224   :  { %v2575_v55 = vpop.f32.mrf.mxu1  ;;  %v2912_v56 = vmax.f32 %v2880_v54, 0.0 }
 0x225   :  { %6761 = vmatmul.msk.f32.gmra.mxu0 %vm2928_vm5, %v3103_v43  ;;  %v2975_v58 = vld [vmem:[#allocation2 + $0x92] sm:$0xff]  ;;  %v2576_v60 = vadd.f32 %v2575_v55, %v2366_v53 }
 0x226   :  { %2945 = vst.msk [vmem:[#allocation2 + $0xa0] sm:$0xff] %vm2928_vm5, %v2912_v56  ;;  %v3007_v61 = vmax.f32 %v2910_v25, %v2975_v58 }
 0x227   :  { %6793 = vmatmul.msk.f32.gmra.mxu1 %vm2928_vm5, %v3104_v57  ;;  %v2784_v62 = vpop.f32.mrf.mxu2  ;;  %v3243_v63 = vld [vmem:[#allocation2 + $0x88] sm:$0xff] }
 0x228   :  { %v2846_v0 = vadd.f32 %v2784_v62, %v2576_v60  ;;  %6741 = vmatmul.msk.f32.gmra.mxu3 %vm2928_vm5, %v3243_v63  ;;  %3039 = vst.msk [vmem:[#allocation2 + $0x90] sm:$0xff] %vm2928_vm5, %v3007_v61  ;;  %v3109_v62 = vld [vmem:[#allocation2 + $0x54] sm:$0xff] }
 0x22a   :  { %v2369_v1 = vpop.f32.mrf.mxu0  ;;  %v2881_v2 = vadd.f32 %v8006_v59, %v2846_v0 }
 0x22c   :  { %v2578_v5 = vpop.f32.mrf.mxu1  ;;  %v2913_v6 = vmax.f32 %v2881_v2, 0.0 }
 0x22d   :  { %6762 = vmatmul.msk.f32.gmra.mxu0 %vm2928_vm5, %v3104_v57  ;;  %v2976_v8 = vld [vmem:[#allocation2 + $0x9a] sm:$0xff]  ;;  %v2579_v10 = vadd.f32 %v2578_v5, %v2369_v1 }
 0x22e   :  { %2946 = vst.msk [vmem:[#allocation2 + $0xa8] sm:$0xff] %vm2928_vm5, %v2913_v6  ;;  %v3008_v12 = vmax.f32 %v2911_v41, %v2976_v8 }
 0x22f   :  { %6794 = vmatmul.msk.f32.gmra.mxu1 %vm2928_vm5, %v3105_v7  ;;  %v2787_v14 = vpop.f32.mrf.mxu2  ;;  %v3244_v16 = vld [vmem:[#allocation2 + $0x90] sm:$0xff] }
 0x230   :  { %v2847_v17 = vadd.f32 %v2787_v14, %v2579_v10  ;;  %6742 = vmatmul.msk.f32.gmra.mxu3 %vm2928_vm5, %v3244_v16  ;;  %3040 = vst.msk [vmem:[#allocation2 + $0x98] sm:$0xff] %vm2928_vm5, %v3008_v12  ;;  %v3110_v16 = vld [vmem:[#allocation2 + $0x5c] sm:$0xff] }
 0x232   :  { %v2372_v18 = vpop.f32.mrf.mxu0  ;;  %v2882_v19 = vadd.f32 %v8006_v59, %v2847_v17 }
 0x234   :  { %v2581_v9 = vpop.f32.mrf.mxu1  ;;  %v2914_v11 = vmax.f32 %v2882_v19, 0.0 }
 0x235   :  { %6763 = vmatmul.msk.f32.gmra.mxu0 %vm2928_vm5, %v3105_v7  ;;  %v2977_v20 = vld [vmem:[#allocation2 + $0xa2] sm:$0xff]  ;;  %v2582_v21 = vadd.f32 %v2581_v9, %v2372_v18 }
 0x236   :  { %2947 = vst.msk [vmem:[#allocation2 + $0xb0] sm:$0xff] %vm2928_vm5, %v2914_v11  ;;  %v3009_v22 = vmax.f32 %v2912_v56, %v2977_v20 }
 0x237   :  { %6795 = vmatmul.msk.f32.gmra.mxu1 %vm2928_vm5, %v3106_v15  ;;  %v2790_v23 = vpop.f32.mrf.mxu2  ;;  %v3245_v24 = vld [vmem:[#allocation2 + $0x98] sm:$0xff] }
 0x238   :  { %v2848_v25 = vadd.f32 %v2790_v23, %v2582_v21  ;;  %6743 = vmatmul.msk.f32.gmra.mxu3 %vm2928_vm5, %v3245_v24  ;;  %3041 = vst.msk [vmem:[#allocation2 + $0xa0] sm:$0xff] %vm2928_vm5, %v3009_v22 }
 0x23a   :  { %v2375_v26 = vpop.f32.mrf.mxu0  ;;  %v2883_v29 = vadd.f32 %v8006_v59, %v2848_v25  ;;  %v3111_v25 = vld [vmem:[#allocation2 + $0x64] sm:$0xff] }
 0x23c   :  { %v2584_v31 = vpop.f32.mrf.mxu1  ;;  %v2915_v32 = vmax.f32 %v2883_v29, 0.0 }
 0x23d   :  { %6764 = vmatmul.msk.f32.gmra.mxu0 %vm2928_vm5, %v3106_v15  ;;  %v2978_v34 = vld [vmem:[#allocation2 + $0xaa] sm:$0xff]  ;;  %v2585_v35 = vadd.f32 %v2584_v31, %v2375_v26 }
 0x23e   :  { %2948 = vst.msk [vmem:[#allocation2 + $0xb8] sm:$0xff] %vm2928_vm5, %v2915_v32  ;;  %v3010_v37 = vmax.f32 %v2913_v6, %v2978_v34  ;;  %v4265_v34 = vld [vmem:[%s9639_s7 + $0xa0] sm:$0xff] }
 0x23f   :  { %6796 = vmatmul.msk.f32.gmra.mxu1 %vm2928_vm5, %v3107_v33  ;;  %v2793_v40 = vpop.f32.mrf.mxu2  ;;  %v3246_v41 = vld [vmem:[#allocation2 + $0xa0] sm:$0xff]  ;;  %5085 = vmatpush.msrb.mxu0 %v4265_v34 }
 0x240   :  { %v2849_v43 = vadd.f32 %v2793_v40, %v2585_v35  ;;  %6744 = vmatmul.msk.f32.gmra.mxu3 %vm2928_vm5, %v3246_v41  ;;  %3042 = vst.msk [vmem:[#allocation2 + $0xa8] sm:$0xff] %vm2928_vm5, %v3010_v37 }
 0x242   :  { %v2378_v44 = vpop.f32.mrf.mxu0  ;;  %v2884_v46 = vadd.f32 %v8006_v59, %v2849_v43 }
 0x243   :  { %v8198_v51 = vpop.f32.mrf.mxu3 }
 0x244   :  { %v2587_v45 = vpop.f32.mrf.mxu1  ;;  %v2916_v47 = vmax.f32 %v2884_v46, 0.0 }
 0x245   :  { %6765 = vmatmul.msk.f32.gmra.mxu0 %vm2928_vm5, %v3107_v33  ;;  %v2979_v49 = vld [vmem:[#allocation2 + $0xb2] sm:$0xff]  ;;  %v2588_v27 = vadd.f32 %v2587_v45, %v2378_v44 }
 0x246   :  { %2949 = vst.msk [vmem:[#allocation2 + $0xc0] sm:$0xff] %vm2928_vm5, %v2916_v47  ;;  %v3011_v52 = vmax.f32 %v2914_v11, %v2979_v49  ;;  %v4247_v33 = vld [vmem:[%s9639_s7 + $0x10] sm:$0xff] }
 0x247   :  { %6797 = vmatmul.msk.f32.gmra.mxu1 %vm2928_vm5, %v3108_v48  ;;  %v2796_v53 = vpop.f32.mrf.mxu2  ;;  %v3247_v54 = vld [vmem:[#allocation2 + $0xa8] sm:$0xff]  ;;  %4878 = vmatpush.msrb.mxu3 %v4247_v33 }
 0x248   :  { %v2850_v55 = vadd.f32 %v2796_v53, %v2588_v27  ;;  %6745 = vmatmul.msk.f32.gmra.mxu3 %vm2928_vm5, %v3247_v54  ;;  %3043 = vst.msk [vmem:[#allocation2 + $0xb0] sm:$0xff] %vm2928_vm5, %v3011_v52  ;;  %v3112_v44 = vld [vmem:[#allocation2 + $0x6c] sm:$0xff] }
 0x24a   :  { %v2381_v56 = vpop.f32.mrf.mxu0  ;;  %v2885_v57 = vadd.f32 %v8006_v59, %v2850_v55 }
 0x24b   :  { %v8206_v60 = vpop.f32.mrf.mxu3 }
 0x24c   :  { %v2590_v58 = vpop.f32.mrf.mxu1  ;;  %v2917_v61 = vmax.f32 %v2885_v57, 0.0  ;;  %v3113_v57 = vld [vmem:[#allocation2 + $0x74] sm:$0xff] }
 0x24d   :  { %6766 = vmatmul.msk.f32.gmra.mxu0 %vm2928_vm5, %v3108_v48  ;;  %v2980_v63 = vld [vmem:[#allocation2 + $0xba] sm:$0xff]  ;;  %v2591_v0 = vadd.f32 %v2590_v58, %v2381_v56 }
 0x24e   :  { %2950 = vst.msk [vmem:[#allocation2 + $0xc8] sm:$0xff] %vm2928_vm5, %v2917_v61  ;;  %v3012_v1 = vmax.f32 %v2915_v32, %v2980_v63  ;;  %v4255_v32 = vld [vmem:[%s9639_s7 + $0x50] sm:$0xff] }
 0x24f   :  { %6798 = vmatmul.msk.f32.gmra.mxu1 %vm2928_vm5, %v3109_v62  ;;  %v2799_v2 = vpop.f32.mrf.mxu2  ;;  %v3248_v5 = vld [vmem:[#allocation2 + $0xb0] sm:$0xff]  ;;  %4669 = vmatpush.msrb.mxu2 %v4255_v32 }
 0x250   :  { %v2851_v6 = vadd.f32 %v2799_v2, %v2591_v0  ;;  %6746 = vmatmul.msk.f32.gmra.mxu3 %vm2928_vm5, %v3248_v5  ;;  %3044 = vst.msk [vmem:[#allocation2 + $0xb8] sm:$0xff] %vm2928_vm5, %v3012_v1 }
 0x252   :  { %v2384_v7 = vpop.f32.mrf.mxu0  ;;  %v2886_v8 = vadd.f32 %v8006_v59, %v2851_v6 }
 0x253   :  { %v8214_v12 = vpop.f32.mrf.mxu3 }
 0x254   :  { %v2593_v10 = vpop.f32.mrf.mxu1  ;;  %v2918_v14 = vmax.f32 %v2886_v8, 0.0 }
 0x255   :  { %6767 = vmatmul.msk.f32.gmra.mxu0 %vm2928_vm5, %v3109_v62  ;;  %v2981_v17 = vld [vmem:[#allocation2 + $0xc2] sm:$0xff]  ;;  %v2594_v18 = vadd.f32 %v2593_v10, %v2384_v7 }
 0x256   :  { %2951 = vst.msk [vmem:[#allocation2 + $0xd0] sm:$0xff] %vm2928_vm5, %v2918_v14  ;;  %v3013_v19 = vmax.f32 %v2916_v47, %v2981_v17  ;;  %v3114_v10 = vld [vmem:[#allocation2 + $0x7c] sm:$0xff] }
 0x257   :  { %6799 = vmatmul.msk.f32.gmra.mxu1 %vm2928_vm5, %v3110_v16  ;;  %v2802_v9 = vpop.f32.mrf.mxu2  ;;  %v3249_v11 = vld [vmem:[#allocation2 + $0xb8] sm:$0xff] }
 0x258   :  { %v2852_v15 = vadd.f32 %v2802_v9, %v2594_v18  ;;  %6747 = vmatmul.msk.f32.gmra.mxu3 %vm2928_vm5, %v3249_v11  ;;  %3045 = vst.msk [vmem:[#allocation2 + $0xc0] sm:$0xff] %vm2928_vm5, %v3013_v19  ;;  %v8265_v11 = vld [vmem:[%s9636_s4] ss:$0 sm:$0xff] }
 0x25a   :  { %v2387_v20 = vpop.f32.mrf.mxu0  ;;  %v2887_v21 = vadd.f32 %v8006_v59, %v2852_v15 }
 0x25b   :  { %v8222_v23 = vpop.f32.mrf.mxu3 }
 0x25c   :  { %v2596_v22 = vpop.f32.mrf.mxu1  ;;  %v2919_v24 = vmax.f32 %v2887_v21, 0.0 }
 0x25d   :  { %6768 = vmatmul.msk.f32.gmra.mxu0 %vm2928_vm5, %v3110_v16  ;;  %v2982_v26 = vld [vmem:[#allocation2 + $0xca] sm:$0xff]  ;;  %v2597_v29 = vadd.f32 %v2596_v22, %v2387_v20 }
 0x25e   :  { %2952 = vst.msk [vmem:[#allocation2 + $0xd8] sm:$0xff] %vm2928_vm5, %v2919_v24  ;;  %v3014_v31 = vmax.f32 %v2917_v61, %v2982_v26 }
 0x25f   :  { %6800 = vmatmul.msk.f32.gmra.mxu1 %vm2928_vm5, %v3111_v25  ;;  %v2805_v35 = vpop.f32.mrf.mxu2  ;;  %v3250_v37 = vld [vmem:[#allocation2 + $0xc0] sm:$0xff] }
 0x260   :  { %v2853_v38 = vadd.f32 %v2805_v35, %v2597_v29  ;;  %6748 = vmatmul.msk.f32.gmra.mxu3 %vm2928_vm5, %v3250_v37  ;;  %3046 = vst.msk [vmem:[#allocation2 + $0xc8] sm:$0xff] %vm2928_vm5, %v3014_v31 }
 0x262   :  { %v2390_v39 = vpop.f32.mrf.mxu0  ;;  %v2888_v42 = vadd.f32 %v8006_v59, %v2853_v38 }
 0x263   :  { %v8239_v41 = vpop.f32.mrf.mxu3 }
 0x264   :  { %v2599_v40 = vpop.f32.mrf.mxu1  ;;  %v2920_v43 = vmax.f32 %v2888_v42, 0.0  ;;  %v3116_v42 = vld [vmem:[#allocation2 + $0x8c] sm:$0xff] }
 0x265   :  { %6769 = vmatmul.msk.f32.gmra.mxu0 %vm2928_vm5, %v3111_v25  ;;  %v2983_v46 = vld [vmem:[#allocation2 + $0xd2] sm:$0xff]  ;;  %v2600_v45 = vadd.f32 %v2599_v40, %v2390_v39 }
 0x266   :  { %2953 = vst.msk [vmem:[#allocation2 + $0xe0] sm:$0xff] %vm2928_vm5, %v2920_v43  ;;  %v3015_v47 = vmax.f32 %v2918_v14, %v2983_v46 }
 0x267   :  { %6801 = vmatmul.msk.f32.gmra.mxu1 %vm2928_vm5, %v3112_v44  ;;  %v2808_v48 = vpop.f32.mrf.mxu2  ;;  %v3251_v49 = vld [vmem:[#allocation2 + $0xc8] sm:$0xff] }
 0x268   :  { %v2854_v27 = vadd.f32 %v2808_v48, %v2600_v45  ;;  %6749 = vmatmul.msk.f32.gmra.mxu3 %vm2928_vm5, %v3251_v49  ;;  %3047 = vst.msk [vmem:[#allocation2 + $0xd0] sm:$0xff] %vm2928_vm5, %v3015_v47  ;;  %v4254_v48 = vld [vmem:[%s9639_s7 + $0x48] sm:$0xff] }
 0x269   :  { %v4246_v49 = vld [vmem:[%s9639_s7 + $0x8] sm:$0xff]  ;;  %4670 = vmatpush.msrb.mxu2 %v4254_v48 }
 0x26a   :  { %v2393_v52 = vpop.f32.mrf.mxu0  ;;  %v2889_v53 = vadd.f32 %v8006_v59, %v2854_v27  ;;  %v4264_v27 = vld [vmem:[%s9639_s7 + $0x98] sm:$0xff]  ;;  %4879 = vmatpush.msrb.mxu3 %v4246_v49  ;;  %v3120_v48 = vld [vmem:[#allocation2 + $0xac] sm:$0xff] }
 0x26b   :  { %v8247_v55 = vpop.f32.mrf.mxu3  ;;  %5086 = vmatpush.msrb.mxu0 %v4264_v27 }
 0x26c   :  { %v2602_v54 = vpop.f32.mrf.mxu1  ;;  %v2921_v56 = vmax.f32 %v2889_v53, 0.0 }
 0x26d   :  { %6770 = vmatmul.msk.f32.gmra.mxu0 %vm2928_vm5, %v3112_v44  ;;  %v2984_v58 = vld [vmem:[#allocation2 + $0xda] sm:$0xff]  ;;  %v2603_v61 = vadd.f32 %v2602_v54, %v2393_v52 }
 0x26e   :  { %2954 = vst.msk [vmem:[#allocation2 + $0xe8] sm:$0xff] %vm2928_vm5, %v2921_v56  ;;  %v3016_v62 = vmax.f32 %v2919_v24, %v2984_v58  ;;  %v3115_v24 = vld [vmem:[#allocation2 + $0x84] sm:$0xff]  ;;  %v3117_v58 = vld [vmem:[#allocation2 + $0x94] sm:$0xff] }
 0x26f   :  { %6802 = vmatmul.msk.f32.gmra.mxu1 %vm2928_vm5, %v3113_v57  ;;  %v2811_v63 = vpop.f32.mrf.mxu2  ;;  %v3252_v0 = vld [vmem:[#allocation2 + $0xd0] sm:$0xff] }
 0x270   :  { %v2855_v1 = vadd.f32 %v2811_v63, %v2603_v61  ;;  %6750 = vmatmul.msk.f32.gmra.mxu3 %vm2928_vm5, %v3252_v0  ;;  %3048 = vst.msk [vmem:[#allocation2 + $0xd8] sm:$0xff] %vm2928_vm5, %v3016_v62 }
 0x272   :  { %v2396_v2 = vpop.f32.mrf.mxu0  ;;  %v2890_v5 = vadd.f32 %v8006_v59, %v2855_v1 }
 0x273   :  { %v8255_v7 = vpop.f32.mrf.mxu3 }
 0x274   :  { %v2605_v6 = vpop.f32.mrf.mxu1  ;;  %v2922_v8 = vmax.f32 %v2890_v5, 0.0 }
 0x275   :  { %6771 = vmatmul.msk.f32.gmra.mxu0 %vm2928_vm5, %v3113_v57  ;;  %v2985_v14 = vld [vmem:[#allocation2 + $0xe2] sm:$0xff]  ;;  %v2606_v16 = vadd.f32 %v2605_v6, %v2396_v2 }
 0x276   :  { %2955 = vst.msk [vmem:[#allocation2 + $0xf0] sm:$0xff] %vm2928_vm5, %v2922_v8  ;;  %v3017_v17 = vmax.f32 %v2920_v43, %v2985_v14 }
 0x277   :  { %6803 = vmatmul.msk.f32.gmra.mxu1 %vm2928_vm5, %v3114_v10  ;;  %v2814_v18 = vpop.f32.mrf.mxu2  ;;  %v3253_v19 = vld [vmem:[#allocation2 + $0xd8] sm:$0xff] }
 0x278   :  { %v2856_v9 = vadd.f32 %v2814_v18, %v2606_v16  ;;  %6751 = vmatmul.msk.f32.gmra.mxu3 %vm2928_vm5, %v3253_v19  ;;  %3049 = vst.msk [vmem:[#allocation2 + $0xe0] sm:$0xff] %vm2928_vm5, %v3017_v17 }
 0x27a   :  { %v2399_v59 = vpop.f32.mrf.mxu0  ;;  %v2891_v15 = vadd.f32 %v8265_v11, %v2856_v9 }
 0x27b   :  { %v8268_v21 = vpop.f32.mrf.mxu3 }
 0x27c   :  { %v2608_v20 = vpop.f32.mrf.mxu1  ;;  %v2923_v22 = vmax.f32 %v2891_v15, 0.0 }
 0x27d   :  { %6772 = vmatmul.msk.f32.gmra.mxu0 %vm2928_vm5, %v3114_v10  ;;  %v2986_v25 = vld [vmem:[#allocation2 + $0xea] sm:$0xff]  ;;  %v2609_v26 = vadd.f32 %v2608_v20, %v2399_v59 }
 0x27e   :  { %2956 = vst.msk [vmem:[#allocation2 + $0xf8] sm:$0xff] %vm2928_vm5, %v2923_v22  ;;  %v3018_v29 = vmax.f32 %v2921_v56, %v2986_v25  ;;  %v4253_v25 = vld [vmem:[%s9639_s7 + $0x40] sm:$0xff] }
 0x27f   :  { %6804 = vmatmul.msk.f32.gmra.mxu1 %vm2928_vm5, %v3115_v24  ;;  %v2817_v31 = vpop.f32.mrf.mxu2  ;;  %v3254_v32 = vld [vmem:[#allocation2 + $0xe0] sm:$0xff]  ;;  %4671 = vmatpush.msrb.mxu2 %v4253_v25 }
 0x280   :  { %v2857_v33 = vadd.f32 %v2817_v31, %v2609_v26  ;;  %6752 = vmatmul.msk.f32.gmra.mxu3 %vm2928_vm5, %v3254_v32  ;;  %3050 = vst.msk [vmem:[#allocation2 + $0xe8] sm:$0xff] %vm2928_vm5, %v3018_v29 }
 0x282   :  { %v2402_v34 = vpop.f32.mrf.mxu0  ;;  %v2892_v35 = vadd.f32 %v8265_v11, %v2857_v33 }
 0x283   :  { %v8276_v38 = vpop.f32.mrf.mxu3 }
 0x284   :  { %v2611_v37 = vpop.f32.mrf.mxu1  ;;  %v2924_v39 = vmax.f32 %v2892_v35, 0.0 }
 0x285   :  { %6773 = vmatmul.msk.f32.gmra.mxu0 %vm2928_vm5, %v3115_v24  ;;  %v2987_v40 = vld [vmem:[#allocation2 + $0xf2] sm:$0xff]  ;;  %v2612_v43 = vadd.f32 %v2611_v37, %v2402_v34  ;;  %v8317_v24 = vld [vmem:[%s9638_s6] ss:$0 sm:$0xff] }
 0x286   :  { %2957 = vst.msk [vmem:[#allocation2 + $0x100] sm:$0xff] %vm2928_vm5, %v2924_v39  ;;  %v3019_v44 = vmax.f32 %v2922_v8, %v2987_v40  ;;  %v3118_v8 = vld [vmem:[#allocation2 + $0x9c] sm:$0xff]  ;;  %v4263_v40 = vld [vmem:[%s9639_s7 + $0x90] sm:$0xff] }
 0x287   :  { %6805 = vmatmul.msk.f32.gmra.mxu1 %vm2928_vm5, %v3116_v42  ;;  %v2820_v46 = vpop.f32.mrf.mxu2  ;;  %v3255_v45 = vld [vmem:[#allocation2 + $0xe8] sm:$0xff]  ;;  %v3374_v17 = vsel %vm3277_vm8, 0.0, %v3118_v8  ;;  %v3214_v28 = vsel %vm3086_vm9, 0.0, %v3118_v8  ;;  %v4245_v37 = vld [vmem:[%s9639_s7] sm:$0xff]  ;;  %5087 = vmatpush.msrb.mxu0 %v4263_v40 }
 0x288   :  { %v2858_v47 = vadd.f32 %v2820_v46, %v2612_v43  ;;  %6753 = vmatmul.msk.f32.gmra.mxu3 %vm2928_vm5, %v3255_v45  ;;  %3051 = vst.msk [vmem:[#allocation2 + $0xf0] sm:$0xff] %vm2928_vm5, %v3019_v44 }
 0x289   :  { %4880 = vmatpush.msrb.mxu3 %v4245_v37  ;;  %v5429_v37 = vld [vmem:[%s9641_s9 + $0x78] sm:$0xff] }
 0x28a   :  { %v2405_v52 = vpop.f32.mrf.mxu0  ;;  %v2893_v53 = vadd.f32 %v8265_v11, %v2858_v47  ;;  %5577 = vmatpush.msra.mxu1 %v5429_v37 }
 0x28b   :  { %v8293_v56 = vpop.f32.mrf.mxu3 }
 0x28c   :  { %v2614_v54 = vpop.f32.mrf.mxu1  ;;  %v2925_v57 = vmax.f32 %v2893_v53, 0.0 }
 0x28d   :  { %6774 = vmatmul.msk.f32.gmra.mxu0 %vm2928_vm5, %v3116_v42  ;;  %v2988_v61 = vld [vmem:[#allocation2 + $0xfa] sm:$0xff]  ;;  %v2615_v62 = vadd.f32 %v2614_v54, %v2405_v52 }
 0x28e   :  { %2958 = vst.msk [vmem:[#allocation2 + $0x108] sm:$0xff] %vm2928_vm5, %v2925_v57  ;;  %v3020_v63 = vmax.f32 %v2923_v22, %v2988_v61 }
 0x28f   :  { %6806 = vmatmul.msk.f32.gmra.mxu1 %vm2928_vm5, %v3117_v58  ;;  %v2823_v0 = vpop.f32.mrf.mxu2  ;;  %v3256_v1 = vld [vmem:[#allocation2 + $0xf0] sm:$0xff] }
 0x290   :  { %v2859_v2 = vadd.f32 %v2823_v0, %v2615_v62  ;;  %6754 = vmatmul.msk.f32.gmra.mxu3 %vm2928_vm5, %v3256_v1  ;;  %3052 = vst.msk [vmem:[#allocation2 + $0xf8] sm:$0xff] %vm2928_vm5, %v3020_v63  ;;  %v3121_v63 = vld [vmem:[#allocation2 + $0xb4] sm:$0xff] }
 0x292   :  { %v2408_v5 = vpop.f32.mrf.mxu0  ;;  %v2894_v6 = vadd.f32 %v8265_v11, %v2859_v2 }
 0x293   :  { %v8303_v14 = vpop.f32.mrf.mxu3 }
 0x294   :  { %v2617_v10 = vpop.f32.mrf.mxu1  ;;  %v2926_v16 = vmax.f32 %v2894_v6, 0.0 }
 0x295   :  { %6775 = vmatmul.msk.f32.gmra.mxu0 %vm2928_vm5, %v3117_v58  ;;  %v2989_v18 = vld [vmem:[#allocation2 + $0x102] sm:$0xff]  ;;  %v2618_v19 = vadd.f32 %v2617_v10, %v2408_v5 }
 0x296   :  { %2959 = vst.msk [vmem:[#allocation2 + $0x110] sm:$0xff] %vm2928_vm5, %v2926_v16  ;;  %v3021_v9 = vmax.f32 %v2924_v39, %v2989_v18  ;;  %v3122_v18 = vld [vmem:[#allocation2 + $0xbc] sm:$0xff] }
 0x297   :  { %6807 = vmatmul.msk.f32.gmra.mxu1 %vm2928_vm5, %v3374_v17  ;;  %v2826_v59 = vpop.f32.mrf.mxu2  ;;  %v3257_v15 = vld [vmem:[#allocation2 + $0xf8] sm:$0xff] }
 0x298   :  { %v2860_v20 = vadd.f32 %v2826_v59, %v2618_v19  ;;  %6755 = vmatmul.msk.f32.gmra.mxu3 %vm2928_vm5, %v3257_v15  ;;  %3053 = vst.msk [vmem:[#allocation2 + $0x100] sm:$0xff] %vm2928_vm5, %v3021_v9 }
 0x29a   :  { %v3713_v30 = vpop.f32.mrf.mxu0  ;;  %v2895_v36 = vadd.f32 %v8265_v11, %v2860_v20  ;;  %v3119_v11 = vld [vmem:[#allocation2 + $0xa4] sm:$0xff] }
 0x29b   :  { %v3714_v22 = vadd.f32 %v3713_v30, %v8198_v51  ;;  %v8322_v29 = vpop.f32.mrf.mxu3 }
 0x29c   :  { %v3922_v26 = vpop.f32.mrf.mxu1  ;;  %v2927_v50 = vmax.f32 %v2895_v36, 0.0  ;;  %v5421_v36 = vld [vmem:[%s9641_s9 + $0x38] sm:$0xff] }
 0x29d   :  { %v4018_v31 = vadd.f32 %v3922_v26, %v3714_v22  ;;  %6776 = vmatmul.msk.f32.gmra.mxu0 %vm2928_vm5, %v3214_v28  ;;  %v2990_v51 = vld [vmem:[#allocation2 + $0x10a] sm:$0xff]  ;;  %5696 = vmatpush.msra.mxu2 %v5421_v36 }
 0x29e   :  { %2960 = vst.msk [vmem:[#allocation2 + $0x118] sm:$0xff] %vm2928_vm5, %v2927_v50  ;;  %v3022_v33 = vmax.f32 %v2925_v57, %v2990_v51 }
 0x29f   :  { %v4053_v32 = vadd.f32 %v8317_v24, %v4018_v31  ;;  %6808 = vmatmul.msk.f32.gmra.mxu1 %vm2928_vm5, %v3119_v11  ;;  %v3258_v34 = vld [vmem:[#allocation2 + $0x100] sm:$0xff] }
 0x2a0   :  { %6756 = vmatmul.msk.f32.gmra.mxu3 %vm2928_vm5, %v3258_v34  ;;  %3054 = vst.msk [vmem:[#allocation2 + $0x108] sm:$0xff] %vm2928_vm5, %v3022_v33  ;;  %v5437_v34 = vld [vmem:[%s9641_s9 + $0xb8] sm:$0xff] }
 0x2a1   :  { %v4085_v35 = vmax.f32 %v4053_v32, 0.0  ;;  %5937 = vmatpush.msra.mxu3 %v5437_v34 }
 0x2a2   :  { %v3716_v39 = vpop.f32.mrf.mxu0 }
 0x2a3   :  { %4117 = vst.msk [vmem:[#allocation2 + $0x20] sm:$0xff] %vm51_vm1, %v4085_v35  ;;  %v3717_v42 = vadd.f32 %v3716_v39, %v8206_v60  ;;  %v8338_v44 = vpop.f32.mrf.mxu3 }
 0x2a4   :  { %v3925_v43 = vpop.f32.mrf.mxu1 }
 0x2a5   :  { %v4019_v46 = vadd.f32 %v3925_v43, %v3717_v42  ;;  %6777 = vmatmul.msk.f32.gmra.mxu0 %vm2928_vm5, %v3119_v11  ;;  %v2991_v45 = vld [vmem:[#allocation2 + $0x112] sm:$0xff]  ;;  %v2992_v47 = vld [vmem:[#allocation2 + $0x11a] sm:$0xff] }
 0x2a6   :  { %v3024_v49 = vmax.f32 %v2927_v50, %v2992_v47  ;;  %v3023_v60 = vmax.f32 %v2926_v16, %v2991_v45  ;;  %v3123_v50 = vld [vmem:[#allocation2 + $0xc4] sm:$0xff]  ;;  %v3124_v43 = vld [vmem:[#allocation2 + $0xcc] sm:$0xff] }
 0x2a7   :  { %v4054_v27 = vadd.f32 %v8317_v24, %v4019_v46  ;;  %6809 = vmatmul.msk.f32.gmra.mxu1 %vm2928_vm5, %v3120_v48  ;;  %v3259_v52 = vld [vmem:[#allocation2 + $0x108] sm:$0xff] }
 0x2a8   :  { %3056 = vst.msk [vmem:[#allocation2 + $0x118] sm:$0xff] %vm2928_vm5, %v3024_v49  ;;  %6757 = vmatmul.msk.f32.gmra.mxu3 %vm2928_vm5, %v3259_v52 }
 0x2a9   :  { %v4086_v53 = vmax.f32 %v4054_v27, 0.0  ;;  %3055 = vst.msk [vmem:[#allocation2 + $0x110] sm:$0xff] %vm2928_vm5, %v3023_v60 }
 0x2aa   :  { %v3719_v54 = vpop.f32.mrf.mxu0 }
 0x2ab   :  { %4118 = vst.msk [vmem:[#allocation2 + $0x28] sm:$0xff] %vm51_vm1, %v4086_v53  ;;  %v3720_v57 = vadd.f32 %v3719_v54, %v8214_v12  ;;  %v8348_v61 = vpop.f32.mrf.mxu3 }
 0x2ac   :  { %v3928_v58 = vpop.f32.mrf.mxu1 }
 0x2ad   :  { %v4020_v62 = vadd.f32 %v3928_v58, %v3720_v57  ;;  %6778 = vmatmul.msk.f32.gmra.mxu0 %vm2928_vm5, %v3120_v48  ;;  %v3125_v57 = vld [vmem:[#allocation2 + $0xd4] sm:$0xff] }
 0x2af   :  { %v4055_v0 = vadd.f32 %v8317_v24, %v4020_v62  ;;  %6810 = vmatmul.msk.f32.gmra.mxu1 %vm2928_vm5, %v3121_v63  ;;  %v3261_v59 = vld [vmem:[#allocation2 + $0x118] sm:$0xff] }
 0x2b0   :  { %v3260_v2 = vld [vmem:[#allocation2 + $0x110] sm:$0xff] }
 0x2b1   :  { %v4087_v1 = vmax.f32 %v4055_v0, 0.0  ;;  %6758 = vmatmul.msk.f32.gmra.mxu3 %vm2928_vm5, %v3260_v2 }
 0x2b2   :  { %v3722_v5 = vpop.f32.mrf.mxu0  ;;  %v4149_v6 = vld [vmem:[#allocation2 + $0x24] sm:$0xff] }
 0x2b3   :  { %4119 = vst.msk [vmem:[#allocation2 + $0x30] sm:$0xff] %vm51_vm1, %v4087_v1  ;;  %v3723_v12 = vadd.f32 %v3722_v5, %v8222_v23  ;;  %v4181_v8 = vmax.f32 %v4085_v35, %v4149_v6  ;;  %v8356_v16 = vpop.f32.mrf.mxu3  ;;  %v4262_v35 = vld [vmem:[%s9639_s7 + $0x88] sm:$0xff] }
 0x2b4   :  { %v3931_v10 = vpop.f32.mrf.mxu1  ;;  %5088 = vmatpush.msrb.mxu0 %v4262_v35  ;;  %v3128_v35 = vld [vmem:[#allocation2 + $0xec] sm:$0xff] }
 0x2b5   :  { %v4021_v17 = vadd.f32 %v3931_v10, %v3723_v12  ;;  %6779 = vmatmul.msk.f32.gmra.mxu0 %vm2928_vm5, %v3121_v63  ;;  %4213 = vst.msk [vmem:[#allocation2 + $0x20] sm:$0xff] %vm51_vm1, %v4181_v8  ;;  %v3126_v8 = vld [vmem:[#allocation2 + $0xdc] sm:$0xff] }
 0x2b7   :  { %v4056_v19 = vadd.f32 %v8317_v24, %v4021_v17  ;;  %6811 = vmatmul.msk.f32.gmra.mxu1 %vm2928_vm5, %v3122_v18 }
 0x2b9   :  { %v4088_v9 = vmax.f32 %v4056_v19, 0.0  ;;  %6759 = vmatmul.msk.f32.gmra.mxu3 %vm2928_vm5, %v3261_v59  ;;  %v5420_v59 = vld [vmem:[%s9641_s9 + $0x30] sm:$0xff] }
 0x2ba   :  { %v3725_v15 = vpop.f32.mrf.mxu0  ;;  %v4150_v23 = vld [vmem:[#allocation2 + $0x2c] sm:$0xff]  ;;  %5697 = vmatpush.msra.mxu2 %v5420_v59 }
 0x2bb   :  { %4120 = vst.msk [vmem:[#allocation2 + $0x38] sm:$0xff] %vm51_vm1, %v4088_v9  ;;  %v3726_v20 = vadd.f32 %v3725_v15, %v8239_v41  ;;  %v4182_v30 = vmax.f32 %v4086_v53, %v4150_v23  ;;  %v8368_v25 = vpop.f32.mrf.mxu3 }
 0x2bc   :  { %v3934_v22 = vpop.f32.mrf.mxu1  ;;  %v4303_v26 = vld [vmem:[#allocation2 + $0x20] sm:$0xff] }
 0x2bd   :  { %v4022_v28 = vadd.f32 %v3934_v22, %v3726_v20  ;;  %6780 = vmatmul.msk.f32.gmra.mxu0 %vm2928_vm5, %v3122_v18  ;;  %6824 = vmatmul.msk.f32.vlgmr.msrb.gmra.mxu2 %vm51_vm1, %v4303_v26  ;;  %4214 = vst.msk [vmem:[#allocation2 + $0x28] sm:$0xff] %vm51_vm1, %v4182_v30 }
 0x2bf   :  { %v4057_v41 = vadd.f32 %v8317_v24, %v4022_v28  ;;  %6812 = vmatmul.msk.f32.gmra.mxu1 %vm2928_vm5, %v3123_v50 }
 0x2c1   :  { %v4089_v31 = vmax.f32 %v4057_v41, 0.0  ;;  %4881 = vmatmul.f32.vlgmr.msrb.gmra.mxu3 %v7077_v3 }
 0x2c2   :  { %v3728_v11 = vpop.f32.mrf.mxu0  ;;  %v4151_v51 = vld [vmem:[#allocation2 + $0x34] sm:$0xff] }
 0x2c3   :  { %4121 = vst.msk [vmem:[#allocation2 + $0x40] sm:$0xff] %vm51_vm1, %v4089_v31  ;;  %v3729_v32 = vadd.f32 %v3728_v11, %v8247_v55  ;;  %v4183_v33 = vmax.f32 %v4087_v1, %v4151_v51  ;;  %v8387_v42 = vpop.f32.mrf.mxu3  ;;  %v4261_v11 = vld [vmem:[%s9639_s7 + $0x80] sm:$0xff]  ;;  %v5428_v51 = vld [vmem:[%s9641_s9 + $0x70] sm:$0xff] }
 0x2c4   :  { %v3937_v39 = vpop.f32.mrf.mxu1  ;;  %v8389_v40 = vld [vmem:[#allocation2 + $0x28] sm:$0xff]  ;;  %5089 = vmatpush.msrb.mxu0 %v4261_v11  ;;  %5578 = vmatpush.msra.mxu1 %v5428_v51 }
 0x2c5   :  { %v4023_v55 = vadd.f32 %v3937_v39, %v3729_v32  ;;  %6781 = vmatmul.msk.f32.gmra.mxu0 %vm2928_vm5, %v3123_v50  ;;  %6825 = vmatmul.msk.f32.gmra.mxu2 %vm51_vm1, %v8389_v40  ;;  %4215 = vst.msk [vmem:[#allocation2 + $0x30] sm:$0xff] %vm51_vm1, %v4183_v33 }
 0x2c7   :  { %v4058_v46 = vadd.f32 %v8317_v24, %v4023_v55  ;;  %6813 = vmatmul.msk.f32.gmra.mxu1 %vm2928_vm5, %v3124_v43 }
 0x2c9   :  { %v4090_v45 = vmax.f32 %v4058_v46, 0.0  ;;  %6856 = vmatmul.msk.f32.gmra.mxu3 %vm51_vm1, %v4303_v26 }
 0x2ca   :  { %v3731_v47 = vpop.f32.mrf.mxu0  ;;  %v4152_v48 = vld [vmem:[#allocation2 + $0x3c] sm:$0xff] }
 0x2cb   :  { %4122 = vst.msk [vmem:[#allocation2 + $0x48] sm:$0xff] %vm51_vm1, %v4090_v45  ;;  %v3732_v49 = vadd.f32 %v3731_v47, %v8255_v7  ;;  %v4184_v27 = vmax.f32 %v4088_v9, %v4152_v48  ;;  %v8400_v52 = vpop.f32.mrf.mxu3 }
 0x2cc   :  { %v3940_v60 = vpop.f32.mrf.mxu1  ;;  %v8402_v53 = vld [vmem:[#allocation2 + $0x30] sm:$0xff] }
 0x2cd   :  { %v4024_v54 = vadd.f32 %v3940_v60, %v3732_v49  ;;  %6782 = vmatmul.msk.f32.gmra.mxu0 %vm2928_vm5, %v3124_v43  ;;  %6826 = vmatmul.msk.f32.gmra.mxu2 %vm51_vm1, %v8402_v53  ;;  %4216 = vst.msk [vmem:[#allocation2 + $0x38] sm:$0xff] %vm51_vm1, %v4184_v27  ;;  %v3129_v60 = vld [vmem:[#allocation2 + $0xf4] sm:$0xff] }
 0x2cf   :  { %v4059_v58 = vadd.f32 %v8317_v24, %v4024_v54  ;;  %6814 = vmatmul.msk.f32.gmra.mxu1 %vm2928_vm5, %v3125_v57 }
 0x2d1   :  { %v4091_v7 = vmax.f32 %v4059_v58, 0.0  ;;  %6857 = vmatmul.msk.f32.gmra.mxu3 %vm51_vm1, %v8389_v40 }
 0x2d2   :  { %v3734_v62 = vpop.f32.mrf.mxu0  ;;  %v4153_v63 = vld [vmem:[#allocation2 + $0x44] sm:$0xff] }
 0x2d3   :  { %4123 = vst.msk [vmem:[#allocation2 + $0x50] sm:$0xff] %vm51_vm1, %v4091_v7  ;;  %v3735_v0 = vadd.f32 %v3734_v62, %v8268_v21  ;;  %v4185_v1 = vmax.f32 %v4089_v31, %v4153_v63  ;;  %v8414_v5 = vpop.f32.mrf.mxu3  ;;  %v5436_v31 = vld [vmem:[%s9641_s9 + $0xb0] sm:$0xff] }
 0x2d4   :  { %v3943_v2 = vpop.f32.mrf.mxu1  ;;  %v8416_v6 = vld [vmem:[#allocation2 + $0x38] sm:$0xff]  ;;  %5938 = vmatpush.msra.mxu3 %v5436_v31  ;;  %v5427_v31 = vld [vmem:[%s9641_s9 + $0x68] sm:$0xff] }
 0x2d5   :  { %v4025_v12 = vadd.f32 %v3943_v2, %v3735_v0  ;;  %6783 = vmatmul.msk.f32.gmra.mxu0 %vm2928_vm5, %v3125_v57  ;;  %6827 = vmatmul.msk.f32.gmra.mxu2 %vm51_vm1, %v8416_v6  ;;  %4217 = vst.msk [vmem:[#allocation2 + $0x40] sm:$0xff] %vm51_vm1, %v4185_v1 }
 0x2d6   :  { %5579 = vmatpush.msra.mxu1 %v5427_v31 }
 0x2d7   :  { %v4060_v10 = vadd.f32 %v8317_v24, %v4025_v12  ;;  %6815 = vmatmul.msk.f32.gmra.mxu1 %vm2928_vm5, %v3126_v8  ;;  %v3130_v12 = vld [vmem:[#allocation2 + $0xfc] sm:$0xff] }
 0x2d9   :  { %v4092_v21 = vmax.f32 %v4060_v10, 0.0  ;;  %6858 = vmatmul.msk.f32.gmra.mxu3 %vm51_vm1, %v8402_v53 }
 0x2da   :  { %v3737_v17 = vpop.f32.mrf.mxu0  ;;  %v4154_v18 = vld [vmem:[#allocation2 + $0x4c] sm:$0xff] }
 0x2db   :  { %4124 = vst.msk [vmem:[#allocation2 + $0x58] sm:$0xff] %vm51_vm1, %v4092_v21  ;;  %v3738_v19 = vadd.f32 %v3737_v17, %v8276_v38  ;;  %v4186_v9 = vmax.f32 %v4090_v45, %v4154_v18  ;;  %v8431_v23 = vpop.f32.mrf.mxu3  ;;  %v3127_v38 = vld [vmem:[#allocation2 + $0xe4] sm:$0xff] }
 0x2dc   :  { %v3946_v15 = vpop.f32.mrf.mxu1  ;;  %v8433_v20 = vld [vmem:[#allocation2 + $0x40] sm:$0xff] }
 0x2dd   :  { %v4026_v30 = vadd.f32 %v3946_v15, %v3738_v19  ;;  %6784 = vmatmul.msk.f32.gmra.mxu0 %vm2928_vm5, %v3126_v8  ;;  %6828 = vmatmul.msk.f32.gmra.mxu2 %vm51_vm1, %v8433_v20  ;;  %4218 = vst.msk [vmem:[#allocation2 + $0x48] sm:$0xff] %vm51_vm1, %v4186_v9  ;;  %v5419_v19 = vld [vmem:[%s9641_s9 + $0x28] sm:$0xff] }
 0x2de   :  { %5698 = vmatpush.msra.mxu2 %v5419_v19  ;;  %v5418_v19 = vld [vmem:[%s9641_s9 + $0x20] sm:$0xff] }
 0x2df   :  { %v4061_v36 = vadd.f32 %v8317_v24, %v4026_v30  ;;  %6816 = vmatmul.msk.f32.gmra.mxu1 %vm2928_vm5, %v3127_v38 }
 0x2e0   :  { %5699 = vmatpush.msra.mxu2 %v5418_v19 }
 0x2e1   :  { %v4093_v22 = vmax.f32 %v4061_v36, 0.0  ;;  %6859 = vmatmul.msk.f32.gmra.mxu3 %vm51_vm1, %v8416_v6 }
 0x2e2   :  { %v3740_v26 = vpop.f32.mrf.mxu0  ;;  %v4155_v28 = vld [vmem:[#allocation2 + $0x54] sm:$0xff] }
 0x2e3   :  { %4125 = vst.msk [vmem:[#allocation2 + $0x60] sm:$0xff] %vm51_vm1, %v4093_v22  ;;  %v3741_v50 = vadd.f32 %v3740_v26, %v8293_v56  ;;  %v4187_v41 = vmax.f32 %v4091_v7, %v4155_v28  ;;  %v8454_v33 = vpop.f32.mrf.mxu3 }
 0x2e4   :  { %v3949_v32 = vpop.f32.mrf.mxu1  ;;  %v8456_v34 = vld [vmem:[#allocation2 + $0x48] sm:$0xff] }
 0x2e5   :  { %v4027_v56 = vadd.f32 %v3949_v32, %v3741_v50  ;;  %6785 = vmatmul.msk.f32.gmra.mxu0 %vm2928_vm5, %v3127_v38  ;;  %6829 = vmatmul.msk.f32.gmra.mxu2 %vm51_vm1, %v8456_v34  ;;  %4219 = vst.msk [vmem:[#allocation2 + $0x50] sm:$0xff] %vm51_vm1, %v4187_v41  ;;  %v5435_v41 = vld [vmem:[%s9641_s9 + $0xa8] sm:$0xff] }
 0x2e6   :  { %5939 = vmatpush.msra.mxu3 %v5435_v41  ;;  %v5434_v41 = vld [vmem:[%s9641_s9 + $0xa0] sm:$0xff] }
 0x2e7   :  { %v4062_v37 = vadd.f32 %v8317_v24, %v4027_v56  ;;  %6817 = vmatmul.msk.f32.gmra.mxu1 %vm2928_vm5, %v3128_v35 }
 0x2e8   :  { %5940 = vmatpush.msra.mxu3 %v5434_v41 }
 0x2e9   :  { %v4094_v39 = vmax.f32 %v4062_v37, 0.0  ;;  %6860 = vmatmul.msk.f32.gmra.mxu3 %vm51_vm1, %v8433_v20 }
 0x2ea   :  { %v3743_v55 = vpop.f32.mrf.mxu0  ;;  %v4156_v43 = vld [vmem:[#allocation2 + $0x5c] sm:$0xff] }
 0x2eb   :  { %4126 = vst.msk [vmem:[#allocation2 + $0x68] sm:$0xff] %vm51_vm1, %v4094_v39  ;;  %v3744_v46 = vadd.f32 %v3743_v55, %v8303_v14  ;;  %v4188_v45 = vmax.f32 %v4092_v21, %v4156_v43  ;;  %v8468_v48 = vpop.f32.mrf.mxu3 }
 0x2ec   :  { %v3952_v47 = vpop.f32.mrf.mxu1  ;;  %v8470_v49 = vld [vmem:[#allocation2 + $0x50] sm:$0xff] }
 0x2ed   :  { %v4028_v27 = vadd.f32 %v3952_v47, %v3744_v46  ;;  %6786 = vmatmul.msk.f32.gmra.mxu0 %vm2928_vm5, %v3128_v35  ;;  %6830 = vmatmul.msk.f32.gmra.mxu2 %vm51_vm1, %v8470_v49  ;;  %4220 = vst.msk [vmem:[#allocation2 + $0x58] sm:$0xff] %vm51_vm1, %v4188_v45 }
 0x2ef   :  { %v4063_v54 = vadd.f32 %v8317_v24, %v4028_v27  ;;  %6818 = vmatmul.msk.f32.gmra.mxu1 %vm2928_vm5, %v3129_v60 }
 0x2f1   :  { %v4095_v14 = vmax.f32 %v4063_v54, 0.0  ;;  %6861 = vmatmul.msk.f32.gmra.mxu3 %vm51_vm1, %v8456_v34  ;;  %v3133_v54 = vld [vmem:[#allocation2 + $0x114] sm:$0xff] }
 0x2f2   :  { %v3746_v57 = vpop.f32.mrf.mxu0  ;;  %v4157_v58 = vld [vmem:[#allocation2 + $0x64] sm:$0xff] }
 0x2f3   :  { %4127 = vst.msk [vmem:[#allocation2 + $0x70] sm:$0xff] %vm51_vm1, %v4095_v14  ;;  %v3747_v7 = vadd.f32 %v3746_v57, %v8322_v29  ;;  %v4189_v62 = vmax.f32 %v4093_v22, %v4157_v58  ;;  %v8482_v0 = vpop.f32.mrf.mxu3 }
 0x2f4   :  { %v3955_v63 = vpop.f32.mrf.mxu1  ;;  %v8484_v1 = vld [vmem:[#allocation2 + $0x58] sm:$0xff] }
 0x2f5   :  { %v4029_v2 = vadd.f32 %v3955_v63, %v3747_v7  ;;  %6787 = vmatmul.msk.f32.gmra.mxu0 %vm2928_vm5, %v3129_v60  ;;  %6831 = vmatmul.msk.f32.gmra.mxu2 %vm51_vm1, %v8484_v1  ;;  %4221 = vst.msk [vmem:[#allocation2 + $0x60] sm:$0xff] %vm51_vm1, %v4189_v62  ;;  %v3294_v62 = vld [vmem:[#allocation2 + $0x11c] sm:$0xff] }
 0x2f7   :  { %v4064_v8 = vadd.f32 %v8317_v24, %v4029_v2  ;;  %6819 = vmatmul.msk.f32.gmra.mxu1 %vm2928_vm5, %v3130_v12 }
 0x2f9   :  { %v4096_v29 = vmax.f32 %v4064_v8, 0.0  ;;  %6862 = vmatmul.msk.f32.gmra.mxu3 %vm51_vm1, %v8470_v49 }
 0x2fa   :  { %v3749_v10 = vpop.f32.mrf.mxu0  ;;  %v4158_v21 = vld [vmem:[#allocation2 + $0x6c] sm:$0xff] }
 0x2fb   :  { %4128 = vst.msk [vmem:[#allocation2 + $0x78] sm:$0xff] %vm51_vm1, %v4096_v29  ;;  %v3750_v17 = vadd.f32 %v3749_v10, %v8338_v44  ;;  %v4190_v18 = vmax.f32 %v4094_v39, %v4158_v21  ;;  %v8499_v59 = vpop.f32.mrf.mxu3  ;;  %v3131_v44 = vld [vmem:[#allocation2 + $0x104] sm:$0xff]  ;;  %v3390_v10 = vsel %vm3293_vm10, 0.0, %v3294_v62 }
 0x2fc   :  { %v3958_v9 = vpop.f32.mrf.mxu1  ;;  %v8501_v15 = vld [vmem:[#allocation2 + $0x60] sm:$0xff] }
 0x2fd   :  { %v4030_v30 = vadd.f32 %v3958_v9, %v3750_v17  ;;  %6788 = vmatmul.msk.f32.gmra.mxu0 %vm2928_vm5, %v3130_v12  ;;  %6832 = vmatmul.msk.f32.gmra.mxu2 %vm51_vm1, %v8501_v15  ;;  %4222 = vst.msk [vmem:[#allocation2 + $0x68] sm:$0xff] %vm51_vm1, %v4190_v18 }
 0x2ff   :  { %v4065_v38 = vadd.f32 %v8317_v24, %v4030_v30  ;;  %6820 = vmatmul.msk.f32.gmra.mxu1 %vm2928_vm5, %v3131_v44 }
 0x301   :  { %v4097_v36 = vmax.f32 %v4065_v38, 0.0  ;;  %6863 = vmatmul.msk.f32.gmra.mxu3 %vm51_vm1, %v8484_v1 }
 0x302   :  { %v3752_v22 = vpop.f32.mrf.mxu0  ;;  %v4159_v26 = vld [vmem:[#allocation2 + $0x74] sm:$0xff] }
 0x303   :  { %4129 = vst.msk [vmem:[#allocation2 + $0x80] sm:$0xff] %vm51_vm1, %v4097_v36  ;;  %v3753_v28 = vadd.f32 %v3752_v22, %v8348_v61  ;;  %v4191_v50 = vmax.f32 %v4095_v14, %v4159_v26  ;;  %v8519_v51 = vpop.f32.mrf.mxu3  ;;  %v3132_v61 = vld [vmem:[#allocation2 + $0x10c] sm:$0xff] }
 0x304   :  { %v3961_v11 = vpop.f32.mrf.mxu1  ;;  %v8521_v32 = vld [vmem:[#allocation2 + $0x68] sm:$0xff] }
 0x305   :  { %v4031_v56 = vadd.f32 %v3961_v11, %v3753_v28  ;;  %6789 = vmatmul.msk.f32.gmra.mxu0 %vm2928_vm5, %v3131_v44  ;;  %6833 = vmatmul.msk.f32.gmra.mxu2 %vm51_vm1, %v8521_v32  ;;  %4223 = vst.msk [vmem:[#allocation2 + $0x70] sm:$0xff] %vm51_vm1, %v4191_v50 }
 0x307   :  { %v4066_v35 = vadd.f32 %v8317_v24, %v4031_v56  ;;  %6821 = vmatmul.msk.f32.gmra.mxu1 %vm2928_vm5, %v3132_v61 }
 0x309   :  { %v4098_v37 = vmax.f32 %v4066_v35, 0.0  ;;  %6864 = vmatmul.msk.f32.gmra.mxu3 %vm51_vm1, %v8501_v15 }
 0x30a   :  { %v3755_v39 = vpop.f32.mrf.mxu0  ;;  %v4160_v55 = vld [vmem:[#allocation2 + $0x7c] sm:$0xff] }
 0x30b   :  { %4130 = vst.msk [vmem:[#allocation2 + $0x88] sm:$0xff] %vm51_vm1, %v4098_v37  ;;  %v3756_v43 = vadd.f32 %v3755_v39, %v8356_v16  ;;  %v4192_v46 = vmax.f32 %v4096_v29, %v4160_v55  ;;  %v8533_v47 = vpop.f32.mrf.mxu3 }
 0x30c   :  { %v3964_v45 = vpop.f32.mrf.mxu1  ;;  %v8535_v27 = vld [vmem:[#allocation2 + $0x70] sm:$0xff] }
 0x30d   :  { %v4032_v60 = vadd.f32 %v3964_v45, %v3756_v43  ;;  %6790 = vmatmul.msk.f32.gmra.mxu0 %vm2928_vm5, %v3132_v61  ;;  %6834 = vmatmul.msk.f32.gmra.mxu2 %vm51_vm1, %v8535_v27  ;;  %4224 = vst.msk [vmem:[#allocation2 + $0x78] sm:$0xff] %vm51_vm1, %v4192_v46 }
 0x30f   :  { %v4067_v14 = vadd.f32 %v8317_v24, %v4032_v60  ;;  %6822 = vmatmul.msk.f32.gmra.mxu1 %vm2928_vm5, %v3133_v54 }
 0x311   :  { %v4099_v16 = vmax.f32 %v4067_v14, 0.0  ;;  %6865 = vmatmul.msk.f32.gmra.mxu3 %vm51_vm1, %v8521_v32 }
 0x312   :  { %v3758_v57 = vpop.f32.mrf.mxu0  ;;  %v4161_v58 = vld [vmem:[#allocation2 + $0x84] sm:$0xff] }
 0x313   :  { %4131 = vst.msk [vmem:[#allocation2 + $0x90] sm:$0xff] %vm51_vm1, %v4099_v16  ;;  %v3759_v7 = vadd.f32 %v3758_v57, %v8368_v25  ;;  %v4193_v63 = vmax.f32 %v4097_v36, %v4161_v58  ;;  %v8549_v12 = vpop.f32.mrf.mxu3 }
 0x314   :  { %v3967_v2 = vpop.f32.mrf.mxu1  ;;  %v8551_v8 = vld [vmem:[#allocation2 + $0x78] sm:$0xff] }
 0x315   :  { %v4033_v29 = vadd.f32 %v3967_v2, %v3759_v7  ;;  %6791 = vmatmul.msk.f32.gmra.mxu0 %vm2928_vm5, %v3133_v54  ;;  %6835 = vmatmul.msk.f32.gmra.mxu2 %vm51_vm1, %v8551_v8  ;;  %4225 = vst.msk [vmem:[#allocation2 + $0x80] sm:$0xff] %vm51_vm1, %v4193_v63 }
 0x317   :  { %v4068_v25 = vadd.f32 %v8317_v24, %v4033_v29  ;;  %6823 = vmatmul.msk.f32.gmra.mxu1 %vm2928_vm5, %v3390_v10 }
 0x319   :  { %v4100_v4 = vmax.f32 %v4068_v25, 0.0  ;;  %6866 = vmatmul.msk.f32.gmra.mxu3 %vm51_vm1, %v8535_v27 }
 0x31a   :  { %v3761_v13 = vpop.f32.mrf.mxu0  ;;  %v4162_v21 = vld [vmem:[#allocation2 + $0x8c] sm:$0xff] }
 0x31b   :  { %4132 = vst.msk [vmem:[#allocation2 + $0x98] sm:$0xff] %vm51_vm1, %v4100_v4  ;;  %v3762_v17 = vadd.f32 %v3761_v13, %v8387_v42  ;;  %v4194_v18 = vmax.f32 %v4098_v37, %v4162_v21  ;;  %v8566_v30 = vpop.f32.mrf.mxu3  ;;  %v5417_v13 = vld [vmem:[%s9641_s9 + $0x18] sm:$0xff] }
 0x31c   :  { %v3970_v9 = vpop.f32.mrf.mxu1  ;;  %v8568_v44 = vld [vmem:[#allocation2 + $0x80] sm:$0xff]  ;;  %5700 = vmatpush.msra.mxu2 %v5417_v13 }
 0x31d   :  { %v4034_v38 = vadd.f32 %v3970_v9, %v3762_v17  ;;  %6836 = vmatmul.msk.f32.gmra.mxu2 %vm51_vm1, %v8568_v44  ;;  %6886 = vmatmul.msk.f32.vlgmr.msrb.gmra.mxu0 %vm51_vm1, %v8389_v40  ;;  %4226 = vst.msk [vmem:[#allocation2 + $0x88] sm:$0xff] %vm51_vm1, %v4194_v18  ;;  %v5426_v40 = vld [vmem:[%s9641_s9 + $0x60] sm:$0xff] }
 0x31e   :  { %5580 = vmatpush.msra.mxu1 %v5426_v40 }
 0x31f   :  { %v4069_v42 = vadd.f32 %v8317_v24, %v4034_v38 }
 0x321   :  { %v4101_v36 = vmax.f32 %v4069_v42, 0.0  ;;  %6867 = vmatmul.msk.f32.gmra.mxu3 %vm51_vm1, %v8551_v8 }
 0x322   :  { %v3764_v22 = vpop.f32.mrf.mxu0  ;;  %v4163_v26 = vld [vmem:[#allocation2 + $0x94] sm:$0xff] }
 0x323   :  { %4133 = vst.msk [vmem:[#allocation2 + $0xa0] sm:$0xff] %vm51_vm1, %v4101_v36  ;;  %v3765_v28 = vadd.f32 %v3764_v22, %v8400_v52  ;;  %v4195_v50 = vmax.f32 %v4099_v16, %v4163_v26  ;;  %v8586_v11 = vpop.f32.mrf.mxu3  ;;  %v5425_v26 = vld [vmem:[%s9641_s9 + $0x58] sm:$0xff] }
 0x324   :  { %v3973_v31 = vpop.f32.mrf.mxu1  ;;  %v8588_v56 = vld [vmem:[#allocation2 + $0x88] sm:$0xff]  ;;  %5581 = vmatpush.msra.mxu1 %v5425_v26 }
 0x325   :  { %v4035_v61 = vadd.f32 %v3973_v31, %v3765_v28  ;;  %6837 = vmatmul.msk.f32.gmra.mxu2 %vm51_vm1, %v8588_v56  ;;  %6887 = vmatmul.msk.f32.gmra.mxu0 %vm51_vm1, %v8402_v53  ;;  %4227 = vst.msk [vmem:[#allocation2 + $0x90] sm:$0xff] %vm51_vm1, %v4195_v50 }
 0x327   :  { %v4070_v52 = vadd.f32 %v8317_v24, %v4035_v61 }
 0x329   :  { %v4102_v35 = vmax.f32 %v4070_v52, 0.0  ;;  %6868 = vmatmul.msk.f32.gmra.mxu3 %vm51_vm1, %v8568_v44 }
 0x32a   :  { %v3767_v37 = vpop.f32.mrf.mxu0  ;;  %v4164_v39 = vld [vmem:[#allocation2 + $0x9c] sm:$0xff] }
 0x32b   :  { %4134 = vst.msk [vmem:[#allocation2 + $0xa8] sm:$0xff] %vm51_vm1, %v4102_v35  ;;  %v3768_v55 = vadd.f32 %v3767_v37, %v8414_v5  ;;  %v4196_v43 = vmax.f32 %v4100_v4, %v4164_v39  ;;  %v8600_v45 = vpop.f32.mrf.mxu3 }
 0x32c   :  { %v3976_v46 = vpop.f32.mrf.mxu1  ;;  %v8602_v60 = vld [vmem:[#allocation2 + $0x90] sm:$0xff] }
 0x32d   :  { %v4036_v53 = vadd.f32 %v3976_v46, %v3768_v55  ;;  %6838 = vmatmul.msk.f32.gmra.mxu2 %vm51_vm1, %v8602_v60  ;;  %6888 = vmatmul.msk.f32.gmra.mxu0 %vm51_vm1, %v8416_v6  ;;  %4228 = vst.msk [vmem:[#allocation2 + $0x98] sm:$0xff] %vm51_vm1, %v4196_v43 }
 0x32f   :  { %v4071_v54 = vadd.f32 %v8317_v24, %v4036_v53 }
 0x331   :  { %v4103_v14 = vmax.f32 %v4071_v54, 0.0  ;;  %6869 = vmatmul.msk.f32.gmra.mxu3 %vm51_vm1, %v8588_v56 }
 0x332   :  { %v3770_v5 = vpop.f32.mrf.mxu0  ;;  %v4165_v16 = vld [vmem:[#allocation2 + $0xa4] sm:$0xff] }
 0x333   :  { %4135 = vst.msk [vmem:[#allocation2 + $0xb0] sm:$0xff] %vm51_vm1, %v4103_v14  ;;  %v3771_v57 = vadd.f32 %v3770_v5, %v8431_v23  ;;  %v4197_v58 = vmax.f32 %v4101_v36, %v4165_v16 }
 0x334   :  { %v3979_v7 = vpop.f32.mrf.mxu1  ;;  %v8614_v62 = vld [vmem:[#allocation2 + $0x98] sm:$0xff]  ;;  %v8616_v6 = vpop.f32.mrf.mxu3 }
 0x335   :  { %v4037_v63 = vadd.f32 %v3979_v7, %v3771_v57  ;;  %6839 = vmatmul.msk.f32.gmra.mxu2 %vm51_vm1, %v8614_v62  ;;  %6889 = vmatmul.msk.f32.gmra.mxu0 %vm51_vm1, %v8433_v20  ;;  %4229 = vst.msk [vmem:[#allocation2 + $0xa0] sm:$0xff] %vm51_vm1, %v4197_v58 }
 0x337   :  { %v4072_v2 = vadd.f32 %v8317_v24, %v4037_v63 }
 0x339   :  { %v4104_v29 = vmax.f32 %v4072_v2, 0.0  ;;  %6870 = vmatmul.msk.f32.gmra.mxu3 %vm51_vm1, %v8602_v60 }
 0x33a   :  { %v3773_v23 = vpop.f32.mrf.mxu0  ;;  %v4166_v10 = vld [vmem:[#allocation2 + $0xac] sm:$0xff] }
 0x33b   :  { %4136 = vst.msk [vmem:[#allocation2 + $0xb8] sm:$0xff] %vm51_vm1, %v4104_v29  ;;  %v3774_v25 = vadd.f32 %v3773_v23, %v8454_v33  ;;  %v4198_v4 = vmax.f32 %v4102_v35, %v4166_v10 }
 0x33c   :  { %v3982_v20 = vpop.f32.mrf.mxu1  ;;  %v4319_v21 = vld [vmem:[#allocation2 + $0xa0] sm:$0xff]  ;;  %v8631_v18 = vpop.f32.mrf.mxu3 }
 0x33d   :  { %v4038_v17 = vadd.f32 %v3982_v20, %v3774_v25  ;;  %6840 = vmatmul.msk.f32.gmra.mxu2 %vm51_vm1, %v4319_v21  ;;  %6890 = vmatmul.msk.f32.gmra.mxu0 %vm51_vm1, %v8456_v34  ;;  %4230 = vst.msk [vmem:[#allocation2 + $0xa8] sm:$0xff] %vm51_vm1, %v4198_v4  ;;  %v5433_v34 = vld [vmem:[%s9641_s9 + $0x98] sm:$0xff] }
 0x33e   :  { %5941 = vmatpush.msra.mxu3 %v5433_v34  ;;  %v5424_v34 = vld [vmem:[%s9641_s9 + $0x50] sm:$0xff] }
 0x33f   :  { %v4073_v33 = vadd.f32 %v8317_v24, %v4038_v17  ;;  %5582 = vmatpush.msra.mxu1 %v5424_v34 }
 0x340   :  { %v8638_v19 = vpop.f32.mrf.mxu2 }
 0x341   :  { %v4105_v9 = vmax.f32 %v4073_v33, 0.0  ;;  %4929 = vmatmul.f32.gmra.mxu3 %v7077_v3 }
 0x342   :  { %v3776_v38 = vpop.f32.mrf.mxu0  ;;  %v4167_v42 = vld [vmem:[#allocation2 + $0xb4] sm:$0xff] }
 0x343   :  { %4137 = vst.msk [vmem:[#allocation2 + $0xc0] sm:$0xff] %vm51_vm1, %v4105_v9  ;;  %v3777_v36 = vadd.f32 %v3776_v38, %v8468_v48  ;;  %v4199_v22 = vmax.f32 %v4103_v14, %v4167_v42 }
 0x344   :  { %v3985_v28 = vpop.f32.mrf.mxu1  ;;  %v8649_v50 = vld [vmem:[#allocation2 + $0xa8] sm:$0xff]  ;;  %v8651_v40 = vpop.f32.mrf.mxu3 }
 0x345   :  { %v4039_v41 = vadd.f32 %v3985_v28, %v3777_v36  ;;  %6841 = vmatmul.msk.f32.gmra.mxu2 %vm51_vm1, %v8649_v50  ;;  %6891 = vmatmul.msk.f32.gmra.mxu0 %vm51_vm1, %v8470_v49  ;;  %4231 = vst.msk [vmem:[#allocation2 + $0xb0] sm:$0xff] %vm51_vm1, %v4199_v22 }
 0x347   :  { %v4074_v48 = vadd.f32 %v8317_v24, %v4039_v41 }
 0x348   :  { %v8659_v31 = vpop.f32.mrf.mxu2 }
 0x349   :  { %v4106_v61 = vmax.f32 %v4074_v48, 0.0  ;;  %6871 = vmatmul.msk.f32.gmra.mxu3 %vm51_vm1, %v4319_v21 }
 0x34a   :  { %v3779_v52 = vpop.f32.mrf.mxu0  ;;  %v4168_v35 = vld [vmem:[#allocation2 + $0xbc] sm:$0xff] }
 0x34b   :  { %4138 = vst.msk [vmem:[#allocation2 + $0xc8] sm:$0xff] %vm51_vm1, %v4106_v61  ;;  %v3780_v37 = vadd.f32 %v3779_v52, %v8482_v0  ;;  %v4200_v39 = vmax.f32 %v4104_v29, %v4168_v35 }
 0x34c   :  { %v3988_v55 = vpop.f32.mrf.mxu1  ;;  %v8664_v43 = vld [vmem:[#allocation2 + $0xb0] sm:$0xff]  ;;  %v8666_v46 = vpop.f32.mrf.mxu3 }
 0x34d   :  { %v4040_v49 = vadd.f32 %v3988_v55, %v3780_v37  ;;  %6842 = vmatmul.msk.f32.gmra.mxu2 %vm51_vm1, %v8664_v43  ;;  %6892 = vmatmul.msk.f32.gmra.mxu0 %vm51_vm1, %v8484_v1  ;;  %4232 = vst.msk [vmem:[#allocation2 + $0xb8] sm:$0xff] %vm51_vm1, %v4200_v39 }
 0x34f   :  { %v4075_v53 = vadd.f32 %v8317_v24, %v4040_v49 }
 0x350   :  { %v8674_v54 = vpop.f32.mrf.mxu2 }
 0x351   :  { %v4107_v0 = vmax.f32 %v4075_v53, 0.0  ;;  %6872 = vmatmul.msk.f32.gmra.mxu3 %vm51_vm1, %v8649_v50 }
 0x352   :  { %v3782_v14 = vpop.f32.mrf.mxu0  ;;  %v4169_v5 = vld [vmem:[#allocation2 + $0xc4] sm:$0xff] }
 0x353   :  { %4139 = vst.msk [vmem:[#allocation2 + $0xd0] sm:$0xff] %vm51_vm1, %v4107_v0  ;;  %v3783_v16 = vadd.f32 %v3782_v14, %v8499_v59  ;;  %v4201_v57 = vmax.f32 %v4105_v9, %v4169_v5 }
 0x354   :  { %v3991_v58 = vpop.f32.mrf.mxu1  ;;  %v8680_v7 = vld [vmem:[#allocation2 + $0xb8] sm:$0xff]  ;;  %v8682_v63 = vpop.f32.mrf.mxu3 }
 0x355   :  { %v4041_v1 = vadd.f32 %v3991_v58, %v3783_v16  ;;  %6843 = vmatmul.msk.f32.gmra.mxu2 %vm51_vm1, %v8680_v7  ;;  %6893 = vmatmul.msk.f32.gmra.mxu0 %vm51_vm1, %v8501_v15  ;;  %4233 = vst.msk [vmem:[#allocation2 + $0xc0] sm:$0xff] %vm51_vm1, %v4201_v57  ;;  %v5416_v15 = vld [vmem:[%s9641_s9 + $0x10] sm:$0xff] }
 0x356   :  { %5701 = vmatpush.msra.mxu2 %v5416_v15 }
 0x357   :  { %v4076_v2 = vadd.f32 %v8317_v24, %v4041_v1 }
 0x358   :  { %v8690_v29 = vpop.f32.mrf.mxu2 }
 0x359   :  { %v4108_v59 = vmax.f32 %v4076_v2, 0.0  ;;  %6873 = vmatmul.msk.f32.gmra.mxu3 %vm51_vm1, %v8664_v43 }
 0x35a   :  { %v3785_v23 = vpop.f32.mrf.mxu0  ;;  %v4170_v10 = vld [vmem:[#allocation2 + $0xcc] sm:$0xff] }
 0x35b   :  { %4140 = vst.msk [vmem:[#allocation2 + $0xd8] sm:$0xff] %vm51_vm1, %v4108_v59  ;;  %v3786_v25 = vadd.f32 %v3785_v23, %v8519_v51  ;;  %v4202_v4 = vmax.f32 %v4106_v61, %v4170_v10 }
 0x35c   :  { %v3994_v13 = vpop.f32.mrf.mxu1  ;;  %v8699_v20 = vld [vmem:[#allocation2 + $0xc0] sm:$0xff]  ;;  %v8701_v17 = vpop.f32.mrf.mxu3 }
 0x35d   :  { %v4042_v21 = vadd.f32 %v3994_v13, %v3786_v25  ;;  %6844 = vmatmul.msk.f32.gmra.mxu2 %vm51_vm1, %v8699_v20  ;;  %6894 = vmatmul.msk.f32.gmra.mxu0 %vm51_vm1, %v8521_v32  ;;  %4234 = vst.msk [vmem:[#allocation2 + $0xc8] sm:$0xff] %vm51_vm1, %v4202_v4  ;;  %v5432_v32 = vld [vmem:[%s9641_s9 + $0x90] sm:$0xff] }
 0x35e   :  { %5942 = vmatpush.msra.mxu3 %v5432_v32 }
 0x35f   :  { %v4077_v51 = vadd.f32 %v8317_v24, %v4042_v21 }
 0x360   :  { %v8709_v33 = vpop.f32.mrf.mxu2 }
 0x361   :  { %v4109_v9 = vmax.f32 %v4077_v51, 0.0  ;;  %6874 = vmatmul.msk.f32.gmra.mxu3 %vm51_vm1, %v8680_v7 }
 0x362   :  { %v3788_v38 = vpop.f32.mrf.mxu0  ;;  %v4171_v42 = vld [vmem:[#allocation2 + $0xd4] sm:$0xff] }
 0x363   :  { %4141 = vst.msk [vmem:[#allocation2 + $0xe0] sm:$0xff] %vm51_vm1, %v4109_v9  ;;  %v3789_v36 = vadd.f32 %v3788_v38, %v8533_v47  ;;  %v4203_v22 = vmax.f32 %v4107_v0, %v4171_v42 }
 0x364   :  { %v3997_v26 = vpop.f32.mrf.mxu1  ;;  %v8721_v28 = vld [vmem:[#allocation2 + $0xc8] sm:$0xff]  ;;  %v8723_v48 = vpop.f32.mrf.mxu3 }
 0x365   :  { %v4043_v41 = vadd.f32 %v3997_v26, %v3789_v36  ;;  %6845 = vmatmul.msk.f32.gmra.mxu2 %vm51_vm1, %v8721_v28  ;;  %6895 = vmatmul.msk.f32.gmra.mxu0 %vm51_vm1, %v8535_v27  ;;  %4235 = vst.msk [vmem:[#allocation2 + $0xd0] sm:$0xff] %vm51_vm1, %v4203_v22 }
 0x367   :  { %v4078_v47 = vadd.f32 %v8317_v24, %v4043_v41 }
 0x368   :  { %v8731_v61 = vpop.f32.mrf.mxu2 }
 0x369   :  { %v4110_v52 = vmax.f32 %v4078_v47, 0.0  ;;  %6875 = vmatmul.msk.f32.gmra.mxu3 %vm51_vm1, %v8699_v20 }
 0x36a   :  { %v3791_v35 = vpop.f32.mrf.mxu0  ;;  %v4172_v37 = vld [vmem:[#allocation2 + $0xdc] sm:$0xff] }
 0x36b   :  { %4142 = vst.msk [vmem:[#allocation2 + $0xe8] sm:$0xff] %vm51_vm1, %v4110_v52  ;;  %v3792_v39 = vadd.f32 %v3791_v35, %v8549_v12  ;;  %v4204_v55 = vmax.f32 %v4108_v59, %v4172_v37  ;;  %v5415_v35 = vld [vmem:[%s9641_s9 + $0x8] sm:$0xff] }
 0x36c   :  { %v4000_v49 = vpop.f32.mrf.mxu1  ;;  %v8737_v53 = vld [vmem:[#allocation2 + $0xd0] sm:$0xff]  ;;  %v8739_v0 = vpop.f32.mrf.mxu3  ;;  %v5423_v37 = vld [vmem:[%s9641_s9 + $0x48] sm:$0xff]  ;;  %5702 = vmatpush.msra.mxu2 %v5415_v35 }
 0x36d   :  { %v4044_v27 = vadd.f32 %v4000_v49, %v3792_v39  ;;  %6846 = vmatmul.msk.f32.gmra.mxu2 %vm51_vm1, %v8737_v53  ;;  %6896 = vmatmul.msk.f32.gmra.mxu0 %vm51_vm1, %v8551_v8  ;;  %4236 = vst.msk [vmem:[#allocation2 + $0xd8] sm:$0xff] %vm51_vm1, %v4204_v55 }
 0x36e   :  { %5583 = vmatpush.msra.mxu1 %v5423_v37  ;;  %v4886_v37 = vadd.f32 %v8666_v46, %v8659_v31 }
 0x36f   :  { %v4079_v14 = vadd.f32 %v8317_v24, %v4044_v27 }
 0x370   :  { %v8747_v5 = vpop.f32.mrf.mxu2 }
 0x371   :  { %v4111_v12 = vmax.f32 %v4079_v14, 0.0  ;;  %6876 = vmatmul.msk.f32.gmra.mxu3 %vm51_vm1, %v8721_v28 }
 0x372   :  { %v3794_v16 = vpop.f32.mrf.mxu0  ;;  %v4173_v57 = vld [vmem:[#allocation2 + $0xe4] sm:$0xff] }
 0x373   :  { %4143 = vst.msk [vmem:[#allocation2 + $0xf0] sm:$0xff] %vm51_vm1, %v4111_v12  ;;  %v3795_v58 = vadd.f32 %v3794_v16, %v8566_v30  ;;  %v4205_v1 = vmax.f32 %v4109_v9, %v4173_v57 }
 0x374   :  { %v4003_v2 = vpop.f32.mrf.mxu1  ;;  %v8753_v59 = vld [vmem:[#allocation2 + $0xd8] sm:$0xff]  ;;  %v8755_v23 = vpop.f32.mrf.mxu3 }
 0x375   :  { %v4045_v8 = vadd.f32 %v4003_v2, %v3795_v58  ;;  %6847 = vmatmul.msk.f32.gmra.mxu2 %vm51_vm1, %v8753_v59  ;;  %6897 = vmatmul.msk.f32.gmra.mxu0 %vm51_vm1, %v8568_v44  ;;  %4237 = vst.msk [vmem:[#allocation2 + $0xe0] sm:$0xff] %vm51_vm1, %v4205_v1 }
 0x377   :  { %v4080_v10 = vadd.f32 %v8317_v24, %v4045_v8  ;;  %v7049_v24 = vld [vmem:[%s9638_s6] ss:$0 sm:$0xff] }
 0x378   :  { %v8763_v25 = vpop.f32.mrf.mxu2 }
 0x379   :  { %v4112_v30 = vmax.f32 %v4080_v10, 0.0  ;;  %6877 = vmatmul.msk.f32.gmra.mxu3 %vm51_vm1, %v8737_v53 }
 0x37a   :  { %v3797_v4 = vpop.f32.mrf.mxu0  ;;  %v4174_v15 = vld [vmem:[#allocation2 + $0xec] sm:$0xff] }
 0x37b   :  { %4144 = vst.msk [vmem:[#allocation2 + $0xf8] sm:$0xff] %vm51_vm1, %v4112_v30  ;;  %v3798_v13 = vadd.f32 %v3797_v4, %v8586_v11  ;;  %v4206_v21 = vmax.f32 %v4110_v52, %v4174_v15 }
 0x37c   :  { %v4006_v51 = vpop.f32.mrf.mxu1  ;;  %v8769_v9 = vld [vmem:[#allocation2 + $0xe0] sm:$0xff]  ;;  %v8771_v38 = vpop.f32.mrf.mxu3 }
 0x37d   :  { %v4046_v44 = vadd.f32 %v4006_v51, %v3798_v13  ;;  %6848 = vmatmul.msk.f32.gmra.mxu2 %vm51_vm1, %v8769_v9  ;;  %6898 = vmatmul.msk.f32.gmra.mxu0 %vm51_vm1, %v8588_v56  ;;  %4238 = vst.msk [vmem:[#allocation2 + $0xe8] sm:$0xff] %vm51_vm1, %v4206_v21 }
 0x37f   :  { %v4081_v11 = vadd.f32 %v7049_v24, %v4046_v44 }
 0x380   :  { %v8781_v42 = vpop.f32.mrf.mxu2 }
 0x381   :  { %v4113_v36 = vmax.f32 %v4081_v11, 0.0  ;;  %6878 = vmatmul.msk.f32.gmra.mxu3 %vm51_vm1, %v8753_v59 }
 0x382   :  { %v3800_v22 = vpop.f32.mrf.mxu0  ;;  %v4175_v32 = vld [vmem:[#allocation2 + $0xf4] sm:$0xff] }
 0x383   :  { %4145 = vst.msk [vmem:[#allocation2 + $0x100] sm:$0xff] %vm51_vm1, %v4113_v36  ;;  %v3801_v34 = vadd.f32 %v3800_v22, %v8600_v45  ;;  %v4207_v56 = vmax.f32 %v4111_v12, %v4175_v32  ;;  %v5431_v45 = vld [vmem:[%s9641_s9 + $0x88] sm:$0xff]  ;;  %v8841_v22 = vld [vmem:[%s9640_s8] ss:$0 sm:$0xff] }
 0x384   :  { %v4009_v26 = vpop.f32.mrf.mxu1  ;;  %v8787_v41 = vld [vmem:[#allocation2 + $0xe8] sm:$0xff]  ;;  %v8789_v52 = vpop.f32.mrf.mxu3  ;;  %5943 = vmatpush.msra.mxu3 %v5431_v45 }
 0x385   :  { %v4047_v47 = vadd.f32 %v4009_v26, %v3801_v34  ;;  %6849 = vmatmul.msk.f32.gmra.mxu2 %vm51_vm1, %v8787_v41  ;;  %6899 = vmatmul.msk.f32.gmra.mxu0 %vm51_vm1, %v8602_v60  ;;  %4239 = vst.msk [vmem:[#allocation2 + $0xf0] sm:$0xff] %vm51_vm1, %v4207_v56 }
 0x387   :  { %v4082_v39 = vadd.f32 %v7049_v24, %v4047_v47 }
 0x388   :  { %v8805_v55 = vpop.f32.mrf.mxu2 }
 0x389   :  { %v4114_v60 = vmax.f32 %v4082_v39, 0.0  ;;  %6879 = vmatmul.msk.f32.gmra.mxu3 %vm51_vm1, %v8769_v9 }
 0x38a   :  { %v3803_v49 = vpop.f32.mrf.mxu0  ;;  %v4176_v27 = vld [vmem:[#allocation2 + $0xfc] sm:$0xff] }
 0x38b   :  { %4146 = vst.msk [vmem:[#allocation2 + $0x108] sm:$0xff] %vm51_vm1, %v4114_v60  ;;  %v3804_v14 = vadd.f32 %v3803_v49, %v8616_v6  ;;  %v4208_v12 = vmax.f32 %v4112_v30, %v4176_v27 }
 0x38c   :  { %v4012_v16 = vpop.f32.mrf.mxu1  ;;  %v8811_v57 = vld [vmem:[#allocation2 + $0xf0] sm:$0xff]  ;;  %v8813_v1 = vpop.f32.mrf.mxu3 }
 0x38d   :  { %v4048_v58 = vadd.f32 %v4012_v16, %v3804_v14  ;;  %6850 = vmatmul.msk.f32.gmra.mxu2 %vm51_vm1, %v8811_v57  ;;  %6900 = vmatmul.msk.f32.gmra.mxu0 %vm51_vm1, %v8614_v62  ;;  %4240 = vst.msk [vmem:[#allocation2 + $0xf8] sm:$0xff] %vm51_vm1, %v4208_v12 }
 0x38f   :  { %v4083_v2 = vadd.f32 %v7049_v24, %v4048_v58 }
 0x390   :  { %v8820_v8 = vpop.f32.mrf.mxu2 }
 0x391   :  { %v4115_v10 = vmax.f32 %v4083_v2, 0.0  ;;  %6880 = vmatmul.msk.f32.gmra.mxu3 %vm51_vm1, %v8787_v41  ;;  %v5430_v2 = vld [vmem:[%s9641_s9 + $0x80] sm:$0xff] }
 0x392   :  { %v3806_v6 = vpop.f32.mrf.mxu0  ;;  %v4177_v30 = vld [vmem:[#allocation2 + $0x104] sm:$0xff]  ;;  %5944 = vmatpush.msra.mxu3 %v5430_v2 }
 0x393   :  { %4147 = vst.msk [vmem:[#allocation2 + $0x110] sm:$0xff] %vm51_vm1, %v4115_v10  ;;  %v3807_v4 = vadd.f32 %v3806_v6, %v8631_v18  ;;  %v4209_v15 = vmax.f32 %v4113_v36, %v4177_v30  ;;  %v4883_v18 = vadd.f32 %v8651_v40, %v8638_v19  ;;  %v5414_v40 = vld [vmem:[%s9641_s9] sm:$0xff]  ;;  %v4889_v6 = vadd.f32 %v8682_v63, %v8674_v54 }
 0x394   :  { %v4015_v13 = vpop.f32.mrf.mxu1  ;;  %v8826_v21 = vld [vmem:[#allocation2 + $0xf8] sm:$0xff]  ;;  %v8828_v51 = vpop.f32.mrf.mxu3  ;;  %5703 = vmatpush.msra.mxu2 %v5414_v40 }
 0x395   :  { %v4049_v62 = vadd.f32 %v4015_v13, %v3807_v4  ;;  %6851 = vmatmul.msk.f32.gmra.mxu2 %vm51_vm1, %v8826_v21  ;;  %5135 = vmatmul.f32.gmra.mxu0 %v7077_v3  ;;  %4241 = vst.msk [vmem:[#allocation2 + $0x100] sm:$0xff] %vm51_vm1, %v4209_v15 }
 0x397   :  { %v4084_v44 = vadd.f32 %v7049_v24, %v4049_v62 }
 0x398   :  { %v8834_v11 = vpop.f32.mrf.mxu2 }
 0x399   :  { %v4116_v36 = vmax.f32 %v4084_v44, 0.0  ;;  %6881 = vmatmul.msk.f32.gmra.mxu3 %vm51_vm1, %v8811_v57  ;;  %v4892_v44 = vadd.f32 %v8701_v17, %v8690_v29 }
 0x39a   :  { %v5091_v32 = vpop.f32.mrf.mxu0  ;;  %v4178_v34 = vld [vmem:[#allocation2 + $0x10c] sm:$0xff] }
 0x39b   :  { %4148 = vst.msk [vmem:[#allocation2 + $0x118] sm:$0xff] %vm51_vm1, %v4116_v36  ;;  %v5187_v56 = vadd.f32 %v5091_v32, %v4883_v18  ;;  %v4210_v24 = vmax.f32 %v4114_v60, %v4178_v34 }
 0x39c   :  { %v8846_v26 = vld [vmem:[#allocation2 + $0x100] sm:$0xff]  ;;  %v8849_v19 = vpop.f32.mrf.mxu3 }
 0x39d   :  { %v5222_v47 = vadd.f32 %v8841_v22, %v5187_v56  ;;  %6852 = vmatmul.msk.f32.gmra.mxu2 %vm51_vm1, %v8846_v26  ;;  %6901 = vmatmul.msk.f32.gmra.mxu0 %vm51_vm1, %v8649_v50  ;;  %4242 = vst.msk [vmem:[#allocation2 + $0x108] sm:$0xff] %vm51_vm1, %v4210_v24 }
 0x39f   :  { %v5254_v35 = vmax.f32 %v5222_v47, 0.0  ;;  %v4895_v47 = vadd.f32 %v8723_v48, %v8709_v33 }
 0x3a0   :  { %v8859_v45 = vpop.f32.mrf.mxu2 }
 0x3a1   :  { %5286 = vst.msk [vmem:[#allocation2 + $0x20] sm:$0xff] %vm51_vm1, %v5254_v35  ;;  %6882 = vmatmul.msk.f32.gmra.mxu3 %vm51_vm1, %v8826_v21 }
 0x3a2   :  { %v4179_v39 = vld [vmem:[#allocation2 + $0x114] sm:$0xff]  ;;  %v4180_v60 = vld [vmem:[#allocation2 + $0x11c] sm:$0xff]  ;;  %v5094_v50 = vpop.f32.mrf.mxu0 }
 0x3a3   :  { %v4211_v49 = vmax.f32 %v4115_v10, %v4179_v39  ;;  %v4212_v27 = vmax.f32 %v4116_v36, %v4180_v60  ;;  %v5188_v14 = vadd.f32 %v5094_v50, %v4886_v37  ;;  %v5422_v10 = vld [vmem:[%s9641_s9 + $0x40] sm:$0xff] }
 0x3a4   :  { %v8866_v12 = vld [vmem:[#allocation2 + $0x108] sm:$0xff]  ;;  %v8870_v58 = vpop.f32.mrf.mxu3  ;;  %5584 = vmatpush.msra.mxu1 %v5422_v10 }
 0x3a5   :  { %4244 = vst.msk [vmem:[#allocation2 + $0x118] sm:$0xff] %vm51_vm1, %v4212_v27  ;;  %v5223_v16 = vadd.f32 %v8841_v22, %v5188_v14  ;;  %6853 = vmatmul.msk.f32.gmra.mxu2 %vm51_vm1, %v8866_v12  ;;  %6902 = vmatmul.msk.f32.gmra.mxu0 %vm51_vm1, %v8664_v43 }
 0x3a6   :  { %4243 = vst.msk [vmem:[#allocation2 + $0x110] sm:$0xff] %vm51_vm1, %v4211_v49  ;;  %v4898_v49 = vadd.f32 %v8739_v0, %v8731_v61  ;;  %v4901_v0 = vadd.f32 %v8755_v23, %v8747_v5 }
 0x3a7   :  { %v5255_v31 = vmax.f32 %v5223_v16, 0.0 }
 0x3a8   :  { %v8877_v46 = vpop.f32.mrf.mxu2 }
 0x3a9   :  { %5287 = vst.msk [vmem:[#allocation2 + $0x28] sm:$0xff] %vm51_vm1, %v5255_v31  ;;  %6883 = vmatmul.msk.f32.gmra.mxu3 %vm51_vm1, %v8846_v26 }
 0x3aa   :  { %v5097_v43 = vpop.f32.mrf.mxu0 }
 0x3ab   :  { %v5189_v30 = vadd.f32 %v5097_v43, %v4889_v6 }
 0x3ac   :  { %v8891_v15 = vpop.f32.mrf.mxu3  ;;  %v8910_v56 = vld [vmem:[#allocation2 + $0x118] sm:$0xff] }
 0x3ad   :  { %v5224_v4 = vadd.f32 %v8841_v22, %v5189_v30  ;;  %v8893_v13 = vld [vmem:[#allocation2 + $0x110] sm:$0xff]  ;;  %6903 = vmatmul.msk.f32.gmra.mxu0 %vm51_vm1, %v8680_v7 }
 0x3ae   :  { %6854 = vmatmul.msk.f32.gmra.mxu2 %vm51_vm1, %v8893_v13 }
 0x3af   :  { %v5256_v54 = vmax.f32 %v5224_v4, 0.0 }
 0x3b0   :  { %v8899_v63 = vpop.f32.mrf.mxu2  ;;  %v5318_v62 = vld [vmem:[#allocation2 + $0x28] sm:$0xff] }
 0x3b1   :  { %5288 = vst.msk [vmem:[#allocation2 + $0x30] sm:$0xff] %vm51_vm1, %v5256_v54  ;;  %v5350_v18 = vmax.f32 %v5254_v35, %v5318_v62  ;;  %6884 = vmatmul.msk.f32.gmra.mxu3 %vm51_vm1, %v8866_v12 }
 0x3b2   :  { %v5100_v36 = vpop.f32.mrf.mxu0 }
 0x3b3   :  { %v5190_v32 = vadd.f32 %v5100_v36, %v4892_v44  ;;  %5382 = vst.msk [vmem:[#allocation2 + $0x20] sm:$0xff] %vm51_vm1, %v5350_v18  ;;  %v4904_v18 = vadd.f32 %v8771_v38, %v8763_v25 }
 0x3b4   :  { %v8908_v34 = vpop.f32.mrf.mxu3 }
 0x3b5   :  { %v5225_v7 = vadd.f32 %v8841_v22, %v5190_v32  ;;  %6904 = vmatmul.msk.f32.gmra.mxu0 %vm51_vm1, %v8699_v20 }
 0x3b6   :  { %6855 = vmatmul.msk.f32.gmra.mxu2 %vm51_vm1, %v8910_v56 }
 0x3b7   :  { %v5257_v29 = vmax.f32 %v5225_v7, 0.0 }
 0x3b8   :  { %v5319_v17 = vld [vmem:[#allocation2 + $0x30] sm:$0xff]  ;;  %v8916_v24 = vpop.f32.mrf.mxu2 }
 0x3b9   :  { %5289 = vst.msk [vmem:[#allocation2 + $0x38] sm:$0xff] %vm51_vm1, %v5257_v29  ;;  %v5351_v40 = vmax.f32 %v5255_v31, %v5319_v17  ;;  %6885 = vmatmul.msk.f32.gmra.mxu3 %vm51_vm1, %v8893_v13 }
 0x3ba   :  { %v5103_v35 = vpop.f32.mrf.mxu0  ;;  %v5439_v60 = vld [vmem:[#allocation2 + $0x20] sm:$0xff] }
 0x3bb   :  { %v5191_v37 = vadd.f32 %v5103_v35, %v4895_v47  ;;  %5383 = vst.msk [vmem:[#allocation2 + $0x28] sm:$0xff] %vm51_vm1, %v5351_v40  ;;  %v4907_v40 = vadd.f32 %v8789_v52, %v8781_v42 }
 0x3bc   :  { %v8925_v39 = vpop.f32.mrf.mxu3 }
 0x3bd   :  { %v5226_v20 = vadd.f32 %v8841_v22, %v5191_v37  ;;  %6905 = vmatmul.msk.f32.gmra.mxu0 %vm51_vm1, %v8721_v28 }
 0x3be   :  { %6948 = vmatmul.msk.f32.vlgmr.msra.gmra.mxu2 %vm51_vm1, %v5439_v60 }
 0x3bf   :  { %v5258_v33 = vmax.f32 %v5226_v20, 0.0 }
 0x3c0   :  { %v5320_v48 = vld [vmem:[#allocation2 + $0x38] sm:$0xff]  ;;  %v8930_v50 = vpop.f32.mrf.mxu2 }
 0x3c1   :  { %v5352_v27 = vmax.f32 %v5256_v54, %v5320_v48  ;;  %5290 = vst.msk [vmem:[#allocation2 + $0x40] sm:$0xff] %vm51_vm1, %v5258_v33 }
 0x3c2   :  { %v5106_v14 = vpop.f32.mrf.mxu0  ;;  %v5440_v2 = vld [vmem:[#allocation2 + $0x28] sm:$0xff] }
 0x3c3   :  { %5384 = vst.msk [vmem:[#allocation2 + $0x30] sm:$0xff] %vm51_vm1, %v5352_v27  ;;  %v5192_v16 = vadd.f32 %v5106_v14, %v4898_v49  ;;  %v4910_v49 = vadd.f32 %v8813_v1, %v8805_v55 }
 0x3c4   :  { %v8937_v28 = vpop.f32.mrf.mxu3 }
 0x3c5   :  { %v5227_v31 = vadd.f32 %v8841_v22, %v5192_v16  ;;  %6906 = vmatmul.msk.f32.gmra.mxu0 %vm51_vm1, %v8737_v53 }
 0x3c6   :  { %6949 = vmatmul.msk.f32.gmra.mxu2 %vm51_vm1, %v5440_v2 }
 0x3c7   :  { %v5259_v10 = vmax.f32 %v5227_v31, 0.0 }
 0x3c8   :  { %v5321_v6 = vld [vmem:[#allocation2 + $0x40] sm:$0xff]  ;;  %v8942_v61 = vpop.f32.mrf.mxu2 }
 0x3c9   :  { %5291 = vst.msk [vmem:[#allocation2 + $0x48] sm:$0xff] %vm51_vm1, %v5259_v10  ;;  %v5353_v43 = vmax.f32 %v5257_v29, %v5321_v6  ;;  %v4913_v6 = vadd.f32 %v8828_v51, %v8820_v8 }
 0x3ca   :  { %v5109_v30 = vpop.f32.mrf.mxu0  ;;  %v5441_v4 = vld [vmem:[#allocation2 + $0x30] sm:$0xff] }
 0x3cb   :  { %v5193_v54 = vadd.f32 %v5109_v30, %v4901_v0  ;;  %6916 = vmatmul.msk.f32.vlgmr.msra.gmra.mxu1 %vm51_vm1, %v5441_v4  ;;  %5385 = vst.msk [vmem:[#allocation2 + $0x38] sm:$0xff] %vm51_vm1, %v5353_v43 }
 0x3cc   :  { %v8950_v62 = vpop.f32.mrf.mxu3 }
 0x3cd   :  { %v5228_v53 = vadd.f32 %v8841_v22, %v5193_v54  ;;  %6907 = vmatmul.msk.f32.gmra.mxu0 %vm51_vm1, %v8753_v59 }
 0x3ce   :  { %6950 = vmatmul.msk.f32.gmra.mxu2 %vm51_vm1, %v5441_v4 }
 0x3cf   :  { %v5260_v5 = vmax.f32 %v5228_v53, 0.0  ;;  %v4916_v53 = vadd.f32 %v8849_v19, %v8834_v11 }
 0x3d0   :  { %v5322_v23 = vld [vmem:[#allocation2 + $0x48] sm:$0xff]  ;;  %v8955_v44 = vpop.f32.mrf.mxu2 }
 0x3d1   :  { %5292 = vst.msk [vmem:[#allocation2 + $0x50] sm:$0xff] %vm51_vm1, %v5260_v5  ;;  %v5354_v36 = vmax.f32 %v5258_v33, %v5322_v23 }
 0x3d2   :  { %v5112_v32 = vpop.f32.mrf.mxu0  ;;  %v5442_v7 = vld [vmem:[#allocation2 + $0x38] sm:$0xff] }
 0x3d3   :  { %v5194_v29 = vadd.f32 %v5112_v32, %v4904_v18  ;;  %6917 = vmatmul.msk.f32.gmra.mxu1 %vm51_vm1, %v5442_v7  ;;  %5386 = vst.msk [vmem:[#allocation2 + $0x40] sm:$0xff] %vm51_vm1, %v5354_v36 }
 0x3d4   :  { %v8963_v17 = vpop.f32.mrf.mxu3 }
 0x3d5   :  { %v5229_v59 = vadd.f32 %v8841_v22, %v5194_v29  ;;  %6908 = vmatmul.msk.f32.gmra.mxu0 %vm51_vm1, %v8769_v9  ;;  %v4919_v29 = vadd.f32 %v8870_v58, %v8859_v45 }
 0x3d6   :  { %6951 = vmatmul.msk.f32.gmra.mxu2 %vm51_vm1, %v5442_v7 }
 0x3d7   :  { %v5261_v25 = vmax.f32 %v5229_v59, 0.0 }
 0x3d8   :  { %v5323_v38 = vld [vmem:[#allocation2 + $0x50] sm:$0xff]  ;;  %v8968_v47 = vpop.f32.mrf.mxu2 }
 0x3d9   :  { %5293 = vst.msk [vmem:[#allocation2 + $0x58] sm:$0xff] %vm51_vm1, %v5261_v25  ;;  %v5355_v35 = vmax.f32 %v5259_v10, %v5323_v38 }
 0x3da   :  { %v5115_v37 = vpop.f32.mrf.mxu0  ;;  %v5443_v20 = vld [vmem:[#allocation2 + $0x40] sm:$0xff] }
 0x3db   :  { %v5195_v60 = vadd.f32 %v5115_v37, %v4907_v40  ;;  %6918 = vmatmul.msk.f32.gmra.mxu1 %vm51_vm1, %v5443_v20  ;;  %6980 = vmatmul.msk.f32.vlgmr.msra.gmra.mxu3 %vm51_vm1, %v5443_v20  ;;  %5387 = vst.msk [vmem:[#allocation2 + $0x48] sm:$0xff] %vm51_vm1, %v5355_v35 }
 0x3dc   :  { %v8979_v33 = vpop.f32.mrf.mxu3 }
 0x3dd   :  { %v5230_v9 = vadd.f32 %v8841_v22, %v5195_v60  ;;  %6909 = vmatmul.msk.f32.gmra.mxu0 %vm51_vm1, %v8787_v41 }
 0x3de   :  { %6952 = vmatmul.msk.f32.gmra.mxu2 %vm51_vm1, %v5443_v20  ;;  %v4922_v20 = vadd.f32 %v8891_v15, %v8877_v46 }
 0x3df   :  { %v5262_v42 = vmax.f32 %v5230_v9, 0.0 }
 0x3e0   :  { %v5324_v52 = vld [vmem:[#allocation2 + $0x58] sm:$0xff]  ;;  %v8982_v48 = vpop.f32.mrf.mxu2 }
 0x3e1   :  { %5294 = vst.msk [vmem:[#allocation2 + $0x60] sm:$0xff] %vm51_vm1, %v5262_v42  ;;  %v5356_v27 = vmax.f32 %v5260_v5, %v5324_v52 }
 0x3e2   :  { %v5118_v14 = vpop.f32.mrf.mxu0  ;;  %v5444_v16 = vld [vmem:[#allocation2 + $0x48] sm:$0xff] }
 0x3e3   :  { %v5196_v31 = vadd.f32 %v5118_v14, %v4910_v49  ;;  %6919 = vmatmul.msk.f32.gmra.mxu1 %vm51_vm1, %v5444_v16  ;;  %6981 = vmatmul.msk.f32.gmra.mxu3 %vm51_vm1, %v5444_v16  ;;  %5388 = vst.msk [vmem:[#allocation2 + $0x50] sm:$0xff] %vm51_vm1, %v5356_v27  ;;  %v4925_v14 = vadd.f32 %v8908_v34, %v8899_v63 }
 0x3e4   :  { %v8994_v2 = vpop.f32.mrf.mxu3 }
 0x3e5   :  { %v5231_v41 = vadd.f32 %v8841_v22, %v5196_v31  ;;  %6910 = vmatmul.msk.f32.gmra.mxu0 %vm51_vm1, %v8811_v57 }
 0x3e6   :  { %6953 = vmatmul.msk.f32.gmra.mxu2 %vm51_vm1, %v5444_v16 }
 0x3e7   :  { %v5263_v55 = vmax.f32 %v5231_v41, 0.0 }
 0x3e8   :  { %v5325_v1 = vld [vmem:[#allocation2 + $0x60] sm:$0xff]  ;;  %v8996_v10 = vpop.f32.mrf.mxu2 }
 0x3e9   :  { %5295 = vst.msk [vmem:[#allocation2 + $0x68] sm:$0xff] %vm51_vm1, %v5263_v55  ;;  %v5357_v0 = vmax.f32 %v5261_v25, %v5325_v1 }
 0x3ea   :  { %v5121_v43 = vpop.f32.mrf.mxu0  ;;  %v5445_v30 = vld [vmem:[#allocation2 + $0x50] sm:$0xff] }
 0x3eb   :  { %v5197_v4 = vadd.f32 %v5121_v43, %v4913_v6  ;;  %6920 = vmatmul.msk.f32.gmra.mxu1 %vm51_vm1, %v5445_v30  ;;  %6982 = vmatmul.msk.f32.gmra.mxu3 %vm51_vm1, %v5445_v30  ;;  %5389 = vst.msk [vmem:[#allocation2 + $0x58] sm:$0xff] %vm51_vm1, %v5357_v0  ;;  %v4928_v0 = vadd.f32 %v8925_v39, %v8916_v24 }
 0x3ec   :  { %v9013_v23 = vpop.f32.mrf.mxu3 }
 0x3ed   :  { %v5232_v57 = vadd.f32 %v8841_v22, %v5197_v4  ;;  %6911 = vmatmul.msk.f32.gmra.mxu0 %vm51_vm1, %v8826_v21 }
 0x3ee   :  { %6954 = vmatmul.msk.f32.gmra.mxu2 %vm51_vm1, %v5445_v30 }
 0x3ef   :  { %v5264_v8 = vmax.f32 %v5232_v57, 0.0 }
 0x3f0   :  { %v5326_v51 = vld [vmem:[#allocation2 + $0x68] sm:$0xff]  ;;  %v9008_v54 = vpop.f32.mrf.mxu2 }
 0x3f1   :  { %5296 = vst.msk [vmem:[#allocation2 + $0x70] sm:$0xff] %vm51_vm1, %v5264_v8  ;;  %v5358_v5 = vmax.f32 %v5262_v42, %v5326_v51  ;;  %v4931_v51 = vadd.f32 %v8937_v28, %v8930_v50 }
 0x3f2   :  { %v5124_v18 = vpop.f32.mrf.mxu0  ;;  %v5446_v36 = vld [vmem:[#allocation2 + $0x58] sm:$0xff] }
 0x3f3   :  { %v5198_v32 = vadd.f32 %v5124_v18, %v4916_v53  ;;  %6921 = vmatmul.msk.f32.gmra.mxu1 %vm51_vm1, %v5446_v36  ;;  %6983 = vmatmul.msk.f32.gmra.mxu3 %vm51_vm1, %v5446_v36  ;;  %5390 = vst.msk [vmem:[#allocation2 + $0x60] sm:$0xff] %vm51_vm1, %v5358_v5 }
 0x3f5   :  { %v5233_v21 = vadd.f32 %v8841_v22, %v5198_v32  ;;  %6912 = vmatmul.msk.f32.gmra.mxu0 %vm51_vm1, %v8846_v26  ;;  %v9030_v26 = vpop.f32.mrf.mxu3 }
 0x3f6   :  { %6955 = vmatmul.msk.f32.gmra.mxu2 %vm51_vm1, %v5446_v36 }
 0x3f7   :  { %v5265_v11 = vmax.f32 %v5233_v21, 0.0 }
 0x3f8   :  { %v5327_v19 = vld [vmem:[#allocation2 + $0x70] sm:$0xff]  ;;  %v9022_v7 = vpop.f32.mrf.mxu2 }
 0x3f9   :  { %5297 = vst.msk [vmem:[#allocation2 + $0x78] sm:$0xff] %vm51_vm1, %v5265_v11  ;;  %v5359_v59 = vmax.f32 %v5263_v55, %v5327_v19  ;;  %v4934_v19 = vadd.f32 %v8950_v62, %v8942_v61 }
 0x3fa   :  { %v5127_v25 = vpop.f32.mrf.mxu0  ;;  %v5447_v38 = vld [vmem:[#allocation2 + $0x60] sm:$0xff] }
 0x3fb   :  { %v5199_v40 = vadd.f32 %v5127_v25, %v4919_v29  ;;  %6922 = vmatmul.msk.f32.gmra.mxu1 %vm51_vm1, %v5447_v38  ;;  %6984 = vmatmul.msk.f32.gmra.mxu3 %vm51_vm1, %v5447_v38  ;;  %5391 = vst.msk [vmem:[#allocation2 + $0x68] sm:$0xff] %vm51_vm1, %v5359_v59 }
 0x3fd   :  { %v5234_v35 = vadd.f32 %v8841_v22, %v5199_v40  ;;  %6913 = vmatmul.msk.f32.gmra.mxu0 %vm51_vm1, %v8866_v12  ;;  %v9047_v49 = vpop.f32.mrf.mxu3 }
 0x3fe   :  { %6956 = vmatmul.msk.f32.gmra.mxu2 %vm51_vm1, %v5447_v38 }
 0x3ff   :  { %v5266_v45 = vmax.f32 %v5234_v35, 0.0 }
 0x400   :  { %v5328_v58 = vld [vmem:[#allocation2 + $0x78] sm:$0xff]  ;;  %v9036_v37 = vpop.f32.mrf.mxu2 }
 0x401   :  { %5298 = vst.msk [vmem:[#allocation2 + $0x80] sm:$0xff] %vm51_vm1, %v5266_v45  ;;  %v5360_v60 = vmax.f32 %v5264_v8, %v5328_v58  ;;  %v9110_v58 = vld [vmem:[%s9643_s11 + $0x78] sm:$0xff] }
 0x402   :  { %v5130_v9 = vpop.f32.mrf.mxu0  ;;  %v5448_v42 = vld [vmem:[#allocation2 + $0x68] sm:$0xff]  ;;  %6237 = vmatpush.msra.mxu0 %v9110_v58 }
 0x403   :  { %v5200_v52 = vadd.f32 %v5130_v9, %v4922_v20  ;;  %6923 = vmatmul.msk.f32.gmra.mxu1 %vm51_vm1, %v5448_v42  ;;  %6985 = vmatmul.msk.f32.gmra.mxu3 %vm51_vm1, %v5448_v42  ;;  %5392 = vst.msk [vmem:[#allocation2 + $0x70] sm:$0xff] %vm51_vm1, %v5360_v60  ;;  %v9115_v20 = vld [vmem:[%s9643_s11 + $0x38] sm:$0xff]  ;;  %v4937_v60 = vadd.f32 %v8963_v17, %v8955_v44 }
 0x404   :  { %6260 = vmatpush.msrb.mxu1 %v9115_v20 }
 0x405   :  { %v5235_v12 = vadd.f32 %v8841_v22, %v5200_v52  ;;  %6914 = vmatmul.msk.f32.gmra.mxu0 %vm51_vm1, %v8893_v13  ;;  %v9062_v1 = vpop.f32.mrf.mxu3 }
 0x406   :  { %6957 = vmatmul.msk.f32.gmra.mxu2 %vm51_vm1, %v5448_v42 }
 0x407   :  { %v5267_v46 = vmax.f32 %v5235_v12, 0.0 }
 0x408   :  { %v5329_v15 = vld [vmem:[#allocation2 + $0x80] sm:$0xff]  ;;  %v9050_v27 = vpop.f32.mrf.mxu2 }
 0x409   :  { %5299 = vst.msk [vmem:[#allocation2 + $0x88] sm:$0xff] %vm51_vm1, %v5267_v46  ;;  %v5361_v16 = vmax.f32 %v5265_v11, %v5329_v15  ;;  %v9092_v11 = vld [vmem:[%s9643_s11 + $0xb8] sm:$0xff] }
 0x40a   :  { %v5133_v31 = vpop.f32.mrf.mxu0  ;;  %v5449_v41 = vld [vmem:[#allocation2 + $0x70] sm:$0xff]  ;;  %6283 = vmatpush.msrb.mxu2 %v9092_v11 }
 0x40b   :  { %v5201_v55 = vadd.f32 %v5133_v31, %v4925_v14  ;;  %6924 = vmatmul.msk.f32.gmra.mxu1 %vm51_vm1, %v5449_v41  ;;  %6986 = vmatmul.msk.f32.gmra.mxu3 %vm51_vm1, %v5449_v41  ;;  %5393 = vst.msk [vmem:[#allocation2 + $0x78] sm:$0xff] %vm51_vm1, %v5361_v16  ;;  %v4940_v14 = vadd.f32 %v8979_v33, %v8968_v47 }
 0x40d   :  { %v5236_v13 = vadd.f32 %v8841_v22, %v5201_v55  ;;  %6915 = vmatmul.msk.f32.gmra.mxu0 %vm51_vm1, %v8910_v56  ;;  %v9080_v5 = vpop.f32.mrf.mxu3 }
 0x40e   :  { %6958 = vmatmul.msk.f32.gmra.mxu2 %vm51_vm1, %v5449_v41 }
 0x40f   :  { %v5268_v63 = vmax.f32 %v5236_v13, 0.0 }
 0x410   :  { %v5330_v34 = vld [vmem:[#allocation2 + $0x88] sm:$0xff]  ;;  %v9064_v6 = vpop.f32.mrf.mxu2 }
 0x411   :  { %5300 = vst.msk [vmem:[#allocation2 + $0x90] sm:$0xff] %vm51_vm1, %v5268_v63  ;;  %v5362_v43 = vmax.f32 %v5266_v45, %v5330_v34 }
 0x412   :  { %v5136_v30 = vpop.f32.mrf.mxu0  ;;  %v5450_v4 = vld [vmem:[#allocation2 + $0x78] sm:$0xff] }
 0x413   :  { %v5202_v57 = vadd.f32 %v5136_v30, %v4928_v0  ;;  %6925 = vmatmul.msk.f32.gmra.mxu1 %vm51_vm1, %v5450_v4  ;;  %6987 = vmatmul.msk.f32.gmra.mxu3 %vm51_vm1, %v5450_v4  ;;  %5394 = vst.msk [vmem:[#allocation2 + $0x80] sm:$0xff] %vm51_vm1, %v5362_v43  ;;  %v4943_v0 = vadd.f32 %v8994_v2, %v8982_v48  ;;  %v9154_v2 = vld [vmem:[%s9643_s11 + $0xb0] sm:$0xff] }
 0x414   :  { %6284 = vmatpush.msrb.mxu2 %v9154_v2 }
 0x415   :  { %v5237_v56 = vadd.f32 %v8841_v22, %v5202_v57  ;;  %5183 = vmatmul.f32.gmra.mxu0 %v7077_v3  ;;  %v9101_v40 = vpop.f32.mrf.mxu3 }
 0x416   :  { %6959 = vmatmul.msk.f32.gmra.mxu2 %vm51_vm1, %v5450_v4 }
 0x417   :  { %v5269_v8 = vmax.f32 %v5237_v56, 0.0 }
 0x418   :  { %v5331_v24 = vld [vmem:[#allocation2 + $0x90] sm:$0xff]  ;;  %v9075_v39 = vpop.f32.mrf.mxu2 }
 0x419   :  { %5301 = vst.msk [vmem:[#allocation2 + $0x98] sm:$0xff] %vm51_vm1, %v5269_v8  ;;  %v5363_v53 = vmax.f32 %v5267_v46, %v5331_v24 }
 0x41a   :  { %v5139_v18 = vpop.f32.mrf.mxu0  ;;  %v5451_v36 = vld [vmem:[#allocation2 + $0x80] sm:$0xff] }
 0x41b   :  { %v5203_v32 = vadd.f32 %v5139_v18, %v4931_v51  ;;  %6926 = vmatmul.msk.f32.gmra.mxu1 %vm51_vm1, %v5451_v36  ;;  %6988 = vmatmul.msk.f32.gmra.mxu3 %vm51_vm1, %v5451_v36  ;;  %5395 = vst.msk [vmem:[#allocation2 + $0x88] sm:$0xff] %vm51_vm1, %v5363_v53  ;;  %v4946_v51 = vadd.f32 %v9013_v23, %v8996_v10 }
 0x41d   :  { %v5238_v3 = vadd.f32 %v8841_v22, %v5203_v32  ;;  %v9126_v15 = vpop.f32.mrf.mxu3 }
 0x41e   :  { %6960 = vmatmul.msk.f32.gmra.mxu2 %vm51_vm1, %v5451_v36 }
 0x41f   :  { %v5270_v21 = vmax.f32 %v5238_v3, 0.0 }
 0x420   :  { %v5332_v50 = vld [vmem:[#allocation2 + $0x98] sm:$0xff]  ;;  %v9087_v28 = vpop.f32.mrf.mxu2 }
 0x421   :  { %5302 = vst.msk [vmem:[#allocation2 + $0xa0] sm:$0xff] %vm51_vm1, %v5270_v21  ;;  %v5364_v29 = vmax.f32 %v5268_v63, %v5332_v50 }
 0x422   :  { %v5142_v59 = vpop.f32.mrf.mxu0  ;;  %v5452_v25 = vld [vmem:[#allocation2 + $0x88] sm:$0xff] }
 0x423   :  { %v5204_v38 = vadd.f32 %v5142_v59, %v4934_v19  ;;  %6927 = vmatmul.msk.f32.gmra.mxu1 %vm51_vm1, %v5452_v25  ;;  %6989 = vmatmul.msk.f32.gmra.mxu3 %vm51_vm1, %v5452_v25  ;;  %5396 = vst.msk [vmem:[#allocation2 + $0x90] sm:$0xff] %vm51_vm1, %v5364_v29  ;;  %v9170_v29 = vld [vmem:[%s9643_s11 + $0x70] sm:$0xff] }
 0x424   :  { %v9175_v59 = vld [vmem:[%s9643_s11 + $0x30] sm:$0xff]  ;;  %6238 = vmatpush.msra.mxu0 %v9170_v29 }
 0x425   :  { %v5239_v35 = vadd.f32 %v8841_v22, %v5204_v38  ;;  %v9139_v47 = vpop.f32.mrf.mxu3  ;;  %6261 = vmatpush.msrb.mxu1 %v9175_v59 }
 0x426   :  { %6961 = vmatmul.msk.f32.gmra.mxu2 %vm51_vm1, %v5452_v25  ;;  %v4949_v25 = vadd.f32 %v9030_v26, %v9008_v54 }
 0x427   :  { %v5271_v61 = vmax.f32 %v5239_v35, 0.0 }
 0x428   :  { %v5333_v62 = vld [vmem:[#allocation2 + $0xa0] sm:$0xff]  ;;  %v9105_v45 = vpop.f32.mrf.mxu2 }
 0x429   :  { %5303 = vst.msk [vmem:[#allocation2 + $0xa8] sm:$0xff] %vm51_vm1, %v5271_v61  ;;  %v5365_v9 = vmax.f32 %v5269_v8, %v5333_v62 }
 0x42a   :  { %v5145_v42 = vpop.f32.mrf.mxu0  ;;  %v5453_v52 = vld [vmem:[#allocation2 + $0x90] sm:$0xff] }
 0x42b   :  { %v5205_v12 = vadd.f32 %v5145_v42, %v4937_v60  ;;  %6928 = vmatmul.msk.f32.gmra.mxu1 %vm51_vm1, %v5453_v52  ;;  %6990 = vmatmul.msk.f32.gmra.mxu3 %vm51_vm1, %v5453_v52  ;;  %5397 = vst.msk [vmem:[#allocation2 + $0x98] sm:$0xff] %vm51_vm1, %v5365_v9 }
 0x42d   :  { %v5240_v46 = vadd.f32 %v8841_v22, %v5205_v12  ;;  %v9160_v36 = vpop.f32.mrf.mxu3  ;;  %v4952_v12 = vadd.f32 %v9047_v49, %v9022_v7 }
 0x42e   :  { %6962 = vmatmul.msk.f32.gmra.mxu2 %vm51_vm1, %v5453_v52 }
 0x42f   :  { %v5272_v44 = vmax.f32 %v5240_v46, 0.0 }
 0x430   :  { %v5334_v17 = vld [vmem:[#allocation2 + $0xa8] sm:$0xff] }
 0x431   :  { %5304 = vst.msk [vmem:[#allocation2 + $0xb0] sm:$0xff] %vm51_vm1, %v5272_v44  ;;  %v9132_v16 = vpop.f32.mrf.mxu2  ;;  %v5366_v31 = vmax.f32 %v5270_v21, %v5334_v17 }
 0x432   :  { %v5148_v41 = vpop.f32.mrf.mxu0  ;;  %v5454_v55 = vld [vmem:[#allocation2 + $0x98] sm:$0xff] }
 0x433   :  { %v5206_v13 = vadd.f32 %v5148_v41, %v4940_v14  ;;  %6929 = vmatmul.msk.f32.gmra.mxu1 %vm51_vm1, %v5454_v55  ;;  %6991 = vmatmul.msk.f32.gmra.mxu3 %vm51_vm1, %v5454_v55  ;;  %5398 = vst.msk [vmem:[#allocation2 + $0xa0] sm:$0xff] %vm51_vm1, %v5366_v31 }
 0x435   :  { %v5241_v63 = vadd.f32 %v8841_v22, %v5206_v13  ;;  %v9187_v9 = vpop.f32.mrf.mxu3 }
 0x436   :  { %6963 = vmatmul.msk.f32.gmra.mxu2 %vm51_vm1, %v5454_v55 }
 0x437   :  { %v5273_v34 = vmax.f32 %v5241_v63, 0.0  ;;  %v4955_v63 = vadd.f32 %v9062_v1, %v9036_v37  ;;  %v9215_v37 = vld [vmem:[%s9642_s10] ss:$0 sm:$0xff] }
 0x438   :  { %v5335_v33 = vld [vmem:[#allocation2 + $0xb0] sm:$0xff] }
 0x439   :  { %5305 = vst.msk [vmem:[#allocation2 + $0xb8] sm:$0xff] %vm51_vm1, %v5273_v34  ;;  %v9144_v43 = vpop.f32.mrf.mxu2  ;;  %v5367_v30 = vmax.f32 %v5271_v61, %v5335_v33 }
 0x43a   :  { %v5151_v4 = vpop.f32.mrf.mxu0  ;;  %v5455_v57 = vld [vmem:[#allocation2 + $0xa0] sm:$0xff] }
 0x43b   :  { %v5207_v56 = vadd.f32 %v5151_v4, %v4943_v0  ;;  %6930 = vmatmul.msk.f32.gmra.mxu1 %vm51_vm1, %v5455_v57  ;;  %6992 = vmatmul.msk.f32.gmra.mxu3 %vm51_vm1, %v5455_v57  ;;  %5399 = vst.msk [vmem:[#allocation2 + $0xa8] sm:$0xff] %vm51_vm1, %v5367_v30 }
 0x43d   :  { %v5242_v8 = vadd.f32 %v8841_v22, %v5207_v56  ;;  %v9200_v55 = vpop.f32.mrf.mxu3 }
 0x43e   :  { %6964 = vmatmul.msk.f32.gmra.mxu2 %vm51_vm1, %v5455_v57 }
 0x43f   :  { %v5274_v24 = vmax.f32 %v5242_v8, 0.0 }
 0x440   :  { %v5336_v48 = vld [vmem:[#allocation2 + $0xb8] sm:$0xff] }
 0x441   :  { %5306 = vst.msk [vmem:[#allocation2 + $0xc0] sm:$0xff] %vm51_vm1, %v5274_v24  ;;  %v5705_v53 = vpop.f32.mrf.mxu2  ;;  %v5368_v18 = vmax.f32 %v5272_v44, %v5336_v48 }
 0x442   :  { %v5154_v32 = vpop.f32.mrf.mxu0  ;;  %v5456_v3 = vld [vmem:[#allocation2 + $0xa8] sm:$0xff] }
 0x443   :  { %v5208_v21 = vadd.f32 %v5154_v32, %v4946_v51  ;;  %6931 = vmatmul.msk.f32.gmra.mxu1 %vm51_vm1, %v5456_v3  ;;  %6993 = vmatmul.msk.f32.gmra.mxu3 %vm51_vm1, %v5456_v3  ;;  %5400 = vst.msk [vmem:[#allocation2 + $0xb0] sm:$0xff] %vm51_vm1, %v5368_v18  ;;  %v9221_v18 = vld [vmem:[%s9643_s11 + $0xa8] sm:$0xff] }
 0x444   :  { %6285 = vmatpush.msrb.mxu2 %v9221_v18 }
 0x445   :  { %v5243_v50 = vadd.f32 %v8841_v22, %v5208_v21 }
 0x446   :  { %6965 = vmatmul.msk.f32.gmra.mxu2 %vm51_vm1, %v5456_v3 }
 0x447   :  { %v5275_v10 = vmax.f32 %v5243_v50, 0.0 }
 0x448   :  { %v5337_v23 = vld [vmem:[#allocation2 + $0xc0] sm:$0xff]  ;;  %v5586_v19 = vpop.f32.mrf.mxu1 }
 0x449   :  { %5307 = vst.msk [vmem:[#allocation2 + $0xc8] sm:$0xff] %vm51_vm1, %v5275_v10  ;;  %v9180_v38 = vpop.f32.mrf.mxu2  ;;  %v5369_v35 = vmax.f32 %v5273_v34, %v5337_v23  ;;  %v5706_v57 = vadd.f32 %v5705_v53, %v5586_v19  ;;  %v4958_v53 = vadd.f32 %v9080_v5, %v9050_v27 }
 0x44a   :  { %v5157_v61 = vpop.f32.mrf.mxu0  ;;  %v5457_v62 = vld [vmem:[#allocation2 + $0xb0] sm:$0xff] }
 0x44b   :  { %v5209_v60 = vadd.f32 %v5157_v61, %v4949_v25  ;;  %6932 = vmatmul.msk.f32.gmra.mxu1 %vm51_vm1, %v5457_v62  ;;  %6994 = vmatmul.msk.f32.gmra.mxu3 %vm51_vm1, %v5457_v62  ;;  %5401 = vst.msk [vmem:[#allocation2 + $0xb8] sm:$0xff] %vm51_vm1, %v5369_v35 }
 0x44d   :  { %v5244_v54 = vadd.f32 %v8841_v22, %v5209_v60 }
 0x44e   :  { %6966 = vmatmul.msk.f32.gmra.mxu2 %vm51_vm1, %v5457_v62 }
 0x44f   :  { %v5276_v26 = vmax.f32 %v5244_v54, 0.0  ;;  %v9247_v54 = vld [vmem:[%s9643_s11 + $0x68] sm:$0xff] }
 0x450   :  { %v5338_v42 = vld [vmem:[#allocation2 + $0xc8] sm:$0xff]  ;;  %v5589_v52 = vpop.f32.mrf.mxu1  ;;  %6239 = vmatpush.msra.mxu0 %v9247_v54 }
 0x451   :  { %5308 = vst.msk [vmem:[#allocation2 + $0xd0] sm:$0xff] %vm51_vm1, %v5276_v26  ;;  %v9194_v46 = vpop.f32.mrf.mxu2  ;;  %v5370_v44 = vmax.f32 %v5274_v24, %v5338_v42  ;;  %v5709_v27 = vadd.f32 %v9180_v38, %v5589_v52  ;;  %v9252_v38 = vld [vmem:[%s9643_s11 + $0x28] sm:$0xff] }
 0x452   :  { %v5160_v17 = vpop.f32.mrf.mxu0  ;;  %v5458_v14 = vld [vmem:[#allocation2 + $0xb8] sm:$0xff]  ;;  %6262 = vmatpush.msrb.mxu1 %v9252_v38 }
 0x453   :  { %v5210_v31 = vadd.f32 %v5160_v17, %v4952_v12  ;;  %6933 = vmatmul.msk.f32.gmra.mxu1 %vm51_vm1, %v5458_v14  ;;  %6995 = vmatmul.msk.f32.gmra.mxu3 %vm51_vm1, %v5458_v14  ;;  %5402 = vst.msk [vmem:[#allocation2 + $0xc0] sm:$0xff] %vm51_vm1, %v5370_v44 }
 0x455   :  { %v5245_v41 = vadd.f32 %v8841_v22, %v5210_v31 }
 0x456   :  { %6967 = vmatmul.msk.f32.gmra.mxu2 %vm51_vm1, %v5458_v14 }
 0x457   :  { %v5277_v7 = vmax.f32 %v5245_v41, 0.0 }
 0x458   :  { %v5339_v49 = vld [vmem:[#allocation2 + $0xd0] sm:$0xff]  ;;  %v5592_v13 = vpop.f32.mrf.mxu1 }
 0x459   :  { %5309 = vst.msk [vmem:[#allocation2 + $0xd8] sm:$0xff] %vm51_vm1, %v5277_v7  ;;  %v9206_v34 = vpop.f32.mrf.mxu2  ;;  %v5371_v33 = vmax.f32 %v5275_v10, %v5339_v49 }
 0x45a   :  { %v5163_v0 = vpop.f32.mrf.mxu0  ;;  %v5459_v30 = vld [vmem:[#allocation2 + $0xc0] sm:$0xff] }
 0x45b   :  { %v5211_v4 = vadd.f32 %v5163_v0, %v4955_v63  ;;  %6934 = vmatmul.msk.f32.gmra.mxu1 %vm51_vm1, %v5459_v30  ;;  %6996 = vmatmul.msk.f32.gmra.mxu3 %vm51_vm1, %v5459_v30  ;;  %5403 = vst.msk [vmem:[#allocation2 + $0xc8] sm:$0xff] %vm51_vm1, %v5371_v33  ;;  %v4964_v0 = vadd.f32 %v9126_v15, %v9075_v39 }
 0x45d   :  { %v5246_v56 = vadd.f32 %v8841_v22, %v5211_v4 }
 0x45e   :  { %6968 = vmatmul.msk.f32.gmra.mxu2 %vm51_vm1, %v5459_v30  ;;  %v5946_v1 = vpop.f32.mrf.mxu3 }
 0x45f   :  { %v5278_v8 = vmax.f32 %v5246_v56, 0.0  ;;  %v6042_v24 = vadd.f32 %v5946_v1, %v5706_v57 }
 0x460   :  { %v5340_v48 = vld [vmem:[#allocation2 + $0xd8] sm:$0xff]  ;;  %v5595_v51 = vpop.f32.mrf.mxu1 }
 0x461   :  { %5310 = vst.msk [vmem:[#allocation2 + $0xe0] sm:$0xff] %vm51_vm1, %v5278_v8  ;;  %v9227_v32 = vadd.f32 %v9215_v37, %v6042_v24  ;;  %v9229_v3 = vpop.f32.mrf.mxu2  ;;  %v5372_v21 = vmax.f32 %v5276_v26, %v5340_v48  ;;  %v4961_v26 = vadd.f32 %v9101_v40, %v9064_v6  ;;  %v5712_v6 = vadd.f32 %v9194_v46, %v5592_v13 }
 0x462   :  { %v5166_v50 = vpop.f32.mrf.mxu0  ;;  %v5460_v10 = vld [vmem:[#allocation2 + $0xc8] sm:$0xff]  ;;  %v5715_v24 = vadd.f32 %v9206_v34, %v5595_v51  ;;  %v4967_v34 = vadd.f32 %v9139_v47, %v9087_v28  ;;  %v7014_v47 = vld [vmem:[%s9643_s11 + $0x50] sm:$0xff] }
 0x463   :  { %v6109_v23 = vmax.f32 %v9227_v32, 0.0  ;;  %v5212_v19 = vadd.f32 %v5166_v50, %v4958_v53  ;;  %6935 = vmatmul.msk.f32.gmra.mxu1 %vm51_vm1, %v5460_v10  ;;  %6997 = vmatmul.msk.f32.gmra.mxu3 %vm51_vm1, %v5460_v10  ;;  %5404 = vst.msk [vmem:[#allocation2 + $0xd0] sm:$0xff] %vm51_vm1, %v5372_v21  ;;  %v9293_v53 = vld [vmem:[%s9643_s11 + $0x60] sm:$0xff]  ;;  %v5832_v32 = vld [vmem:[#allocation2 + $0x138] sm:$0xff] }
 0x464   :  { %6240 = vmatpush.msra.mxu0 %v9293_v53 }
 0x465   :  { %6141 = vst.msk [vmem:[#allocation2 + $0x20] sm:$0xff] %vm51_vm1, %v6109_v23  ;;  %v5247_v5 = vadd.f32 %v8841_v22, %v5212_v19 }
 0x466   :  { %6969 = vmatmul.msk.f32.gmra.mxu2 %vm51_vm1, %v5460_v10  ;;  %v5949_v25 = vpop.f32.mrf.mxu3 }
 0x467   :  { %v5279_v35 = vmax.f32 %v5247_v5, 0.0  ;;  %v6043_v61 = vadd.f32 %v5949_v25, %v5709_v27  ;;  %v9309_v27 = vld [vmem:[%s9643_s11 + $0x58] sm:$0xff] }
 0x468   :  { %v5341_v62 = vld [vmem:[#allocation2 + $0xe0] sm:$0xff]  ;;  %v9242_v60 = vpop.f32.mrf.mxu1  ;;  %6241 = vmatpush.msra.mxu0 %v9309_v27 }
 0x469   :  { %5311 = vst.msk [vmem:[#allocation2 + $0xe8] sm:$0xff] %vm51_vm1, %v5279_v35  ;;  %v6078_v42 = vadd.f32 %v9215_v37, %v6043_v61  ;;  %v9258_v52 = vpop.f32.mrf.mxu2  ;;  %v5373_v12 = vmax.f32 %v5277_v7, %v5341_v62 }
 0x46a   :  { %v5169_v44 = vpop.f32.mrf.mxu0  ;;  %v5461_v17 = vld [vmem:[#allocation2 + $0xd0] sm:$0xff]  ;;  %6242 = vmatpush.msra.mxu0 %v7014_v47 }
 0x46b   :  { %v6110_v14 = vmax.f32 %v6078_v42, 0.0  ;;  %v5213_v31 = vadd.f32 %v5169_v44, %v4961_v26  ;;  %6936 = vmatmul.msk.f32.gmra.mxu1 %vm51_vm1, %v5461_v17  ;;  %6998 = vmatmul.msk.f32.gmra.mxu3 %vm51_vm1, %v5461_v17  ;;  %5405 = vst.msk [vmem:[#allocation2 + $0xd8] sm:$0xff] %vm51_vm1, %v5373_v12  ;;  %v7013_v26 = vld [vmem:[%s9643_s11 + $0x48] sm:$0xff] }
 0x46c   :  { %6243 = vmatpush.msra.mxu0 %v7013_v26 }
 0x46d   :  { %6142 = vst.msk [vmem:[#allocation2 + $0x28] sm:$0xff] %vm51_vm1, %v6110_v14  ;;  %v9268_v40 = vadd.f32 %v8841_v22, %v5213_v31 }
 0x46e   :  { %6970 = vmatmul.msk.f32.gmra.mxu2 %vm51_vm1, %v5461_v17  ;;  %v5952_v41 = vpop.f32.mrf.mxu3 }
 0x46f   :  { %v5280_v7 = vmax.f32 %v9268_v40, 0.0  ;;  %v6044_v49 = vadd.f32 %v5952_v41, %v5712_v6 }
 0x470   :  { %v5342_v63 = vld [vmem:[#allocation2 + $0xe8] sm:$0xff]  ;;  %v9272_v33 = vpop.f32.mrf.mxu1 }
 0x471   :  { %5312 = vst.msk [vmem:[#allocation2 + $0xf0] sm:$0xff] %vm51_vm1, %v5280_v7  ;;  %v6079_v46 = vadd.f32 %v9215_v37, %v6044_v49  ;;  %v9278_v13 = vpop.f32.mrf.mxu2  ;;  %v5374_v30 = vmax.f32 %v5278_v8, %v5342_v63 }
 0x472   :  { %v5172_v4 = vpop.f32.mrf.mxu0  ;;  %v5462_v57 = vld [vmem:[#allocation2 + $0xd8] sm:$0xff] }
 0x473   :  { %v6111_v56 = vmax.f32 %v6079_v46, 0.0  ;;  %v5214_v1 = vadd.f32 %v5172_v4, %v4964_v0  ;;  %6937 = vmatmul.msk.f32.gmra.mxu1 %vm51_vm1, %v5462_v57  ;;  %6999 = vmatmul.msk.f32.gmra.mxu3 %vm51_vm1, %v5462_v57  ;;  %5406 = vst.msk [vmem:[#allocation2 + $0xe0] sm:$0xff] %vm51_vm1, %v5374_v30 }
 0x475   :  { %6143 = vst.msk [vmem:[#allocation2 + $0x30] sm:$0xff] %vm51_vm1, %v6111_v56  ;;  %v9286_v39 = vadd.f32 %v8841_v22, %v5214_v1 }
 0x476   :  { %6971 = vmatmul.msk.f32.gmra.mxu2 %vm51_vm1, %v5462_v57  ;;  %v5955_v15 = vpop.f32.mrf.mxu3 }
 0x477   :  { %v5281_v8 = vmax.f32 %v9286_v39, 0.0  ;;  %v6045_v48 = vadd.f32 %v5955_v15, %v5715_v24 }
 0x478   :  { %v5343_v21 = vld [vmem:[#allocation2 + $0xf0] sm:$0xff]  ;;  %v9295_v50 = vpop.f32.mrf.mxu1 }
 0x479   :  { %5313 = vst.msk [vmem:[#allocation2 + $0xf8] sm:$0xff] %vm51_vm1, %v5281_v8  ;;  %v6080_v51 = vadd.f32 %v9215_v37, %v6045_v48  ;;  %v9304_v10 = vpop.f32.mrf.mxu2  ;;  %v5375_v19 = vmax.f32 %v5279_v35, %v5343_v21  ;;  %v5718_v35 = vadd.f32 %v9229_v3, %v9242_v60  ;;  %v9332_v3 = vld [vmem:[%s9643_s11 + $0x40] sm:$0xff] }
 0x47a   :  { %v5175_v5 = vpop.f32.mrf.mxu0  ;;  %v5463_v25 = vld [vmem:[#allocation2 + $0xe0] sm:$0xff]  ;;  %6244 = vmatpush.msra.mxu0 %v9332_v3 }
 0x47b   :  { %v6112_v61 = vmax.f32 %v6080_v51, 0.0  ;;  %v5215_v28 = vadd.f32 %v5175_v5, %v4967_v34  ;;  %6938 = vmatmul.msk.f32.gmra.mxu1 %vm51_vm1, %v5463_v25  ;;  %7000 = vmatmul.msk.f32.gmra.mxu3 %vm51_vm1, %v5463_v25  ;;  %5407 = vst.msk [vmem:[#allocation2 + $0xe8] sm:$0xff] %vm51_vm1, %v5375_v19  ;;  %v4976_v51 = vadd.f32 %v9200_v55, %v9144_v43 }
 0x47c   :  { %6339 = vmatpush.msrb.mxu0 %v9110_v58  ;;  %v9360_v58 = vld [vmem:[%s9643_s11 + $0x20] sm:$0xff] }
 0x47d   :  { %6144 = vst.msk [vmem:[#allocation2 + $0x38] sm:$0xff] %vm51_vm1, %v6112_v61  ;;  %v9322_v62 = vadd.f32 %v8841_v22, %v5215_v28  ;;  %v4970_v22 = vadd.f32 %v9160_v36, %v9105_v45  ;;  %v9355_v45 = vld [vmem:[%s9643_s11 + $0xa0] sm:$0xff]  ;;  %6263 = vmatpush.msrb.mxu1 %v9360_v58  ;;  %v5721_v36 = vadd.f32 %v9258_v52, %v9272_v33 }
 0x47e   :  { %6972 = vmatmul.msk.f32.gmra.mxu2 %vm51_vm1, %v5463_v25  ;;  %v5958_v42 = vpop.f32.mrf.mxu3  ;;  %6340 = vmatpush.msrb.mxu0 %v9170_v29  ;;  %v4973_v33 = vadd.f32 %v9187_v9, %v9132_v16  ;;  %v5724_v16 = vadd.f32 %v9278_v13, %v9295_v50 }
 0x47f   :  { %v5282_v12 = vmax.f32 %v9322_v62, 0.0  ;;  %v6046_v44 = vadd.f32 %v5958_v42, %v5718_v35  ;;  %6286 = vmatpush.msrb.mxu2 %v9355_v45 }
 0x480   :  { %v5344_v60 = vld [vmem:[#allocation2 + $0xf8] sm:$0xff]  ;;  %v9334_v17 = vpop.f32.mrf.mxu1  ;;  %6341 = vmatpush.msrb.mxu0 %v9247_v54 }
 0x481   :  { %5314 = vst.msk [vmem:[#allocation2 + $0x100] sm:$0xff] %vm51_vm1, %v5282_v12  ;;  %v9343_v14 = vadd.f32 %v9215_v37, %v6046_v44  ;;  %v9345_v31 = vpop.f32.mrf.mxu2  ;;  %v5376_v6 = vmax.f32 %v5280_v7, %v5344_v60  ;;  %v7050_v7 = vld [vmem:[%s9640_s8] ss:$0 sm:$0xff]  ;;  %v5727_v43 = vadd.f32 %v9304_v10, %v9334_v17  ;;  %v7023_v10 = vld [vmem:[%s9643_s11 + $0x98] sm:$0xff]  ;;  %v7022_v17 = vld [vmem:[%s9643_s11 + $0x90] sm:$0xff] }
 0x482   :  { %v5178_v40 = vpop.f32.mrf.mxu0  ;;  %v5464_v41 = vld [vmem:[#allocation2 + $0xe8] sm:$0xff]  ;;  %6342 = vmatpush.msrb.mxu0 %v9293_v53  ;;  %6287 = vmatpush.msrb.mxu2 %v7023_v10 }
 0x483   :  { %v6113_v49 = vmax.f32 %v9343_v14, 0.0  ;;  %v5216_v63 = vadd.f32 %v5178_v40, %v4970_v22  ;;  %6939 = vmatmul.msk.f32.gmra.mxu1 %vm51_vm1, %v5464_v41  ;;  %7001 = vmatmul.msk.f32.gmra.mxu3 %vm51_vm1, %v5464_v41  ;;  %5408 = vst.msk [vmem:[#allocation2 + $0xf0] sm:$0xff] %vm51_vm1, %v5376_v6  ;;  %v9427_v22 = vld [vmem:[#allocation2 + $0x120] sm:$0xff] }
 0x484   :  { %6343 = vmatpush.msrb.mxu0 %v9309_v27  ;;  %6288 = vmatpush.msrb.mxu2 %v7022_v17  ;;  %v7020_v14 = vld [vmem:[%s9643_s11 + $0x80] sm:$0xff] }
 0x485   :  { %6145 = vst.msk [vmem:[#allocation2 + $0x40] sm:$0xff] %vm51_vm1, %v6113_v49  ;;  %v5251_v0 = vadd.f32 %v7050_v7, %v5216_v63  ;;  %v9437_v63 = vld [vmem:[%s9643_s11 + $0x18] sm:$0xff] }
 0x486   :  { %6973 = vmatmul.msk.f32.gmra.mxu2 %vm51_vm1, %v5464_v41  ;;  %v5961_v46 = vpop.f32.mrf.mxu3  ;;  %6344 = vmatpush.msrb.mxu0 %v7014_v47 }
 0x487   :  { %v5283_v30 = vmax.f32 %v5251_v0, 0.0  ;;  %v6047_v4 = vadd.f32 %v5961_v46, %v5721_v36  ;;  %v7021_v36 = vld [vmem:[%s9643_s11 + $0x88] sm:$0xff]  ;;  %6264 = vmatpush.msrb.mxu1 %v9437_v63 }
 0x488   :  { %v5345_v57 = vld [vmem:[#allocation2 + $0x100] sm:$0xff]  ;;  %v9375_v52 = vpop.f32.mrf.mxu1  ;;  %6345 = vmatpush.msrb.mxu0 %v7013_v26  ;;  %6289 = vmatpush.msrb.mxu2 %v7021_v36 }
 0x489   :  { %5315 = vst.msk [vmem:[#allocation2 + $0x108] sm:$0xff] %vm51_vm1, %v5283_v30  ;;  %v6082_v56 = vadd.f32 %v9215_v37, %v6047_v4  ;;  %v9381_v1 = vpop.f32.mrf.mxu2  ;;  %v5377_v29 = vmax.f32 %v5281_v8, %v5345_v57  ;;  %v5730_v40 = vadd.f32 %v9345_v31, %v9375_v52 }
 0x48a   :  { %v5181_v24 = vpop.f32.mrf.mxu0  ;;  %v5465_v15 = vld [vmem:[#allocation2 + $0xf0] sm:$0xff]  ;;  %6346 = vmatpush.msrb.mxu0 %v9332_v3  ;;  %6290 = vmatpush.msrb.mxu2 %v7020_v14 }
 0x48b   :  { %v6114_v54 = vmax.f32 %v6082_v56, 0.0  ;;  %v5217_v48 = vadd.f32 %v5181_v24, %v4973_v33  ;;  %6940 = vmatmul.msk.f32.gmra.mxu1 %vm51_vm1, %v5465_v15  ;;  %7002 = vmatmul.msk.f32.gmra.mxu3 %vm51_vm1, %v5465_v15  ;;  %5409 = vst.msk [vmem:[#allocation2 + $0xf8] sm:$0xff] %vm51_vm1, %v5377_v29 }
 0x48c   :  { %6385 = vmatpush.msra.mxu2 %v9092_v11  ;;  %v9469_v11 = vld [vmem:[%s9645_s13 + $0x60] sm:$0xf] }
 0x48d   :  { %6146 = vst.msk [vmem:[#allocation2 + $0x48] sm:$0xff] %vm51_vm1, %v6114_v54  ;;  %v5252_v9 = vadd.f32 %v7050_v7, %v5217_v48  ;;  %7031 = vmatpush.msk.msrb.mxu3 %vm6302_vm11, %v9469_v11  ;;  %v6186_v48 = vld [vmem:[%s9643_s11 + $0x8] sm:$0xff] }
 0x48e   :  { %6974 = vmatmul.msk.f32.gmra.mxu2 %vm51_vm1, %v5465_v15  ;;  %v5964_v39 = vpop.f32.mrf.mxu3 }
 0x48f   :  { %v5284_v8 = vmax.f32 %v5252_v9, 0.0  ;;  %v6048_v53 = vadd.f32 %v5964_v39, %v5724_v16  ;;  %6386 = vmatpush.msra.mxu2 %v9154_v2 }
 0x490   :  { %v5346_v21 = vld [vmem:[#allocation2 + $0x108] sm:$0xff]  ;;  %v9394_v34 = vpop.f32.mrf.mxu1 }
 0x491   :  { %5316 = vst.msk [vmem:[#allocation2 + $0x110] sm:$0xff] %vm51_vm1, %v5284_v8  ;;  %v6083_v13 = vadd.f32 %v9215_v37, %v6048_v53  ;;  %v9400_v50 = vpop.f32.mrf.mxu2  ;;  %v5378_v19 = vmax.f32 %v5282_v12, %v5346_v21  ;;  %v5733_v56 = vadd.f32 %v9381_v1, %v9394_v34  ;;  %v6187_v1 = vld [vmem:[%s9643_s11 + $0x10] sm:$0xff]  ;;  %6387 = vmatpush.msra.mxu2 %v9221_v18  ;;  %v6185_v18 = vld [vmem:[%s9643_s11] sm:$0xff]  ;;  %s6429_s11 = sshll.u32 %s7078_s21, 4  ;;  %s6430_s11 = int_to_ptr.vmem [resolvable:$true] %s6429_s11 }
 0x492   :  { %v5184_v27 = vpop.f32.mrf.mxu0  ;;  %v5466_v5 = vld [vmem:[#allocation2 + $0xf8] sm:$0xff]  ;;  %6265 = vmatpush.msrb.mxu1 %v6187_v1 }
 0x493   :  { %v6115_v25 = vmax.f32 %v6083_v13, 0.0  ;;  %v5218_v61 = vadd.f32 %v5184_v27, %v4976_v51  ;;  %6941 = vmatmul.msk.f32.gmra.mxu1 %vm51_vm1, %v5466_v5  ;;  %7003 = vmatmul.msk.f32.gmra.mxu3 %vm51_vm1, %v5466_v5  ;;  %5410 = vst.msk [vmem:[#allocation2 + $0x100] sm:$0xff] %vm51_vm1, %v5378_v19 }
 0x494   :  { %6388 = vmatpush.msra.mxu2 %v9355_v45  ;;  %6266 = vmatpush.msrb.mxu1 %v6186_v48 }
 0x495   :  { %6147 = vst.msk [vmem:[#allocation2 + $0x50] sm:$0xff] %vm51_vm1, %v6115_v25  ;;  %v5253_v55 = vadd.f32 %v7050_v7, %v5218_v61 }
 0x496   :  { %6975 = vmatmul.msk.f32.gmra.mxu2 %vm51_vm1, %v5466_v5  ;;  %v5967_v28 = vpop.f32.mrf.mxu3  ;;  %6267 = vmatpush.msrb.mxu1 %v6185_v18 }
 0x497   :  { %v5285_v47 = vmax.f32 %v5253_v55, 0.0  ;;  %v6049_v35 = vadd.f32 %v5967_v28, %v5727_v43  ;;  %6389 = vmatpush.msra.mxu2 %v7023_v10  ;;  %v6173_v10 = vld [vmem:[#allocation2 + $0x30] sm:$0xff] }
 0x498   :  { %v5347_v62 = vld [vmem:[#allocation2 + $0x110] sm:$0xff]  ;;  %v9412_v26 = vpop.f32.mrf.mxu1  ;;  %6362 = vmatpush.msra.mxu1 %v9115_v20 }
 0x499   :  { %5317 = vst.msk [vmem:[#allocation2 + $0x118] sm:$0xff] %vm51_vm1, %v5285_v47  ;;  %v6084_v42 = vadd.f32 %v9215_v37, %v6049_v35  ;;  %v9416_v12 = vpop.f32.mrf.mxu2  ;;  %v5379_v44 = vmax.f32 %v5283_v30, %v5347_v62  ;;  %v5381_v31 = vmax.f32 %v5285_v47, %v9427_v22  ;;  %v5736_v39 = vadd.f32 %v9400_v50, %v9412_v26  ;;  %v5472_v35 = vld [vmem:[#allocation2 + $0x128] sm:$0xff] }
 0x49a   :  { %v5467_v3 = vld [vmem:[#allocation2 + $0x100] sm:$0xff]  ;;  %6363 = vmatpush.msra.mxu1 %v9175_v59  ;;  %6390 = vmatpush.msra.mxu2 %v7022_v17  ;;  %v9504_v59 = vld [vmem:[%s9645_s13 + $0x58] sm:$0xff]  ;;  %v5831_v17 = vld [vmem:[#allocation2 + $0x130] sm:$0xff] }
 0x49b   :  { %v6116_v60 = vmax.f32 %v6084_v42, 0.0  ;;  %6942 = vmatmul.msk.f32.gmra.mxu1 %vm51_vm1, %v5467_v3  ;;  %7004 = vmatmul.msk.f32.gmra.mxu3 %vm51_vm1, %v5467_v3  ;;  %5411 = vst.msk [vmem:[#allocation2 + $0x108] sm:$0xff] %vm51_vm1, %v5379_v44 }
 0x49c   :  { %v6174_v6 = vld [vmem:[#allocation2 + $0x50] sm:$0xff]  ;;  %6364 = vmatpush.msra.mxu1 %v9252_v38  ;;  %6391 = vmatpush.msra.mxu2 %v7021_v36 }
 0x49d   :  { %6148 = vst.msk [vmem:[#allocation2 + $0x58] sm:$0xff] %vm51_vm1, %v6116_v60  ;;  %v6180_v41 = vmax.f32 %v6113_v49, %v6174_v6  ;;  %6310 = vmatpush.msrb.mxu3 %v9504_v59  ;;  %v9532_v36 = vld [vmem:[%s9645_s13 + $0x50] sm:$0xff] }
 0x49e   :  { %6976 = vmatmul.msk.f32.gmra.mxu2 %vm51_vm1, %v5467_v3  ;;  %v5970_v7 = vpop.f32.mrf.mxu3  ;;  %6365 = vmatpush.msra.mxu1 %v9360_v58 }
 0x49f   :  { %v6050_v0 = vadd.f32 %v5970_v7, %v5730_v40  ;;  %7028 = vmatmul.msk.f32.vlgmr.msra.gmra.mxu0 %vm51_vm1, %v6180_v41  ;;  %6392 = vmatpush.msra.mxu2 %v7020_v14  ;;  %v6179_v40 = vmax.f32 %v6109_v23, %v6173_v10 }
 0x4a0   :  { %v5348_v49 = vld [vmem:[#allocation2 + $0x118] sm:$0xff]  ;;  %v5619_v46 = vpop.f32.mrf.mxu1  ;;  %6366 = vmatpush.msra.mxu1 %v9437_v63  ;;  %6311 = vmatpush.msrb.mxu3 %v9532_v36 }
 0x4a1   :  { %v5380_v30 = vmax.f32 %v5284_v8, %v5348_v49  ;;  %5413 = vst.msk [vmem:[#allocation2 + $0x118] sm:$0xff] %vm51_vm1, %v5381_v31  ;;  %v9451_v4 = vadd.f32 %v9215_v37, %v6050_v0  ;;  %v9453_v57 = vpop.f32.mrf.mxu2  ;;  %v5739_v20 = vadd.f32 %v9416_v12, %v5619_v46 }
 0x4a2   :  { %v5468_v52 = vld [vmem:[#allocation2 + $0x108] sm:$0xff]  ;;  %6367 = vmatpush.msra.mxu1 %v6187_v1 }
 0x4a3   :  { %5412 = vst.msk [vmem:[#allocation2 + $0x110] sm:$0xff] %vm51_vm1, %v5380_v30  ;;  %v6117_v33 = vmax.f32 %v9451_v4, 0.0  ;;  %6943 = vmatmul.msk.f32.gmra.mxu1 %vm51_vm1, %v5468_v52  ;;  %7005 = vmatmul.msk.f32.gmra.mxu3 %vm51_vm1, %v5468_v52 }
 0x4a4   :  { %6368 = vmatpush.msra.mxu1 %v6186_v48 }
 0x4a5   :  { %6149 = vst.msk [vmem:[#allocation2 + $0x60] sm:$0xff] %vm51_vm1, %v6117_v33 }
 0x4a6   :  { %6977 = vmatmul.msk.f32.gmra.mxu2 %vm51_vm1, %v5468_v52  ;;  %v5973_v29 = vpop.f32.mrf.mxu3  ;;  %6369 = vmatpush.msra.mxu1 %v6185_v18 }
 0x4a7   :  { %v6051_v2 = vadd.f32 %v5973_v29, %v5733_v56 }
 0x4a8   :  { %v5622_v24 = vpop.f32.mrf.mxu1  ;;  %v5470_v51 = vld [vmem:[#allocation2 + $0x118] sm:$0xff] }
 0x4a9   :  { %v6086_v15 = vadd.f32 %v9215_v37, %v6051_v2  ;;  %v5744_v54 = vpop.f32.mrf.mxu2  ;;  %v5742_v61 = vadd.f32 %v9453_v57, %v5622_v24  ;;  %v9543_v2 = vld [vmem:[%s9645_s13 + $0x48] sm:$0xff] }
 0x4aa   :  { %v5469_v16 = vld [vmem:[#allocation2 + $0x110] sm:$0xff]  ;;  %6312 = vmatpush.msrb.mxu3 %v9543_v2 }
 0x4ab   :  { %v6118_v9 = vmax.f32 %v6086_v15, 0.0  ;;  %6944 = vmatmul.msk.f32.gmra.mxu1 %vm51_vm1, %v5469_v16  ;;  %7006 = vmatmul.msk.f32.gmra.mxu3 %vm51_vm1, %v5469_v16 }
 0x4ad   :  { %6150 = vst.msk [vmem:[#allocation2 + $0x68] sm:$0xff] %vm51_vm1, %v6118_v9 }
 0x4ae   :  { %6978 = vmatmul.msk.f32.gmra.mxu2 %vm51_vm1, %v5469_v16  ;;  %v5976_v45 = vpop.f32.mrf.mxu3 }
 0x4af   :  { %v6052_v8 = vadd.f32 %v5976_v45, %v5736_v39 }
 0x4b0   :  { %v5625_v53 = vpop.f32.mrf.mxu1 }
 0x4b1   :  { %v6087_v21 = vadd.f32 %v9215_v37, %v6052_v8  ;;  %v5747_v34 = vpop.f32.mrf.mxu2  ;;  %v5745_v12 = vadd.f32 %v5744_v54, %v5625_v53 }
 0x4b3   :  { %v6119_v13 = vmax.f32 %v6087_v21, 0.0  ;;  %6945 = vmatmul.msk.f32.gmra.mxu1 %vm51_vm1, %v5470_v51  ;;  %7007 = vmatmul.msk.f32.gmra.mxu3 %vm51_vm1, %v5470_v51 }
 0x4b5   :  { %6151 = vst.msk [vmem:[#allocation2 + $0x70] sm:$0xff] %vm51_vm1, %v6119_v13 }
 0x4b6   :  { %6979 = vmatmul.msk.f32.gmra.mxu2 %vm51_vm1, %v5470_v51  ;;  %v5979_v38 = vpop.f32.mrf.mxu3 }
 0x4b7   :  { %v6053_v50 = vadd.f32 %v5979_v38, %v5739_v20 }
 0x4b8   :  { %v5628_v19 = vpop.f32.mrf.mxu1 }
 0x4b9   :  { %v6088_v58 = vadd.f32 %v9215_v37, %v6053_v50  ;;  %v5750_v27 = vpop.f32.mrf.mxu2  ;;  %v5748_v63 = vadd.f32 %v5747_v34, %v5628_v19 }
 0x4bb   :  { %v6120_v5 = vmax.f32 %v6088_v58, 0.0  ;;  %6946 = vmatmul.msk.f32.gmra.mxu1 %vm51_vm1, %v9427_v22  ;;  %7008 = vmatmul.msk.f32.gmra.mxu3 %vm51_vm1, %v9427_v22 }
 0x4bc   :  { %v6175_v25 = vld [vmem:[#allocation2 + $0x70] sm:$0xff] }
 0x4bd   :  { %6152 = vst.msk [vmem:[#allocation2 + $0x78] sm:$0xff] %vm51_vm1, %v6120_v5  ;;  %v6181_v43 = vmax.f32 %v6117_v33, %v6175_v25 }
 0x4be   :  { %v5982_v55 = vpop.f32.mrf.mxu3 }
 0x4bf   :  { %v6054_v28 = vadd.f32 %v5982_v55, %v5742_v61  ;;  %7030 = vmatmul.msk.f32.vlgmr.msrb.gmra.mxu2 %vm51_vm1, %v6181_v43 }
 0x4c0   :  { %v5631_v47 = vpop.f32.mrf.mxu1 }
 0x4c1   :  { %v6089_v62 = vadd.f32 %v9215_v37, %v6054_v28  ;;  %v5753_v26 = vpop.f32.mrf.mxu2  ;;  %v5751_v46 = vadd.f32 %v5750_v27, %v5631_v47  ;;  %v9555_v27 = vld [vmem:[%s9645_s13 + $0x40] sm:$0xff] }
 0x4c2   :  { %6313 = vmatpush.msrb.mxu3 %v9555_v27 }
 0x4c3   :  { %v6121_v42 = vmax.f32 %v6089_v62, 0.0  ;;  %6947 = vmatmul.msk.f32.gmra.mxu1 %vm51_vm1, %v5472_v35  ;;  %7009 = vmatmul.msk.f32.gmra.mxu3 %vm51_vm1, %v5472_v35 }
 0x4c5   :  { %6153 = vst.msk [vmem:[#allocation2 + $0x80] sm:$0xff] %vm51_vm1, %v6121_v42 }
 0x4c6   :  { %v5985_v44 = vpop.f32.mrf.mxu3 }
 0x4c7   :  { %v6055_v3 = vadd.f32 %v5985_v44, %v5745_v12 }
 0x4c8   :  { %v5634_v60 = vpop.f32.mrf.mxu1 }
 0x4c9   :  { %v6090_v22 = vadd.f32 %v9215_v37, %v6055_v3  ;;  %v5756_v6 = vpop.f32.mrf.mxu2  ;;  %v5754_v29 = vadd.f32 %v5753_v26, %v5634_v60 }
 0x4cb   :  { %v6122_v41 = vmax.f32 %v6090_v22, 0.0  ;;  %7010 = vmatmul.msk.f32.gmra.mxu3 %vm51_vm1, %v5831_v17  ;;  %7029 = vmatmul.msk.f32.vlgmr.msrb.gmra.mxu1 %vm51_vm1, %v6179_v40  ;;  %v9566_v17 = vld [vmem:[%s9645_s13 + $0x38] sm:$0xff] }
 0x4cc   :  { %6314 = vmatpush.msrb.mxu3 %v9566_v17 }
 0x4cd   :  { %6154 = vst.msk [vmem:[#allocation2 + $0x88] sm:$0xff] %vm51_vm1, %v6122_v41 }
 0x4ce   :  { %v5988_v7 = vpop.f32.mrf.mxu3 }
 0x4cf   :  { %v6056_v31 = vadd.f32 %v5988_v7, %v5748_v63 }
 0x4d0   :  { %v5637_v0 = vpop.f32.mrf.mxu1 }
 0x4d1   :  { %v6091_v23 = vadd.f32 %v9215_v37, %v6056_v31  ;;  %v5759_v14 = vpop.f32.mrf.mxu2  ;;  %v5757_v9 = vadd.f32 %v5756_v6, %v5637_v0 }
 0x4d3   :  { %v6123_v49 = vmax.f32 %v6091_v23, 0.0  ;;  %7011 = vmatmul.msk.f32.gmra.mxu3 %vm51_vm1, %v5832_v32 }
 0x4d5   :  { %6155 = vst.msk [vmem:[#allocation2 + $0x90] sm:$0xff] %vm51_vm1, %v6123_v49 }
 0x4d6   :  { %v5991_v30 = vpop.f32.mrf.mxu3 }
 0x4d7   :  { %v6057_v4 = vadd.f32 %v5991_v30, %v5751_v46 }
 0x4d8   :  { %v5640_v57 = vpop.f32.mrf.mxu1 }
 0x4d9   :  { %v6092_v52 = vadd.f32 %v9215_v37, %v6057_v4  ;;  %v5762_v33 = vpop.f32.mrf.mxu2  ;;  %v5760_v34 = vadd.f32 %v5759_v14, %v5640_v57 }
 0x4db   :  { %v6124_v56 = vmax.f32 %v6092_v52, 0.0 }
 0x4dd   :  { %6156 = vst.msk [vmem:[#allocation2 + $0x98] sm:$0xff] %vm51_vm1, %v6124_v56 }
 0x4de   :  { %v5994_v1 = vpop.f32.mrf.mxu3 }
 0x4df   :  { %v6058_v24 = vadd.f32 %v5994_v1, %v5754_v29 }
 0x4e0   :  { %v5643_v15 = vpop.f32.mrf.mxu1 }
 0x4e1   :  { %v6093_v54 = vadd.f32 %v9215_v37, %v6058_v24  ;;  %v5765_v48 = vpop.f32.mrf.mxu2  ;;  %v5763_v58 = vadd.f32 %v5762_v33, %v5643_v15 }
 0x4e3   :  { %v6125_v16 = vmax.f32 %v6093_v54, 0.0  ;;  %v6218_v54 = vld [vmem:[%s9645_s13 + $0x30] sm:$0xff] }
 0x4e4   :  { %6315 = vmatpush.msrb.mxu3 %v6218_v54 }
 0x4e5   :  { %6157 = vst.msk [vmem:[#allocation2 + $0xa0] sm:$0xff] %vm51_vm1, %v6125_v16 }
 0x4e6   :  { %v5997_v18 = vpop.f32.mrf.mxu3 }
 0x4e7   :  { %v6059_v39 = vadd.f32 %v5997_v18, %v5757_v9 }
 0x4e8   :  { %v5646_v45 = vpop.f32.mrf.mxu1 }
 0x4e9   :  { %v6094_v8 = vadd.f32 %v9215_v37, %v6059_v39  ;;  %v5768_v53 = vpop.f32.mrf.mxu2  ;;  %v5766_v35 = vadd.f32 %v5765_v48, %v5646_v45 }
 0x4eb   :  { %v6126_v21 = vmax.f32 %v6094_v8, 0.0 }
 0x4ed   :  { %6158 = vst.msk [vmem:[#allocation2 + $0xa8] sm:$0xff] %vm51_vm1, %v6126_v21 }
 0x4ee   :  { %v6000_v51 = vpop.f32.mrf.mxu3 }
 0x4ef   :  { %v6060_v13 = vadd.f32 %v6000_v51, %v5760_v34  ;;  %v6217_v34 = vld [vmem:[%s9645_s13 + $0x28] sm:$0xff] }
 0x4f0   :  { %v5649_v20 = vpop.f32.mrf.mxu1  ;;  %6316 = vmatpush.msrb.mxu3 %v6217_v34 }
 0x4f1   :  { %v6095_v38 = vadd.f32 %v9215_v37, %v6060_v13  ;;  %v5771_v50 = vpop.f32.mrf.mxu2  ;;  %v5769_v60 = vadd.f32 %v5768_v53, %v5649_v20  ;;  %v6216_v20 = vld [vmem:[%s9645_s13 + $0x20] sm:$0xff] }
 0x4f2   :  { %6317 = vmatpush.msrb.mxu3 %v6216_v20 }
 0x4f3   :  { %v6127_v19 = vmax.f32 %v6095_v38, 0.0 }
 0x4f5   :  { %6159 = vst.msk [vmem:[#allocation2 + $0xb0] sm:$0xff] %vm51_vm1, %v6127_v19 }
 0x4f6   :  { %v6003_v5 = vpop.f32.mrf.mxu3 }
 0x4f7   :  { %v6061_v25 = vadd.f32 %v6003_v5, %v5763_v58  ;;  %v6214_v58 = vld [vmem:[%s9645_s13 + $0x10] sm:$0xff] }
 0x4f8   :  { %v5652_v61 = vpop.f32.mrf.mxu1 }
 0x4f9   :  { %v6096_v43 = vadd.f32 %v9215_v37, %v6061_v25  ;;  %v5774_v55 = vpop.f32.mrf.mxu2  ;;  %v5772_v31 = vadd.f32 %v5771_v50, %v5652_v61  ;;  %v6215_v50 = vld [vmem:[%s9645_s13 + $0x18] sm:$0xff] }
 0x4fa   :  { %6318 = vmatpush.msrb.mxu3 %v6215_v50 }
 0x4fb   :  { %v6128_v28 = vmax.f32 %v6096_v43, 0.0  ;;  %v6213_v43 = vld [vmem:[%s9645_s13 + $0x8] sm:$0xff] }
 0x4fc   :  { %v6176_v47 = vld [vmem:[#allocation2 + $0xb0] sm:$0xff]  ;;  %6319 = vmatpush.msrb.mxu3 %v6214_v58 }
 0x4fd   :  { %6160 = vst.msk [vmem:[#allocation2 + $0xb8] sm:$0xff] %vm51_vm1, %v6128_v28  ;;  %v6182_v62 = vmax.f32 %v6125_v16, %v6176_v47  ;;  %v6212_v47 = vld [vmem:[%s9645_s13] sm:$0xff] }
 0x4fe   :  { %v6006_v26 = vpop.f32.mrf.mxu3  ;;  %6320 = vmatpush.msrb.mxu3 %v6213_v43 }
 0x4ff   :  { %v6062_v42 = vadd.f32 %v6006_v26, %v5766_v35  ;;  %7034 = vmatmul.msk.f32.vlgmr.msra.gmra.mxu1 %vm51_vm1, %v6182_v62 }
 0x500   :  { %v5655_v12 = vpop.f32.mrf.mxu1  ;;  %6321 = vmatpush.msrb.mxu3 %v6212_v47 }
 0x501   :  { %v6097_v44 = vadd.f32 %v9215_v37, %v6062_v42  ;;  %v5777_v10 = vpop.f32.mrf.mxu2  ;;  %v5775_v30 = vadd.f32 %v5774_v55, %v5655_v12 }
 0x502   :  { %7036 = vmatpush.msk.msra.mxu3 %vm6302_vm11, %v9469_v11 }
 0x503   :  { %v6129_v3 = vmax.f32 %v6097_v44, 0.0 }
 0x504   :  { %6407 = vmatpush.msra.mxu3 %v9504_v59 }
 0x505   :  { %6161 = vst.msk [vmem:[#allocation2 + $0xc0] sm:$0xff] %vm51_vm1, %v6129_v3 }
 0x506   :  { %v6009_v22 = vpop.f32.mrf.mxu3  ;;  %6408 = vmatpush.msra.mxu3 %v9532_v36 }
 0x507   :  { %v6063_v6 = vadd.f32 %v6009_v22, %v5769_v60 }
 0x508   :  { %v5658_v40 = vpop.f32.mrf.mxu1  ;;  %6409 = vmatpush.msra.mxu3 %v9543_v2 }
 0x509   :  { %v6098_v41 = vadd.f32 %v9215_v37, %v6063_v6  ;;  %v5780_v63 = vpop.f32.mrf.mxu2  ;;  %v5778_v24 = vadd.f32 %v5777_v10, %v5658_v40 }
 0x50a   :  { %6410 = vmatpush.msra.mxu3 %v9555_v27 }
 0x50b   :  { %v6130_v7 = vmax.f32 %v6098_v41, 0.0 }
 0x50c   :  { %6411 = vmatpush.msra.mxu3 %v9566_v17 }
 0x50d   :  { %6162 = vst.msk [vmem:[#allocation2 + $0xc8] sm:$0xff] %vm51_vm1, %v6130_v7 }
 0x50e   :  { %v6012_v0 = vpop.f32.mrf.mxu3  ;;  %6412 = vmatpush.msra.mxu3 %v6218_v54 }
 0x50f   :  { %v6064_v32 = vadd.f32 %v6012_v0, %v5772_v31 }
 0x510   :  { %v5661_v23 = vpop.f32.mrf.mxu1  ;;  %6413 = vmatpush.msra.mxu3 %v6217_v34 }
 0x511   :  { %v6099_v14 = vadd.f32 %v9215_v37, %v6064_v32  ;;  %v5783_v49 = vpop.f32.mrf.mxu2  ;;  %v5781_v8 = vadd.f32 %v5780_v63, %v5661_v23 }
 0x512   :  { %6414 = vmatpush.msra.mxu3 %v6216_v20 }
 0x513   :  { %v6131_v46 = vmax.f32 %v6099_v14, 0.0  ;;  %v6211_v14 = vld [vmem:[%s9644_s12] sm:$0x1] }
 0x514   :  { %6415 = vmatpush.msra.mxu3 %v6215_v50 }
 0x515   :  { %6163 = vst.msk [vmem:[#allocation2 + $0xd0] sm:$0xff] %vm51_vm1, %v6131_v46 }
 0x516   :  { %v6015_v4 = vpop.f32.mrf.mxu3  ;;  %6416 = vmatpush.msra.mxu3 %v6214_v58 }
 0x517   :  { %v6065_v57 = vadd.f32 %v6015_v4, %v5775_v30 }
 0x518   :  { %v5664_v52 = vpop.f32.mrf.mxu1  ;;  %6417 = vmatpush.msra.mxu3 %v6213_v43 }
 0x519   :  { %v6100_v33 = vadd.f32 %v9215_v37, %v6065_v57  ;;  %v5786_v56 = vpop.f32.mrf.mxu2  ;;  %v5784_v19 = vadd.f32 %v5783_v49, %v5664_v52 }
 0x51a   :  { %6418 = vmatpush.msra.mxu3 %v6212_v47 }
 0x51b   :  { %v6132_v29 = vmax.f32 %v6100_v33, 0.0 }
 0x51c   :  { %v6177_v1 = vld [vmem:[#allocation2 + $0xd0] sm:$0xff]  ;;  %v6246_v17 = vpop.f32.mrf.mxu0 }
 0x51d   :  { %6164 = vst.msk [vmem:[#allocation2 + $0xd8] sm:$0xff] %vm51_vm1, %v6132_v29  ;;  %v6183_v15 = vmax.f32 %v6129_v3, %v6177_v1 }
 0x51e   :  { %v6018_v48 = vpop.f32.mrf.mxu3 }
 0x51f   :  { %v6066_v16 = vadd.f32 %v6018_v48, %v5778_v24  ;;  %7033 = vmatmul.msk.f32.vlgmr.msrb.gmra.mxu0 %vm51_vm1, %v6183_v15 }
 0x520   :  { %v5667_v9 = vpop.f32.mrf.mxu1 }
 0x521   :  { %v6101_v18 = vadd.f32 %v9215_v37, %v6066_v16  ;;  %v5789_v45 = vpop.f32.mrf.mxu2  ;;  %v5787_v62 = vadd.f32 %v5786_v56, %v5667_v9 }
 0x523   :  { %v6133_v39 = vmax.f32 %v6101_v18, 0.0 }
 0x525   :  { %6165 = vst.msk [vmem:[#allocation2 + $0xe0] sm:$0xff] %vm51_vm1, %v6133_v39 }
 0x526   :  { %v6021_v53 = vpop.f32.mrf.mxu3 }
 0x527   :  { %v6067_v21 = vadd.f32 %v6021_v53, %v5781_v8 }
 0x528   :  { %v5670_v51 = vpop.f32.mrf.mxu1 }
 0x529   :  { %v6102_v13 = vadd.f32 %v9215_v37, %v6067_v21  ;;  %v5792_v5 = vpop.f32.mrf.mxu2  ;;  %v5790_v11 = vadd.f32 %v5789_v45, %v5670_v51  ;;  %v6225_v21 = vld [vmem:[%s9646_s14] sm:$0x1] }
 0x52b   :  { %v6134_v38 = vmax.f32 %v6102_v13, 0.0 }
 0x52d   :  { %6166 = vst.msk [vmem:[#allocation2 + $0xe8] sm:$0xff] %vm51_vm1, %v6134_v38 }
 0x52e   :  { %v6024_v25 = vpop.f32.mrf.mxu3 }
 0x52f   :  { %v6068_v61 = vadd.f32 %v6024_v25, %v5784_v19 }
 0x530   :  { %v5673_v55 = vpop.f32.mrf.mxu1 }
 0x531   :  { %v6103_v28 = vadd.f32 %v9215_v37, %v6068_v61  ;;  %v5795_v12 = vpop.f32.mrf.mxu2  ;;  %v5793_v27 = vadd.f32 %v5792_v5, %v5673_v55 }
 0x533   :  { %v6135_v35 = vmax.f32 %v6103_v28, 0.0 }
 0x535   :  { %6167 = vst.msk [vmem:[#allocation2 + $0xf0] sm:$0xff] %vm51_vm1, %v6135_v35 }
 0x536   :  { %v6027_v26 = vpop.f32.mrf.mxu3 }
 0x537   :  { %v6069_v42 = vadd.f32 %v6027_v26, %v5787_v62 }
 0x538   :  { %v5676_v44 = vpop.f32.mrf.mxu1 }
 0x539   :  { %v6104_v10 = vadd.f32 %v9215_v37, %v6069_v42  ;;  %v5798_v2 = vpop.f32.mrf.mxu2  ;;  %v5796_v30 = vadd.f32 %v5795_v12, %v5676_v44 }
 0x53b   :  { %v6136_v3 = vmax.f32 %v6104_v10, 0.0 }
 0x53c   :  { %v6178_v60 = vld [vmem:[#allocation2 + $0xf0] sm:$0xff] }
 0x53d   :  { %6168 = vst.msk [vmem:[#allocation2 + $0xf8] sm:$0xff] %vm51_vm1, %v6136_v3  ;;  %v6184_v22 = vmax.f32 %v6133_v39, %v6178_v60 }
 0x53e   :  { %v6030_v59 = vpop.f32.mrf.mxu3 }
 0x53f   :  { %v6070_v6 = vadd.f32 %v6030_v59, %v5790_v11  ;;  %7035 = vmatmul.msk.f32.vlgmr.msra.gmra.mxu2 %vm51_vm1, %v6184_v22 }
 0x540   :  { %v5679_v36 = vpop.f32.mrf.mxu1 }
 0x541   :  { %v6105_v40 = vadd.f32 %v9215_v37, %v6070_v6  ;;  %v5799_v1 = vadd.f32 %v5798_v2, %v5679_v36 }
 0x542   :  { %v6292_v23 = vpop.f32.mrf.mxu2 }
 0x543   :  { %v6137_v41 = vmax.f32 %v6105_v40, 0.0 }
 0x545   :  { %6169 = vst.msk [vmem:[#allocation2 + $0x100] sm:$0xff] %vm51_vm1, %v6137_v41 }
 0x546   :  { %v6033_v63 = vpop.f32.mrf.mxu3 }
 0x547   :  { %v6071_v7 = vadd.f32 %v6033_v63, %v5793_v27 }
 0x548   :  { %v6269_v31 = vpop.f32.mrf.mxu1 }
 0x549   :  { %v6106_v0 = vadd.f32 %v9215_v37, %v6071_v7  ;;  %v6270_v32 = vadd.f32 %v6269_v31, %v6246_v17 }
 0x54b   :  { %v6138_v49 = vmax.f32 %v6106_v0, 0.0  ;;  %v6295_v46 = vadd.f32 %v6292_v23, %v6270_v32 }
 0x54d   :  { %6170 = vst.msk [vmem:[#allocation2 + $0x108] sm:$0xff] %vm51_vm1, %v6138_v49  ;;  %v6296_v4 = vadd.f32 %v6295_v46, %v6211_v14 }
 0x54e   :  { %v6036_v57 = vpop.f32.mrf.mxu3 }
 0x54f   :  { %v6297_v52 = vmax.f32 %v6296_v4, 0.0  ;;  %v6072_v33 = vadd.f32 %v6036_v57, %v5796_v30 }
 0x551   :  { %v6107_v56 = vadd.f32 %v9215_v37, %v6072_v33  ;;  %7032 = vmatmul.msk.f32.vlgmr.msrb.gmra.mxu3 %vm6298_vm12, %v6297_v52 }
 0x553   :  { %v6139_v29 = vmax.f32 %v6107_v56, 0.0 }
 0x555   :  { %6171 = vst.msk [vmem:[#allocation2 + $0x110] sm:$0xff] %vm51_vm1, %v6139_v29 }
 0x556   :  { %v6039_v24 = vpop.f32.mrf.mxu3 }
 0x557   :  { %v6073_v15 = vadd.f32 %v6039_v24, %v5799_v1 }
 0x559   :  { %v6108_v54 = vadd.f32 %v9215_v37, %v6073_v15 }
 0x55b   :  { %v6140_v48 = vmax.f32 %v6108_v54, 0.0 }
 0x55d   :  { %6172 = vst.msk [vmem:[#allocation2 + $0x118] sm:$0xff] %vm51_vm1, %v6140_v48 }
 0x57c   :  { %v6371_v9 = vpop.f32.mrf.mxu1 }
 0x59c   :  { %v6348_v16 = vpop.f32.mrf.mxu0 }
 0x59d   :  { %v6372_v18 = vadd.f32 %v6371_v9, %v6348_v16 }
 0x5c2   :  { %v6394_v39 = vpop.f32.mrf.mxu2 }
 0x5c3   :  { %v6397_v45 = vadd.f32 %v6394_v39, %v6372_v18 }
 0x5c5   :  { %v6398_v8 = vadd.f32 %v6397_v45, %v6211_v14 }
 0x5c7   :  { %v6399_v53 = vmax.f32 %v6398_v8, 0.0 }
 0x5c9   :  { %7037 = vmatmul.msk.f32.vlgmr.msra.gmra.mxu3 %vm6298_vm12, %v6399_v53 }
 0x5d4   :  { %v6323_v34 = vpop.f32.mrf.mxu3 }
 0x5d5   :  { %v6324_v51 = vadd.f32 %v6323_v34, %v6225_v21 }
 0x5d7   :  { %6327 = vst.msk [vmem:[#allocation3] sm:$0x1] %vm6326_vm13, %v6324_v51 }
 0x64c   :  { %v6420_v37 = vpop.f32.mrf.mxu3 }
 0x64d   :  { %v6421_v13 = vadd.f32 %v6420_v37, %v6225_v21 }
 0x64f   :  { %6423 = vst.msk [vmem:[#allocation3 + $0x1] sm:$0x1] %vm6326_vm13, %v6421_v13 }
 0x650   :  { %6434 = dma.vmem_to_hbm [thread:$0]  %s6430_s11, 32, %s6432_s2, [#allocation4]  }
 0x651   :  { %7075 = dma.done.wait [#allocation4], 32  }
 0x652   :  { %7076 = vsyncadd [#allocation4], 4294967264 }
 0x653   :  { %6439 = vsyncpa [#allocation4], 1 }

</bundles_post_ra>
